<compile_context>
chip_gen: v6e
topology: v6e:2x2x1
jax: 0.10.0
libtpu: 0.0.40
codegen_flags: <defaults>
</compile_context>

<pallas_src>
import functools

import jax
import jax.numpy as jnp
from jax.experimental import pallas as pl
from jax.experimental.pallas import tpu as pltpu

BN_EPS = 1e-5
_SUBLANE = 8
_FEAT_ALIGN = 256   # v6e/v7x MXU is 2x256x256; 128-wide tiles run it half-width.


def _round_up(n, m):
    return (n + m - 1) // m * m


def _pad2d(a, rows, cols):
    r, c = a.shape
    if r == rows and c == cols:
        return a
    return jnp.pad(a, ((0, rows - r), (0, cols - c)))


def _divisors_desc(n, mult):
    """Divisors of n that are multiples of `mult` (plus n itself), descending."""
    divs = [d for d in range(mult, n + 1, mult) if n % d == 0]
    divs.append(n)
    return sorted(set(divs), reverse=True)


def _tpu_vmem_bytes():
    try:
        return int(pltpu.get_tpu_info().vmem_capacity_bytes)
    except Exception:
        return 64 * 1024 * 1024       # conservative fallback (v7x per-TC VMEM)


def _vmem_budget():
    # ~50 MiB on v7x (64 MiB VMEM), ~100 MiB on v5e/v6e (128 MiB VMEM).
    return int(0.78 * _tpu_vmem_bytes())


def _tile_cap(budget):
    # Bigger N tiles (fewer grid steps, wider MXU/stores) on 128 MiB chips.
    return 2048 if budget >= 72 * 1024 * 1024 else 512


def _compiler_params(vmem_need, n_axes):
    cap = _tpu_vmem_bytes()
    # Double-buffering is already counted inside vmem_need -> 1.15x headroom,
    # and never request all of physical VMEM (Mosaic internal scratch).
    limit = int(min(cap - 8 * 1024 * 1024,
                    max(32 * 1024 * 1024, int(vmem_need * 1.15))))
    return pltpu.CompilerParams(dimension_semantics=("parallel",) * n_axes,
                                vmem_limit_bytes=limit)


# ----------------------------- kernels -------------------------------------

def _linear_bn_relu_kernel(x_ref, w_ref, g_ref, beta_ref, o_ref, *,
                           inv_n, n_valid, zero_padded_rows):
    """out = relu(BN_train(x @ w)) for one (B_pad, tn) output tile.

    The Linear bias is dropped: under training-mode BatchNorm it cancels
    exactly.  Padded batch rows of x are zero, so their h rows are zero and
    the single-pass sums divided by the true batch size are exact.
    """
    h = jnp.dot(x_ref[...], w_ref[...], preferred_element_type=jnp.float32)

    # Single-pass statistics: no centered (Bp, tn) temp is materialized.
    s = jnp.sum(h, axis=0, keepdims=True)
    ss = jnp.sum(h * h, axis=0, keepdims=True)
    mu = s * inv_n
    var = jnp.maximum(ss * inv_n - mu * mu, 0.0)   # guard E[x^2]-E[x]^2 cancel

    # Fold the BN affine into a per-feature scale/shift (all (1, tn) math).
    scale = jax.lax.rsqrt(var + BN_EPS) * g_ref[...]
    shift = beta_ref[...] - mu * scale

    out = jnp.maximum(h * scale + shift, 0.0)
    if zero_padded_rows:
        # Keep padded batch rows exactly zero so the NEXT BN layer's
        # single-pass statistics remain exact.
        row_ids = jax.lax.broadcasted_iota(jnp.int32, out.shape, 0)
        out = jnp.where(row_ids < n_valid, out, 0.0)
    o_ref[...] = out.astype(o_ref.dtype)


def _linear_kernel(x_ref, w_ref, b_ref, o_ref):
    h = jnp.dot(x_ref[...], w_ref[...], preferred_element_type=jnp.float32)
    o_ref[...] = (h + b_ref[...]).astype(o_ref.dtype)


# ----------------------------- tile choosers --------------------------------

def _choose_tile_n(Bp, Kp, Np, x_bytes, o_bytes):
    """Largest feature tile (multiple of 256, divisor of Np) fitting VMEM.

    The resident activation slab is accounted with TWO pipeline buffers
    (Pallas may double-buffer it even for a constant index_map)."""
    budget = _vmem_budget()
    cap = _tile_cap(budget)

    def usage(tn):
        return (2 * Bp * Kp * x_bytes      # resident activation slab (2 bufs)
                + 2 * Kp * tn * 2          # double-buffered bf16 weight tile
                + 2 * Bp * tn * o_bytes    # double-buffered output tile
                + 8 * tn * 4)              # gamma / beta rows

    for tn in _divisors_desc(Np, _FEAT_ALIGN):
        if tn <= cap and usage(tn) <= budget:
            return tn
    # TODO(synk): add a batch (M) grid axis with a cross-tile BN-statistics
    # reduction for per-chip batches whose activation slab exceeds VMEM.
    raise ValueError(
        f"Projector fused layer does not fit in VMEM (batch_pad={Bp}, "
        f"K_pad={Kp}, N_pad={Np}, budget={budget} bytes); batch tiling with a "
        f"cross-tile BatchNorm reduction is required for this size.")


def _choose_tiles_mn(Bp, Kp, Np, x_bytes, o_bytes):
    """(tm, tn) for the final (BN-free) linear; its batch axis may be tiled."""
    budget = _vmem_budget()
    cap = _tile_cap(budget)

    def usage(tm, tn):
        return (2 * tm * Kp * x_bytes + 2 * Kp * tn * 2
                + 2 * tm * tn * o_bytes + 4 * tn * 4)

    for tm in _divisors_desc(Bp, _SUBLANE):
        for tn in _divisors_desc(Np, _FEAT_ALIGN):
            if tn <= cap and usage(tm, tn) <= budget:
                return tm, tn
    raise ValueError(
        f"Projector final layer does not fit in VMEM even at minimal tiles "
        f"(batch_pad={Bp}, K_pad={Kp}, N_pad={Np}, budget={budget} bytes).")


# ----------------------------- launchers ------------------------------------

def _fused_layer(x, w, g, beta, *, n_valid, zero_padded_rows, out_dtype):
    """relu(BN_train(x @ w)) with an N-tiled, pipelined Pallas kernel."""
    Bp, Kp = x.shape
    Np = w.shape[1]
    o_bytes = jnp.dtype(out_dtype).itemsize
    tn = _choose_tile_n(Bp, Kp, Np, x.dtype.itemsize, o_bytes)
    grid = (Np // tn,)

    kernel = functools.partial(
        _linear_bn_relu_kernel,
        inv_n=float(1.0 / n_valid),
        n_valid=n_valid,
        zero_padded_rows=bool(zero_padded_rows and (Bp != n_valid)))

    flops = 2 * Bp * Kp * Np + 8 * Bp * Np
    bytes_accessed = (Bp * Kp * x.dtype.itemsize + Kp * Np * 2 + 2 * Np * 4
                      + Bp * Np * o_bytes)
    vmem_need = (2 * Bp * Kp * x.dtype.itemsize + 2 * Kp * tn * 2
                 + 2 * Bp * tn * o_bytes + 8 * tn * 4)

    return pl.pallas_call(
        kernel,
        out_shape=jax.ShapeDtypeStruct((Bp, Np), out_dtype),
        grid=grid,
        in_specs=[
            # Resident activation slab (constant index map -> DMA'd once).
            # TODO(synk): pin to a single pipeline buffer (pl.Buffered(1)) on
            # v7x; the VMEM budget conservatively assumes 2 buffers today.
            pl.BlockSpec((Bp, Kp), lambda j: (0, 0)),
            pl.BlockSpec((Kp, tn), lambda j: (0, j)),   # weight tile (pipelined)
            pl.BlockSpec((1, tn), lambda j: (0, j)),    # gamma
            pl.BlockSpec((1, tn), lambda j: (0, j)),    # beta
        ],
        out_specs=pl.BlockSpec((Bp, tn), lambda j: (0, j)),
        compiler_params=_compiler_params(vmem_need, 1),
        cost_estimate=pl.CostEstimate(flops=flops, transcendentals=Np,
                                      bytes_accessed=bytes_accessed),
    )(x, w, g, beta)


def _final_linear(x, w, b, *, out_dtype):
    Bp, Kp = x.shape
    Np = w.shape[1]
    o_bytes = jnp.dtype(out_dtype).itemsize
    tm, tn = _choose_tiles_mn(Bp, Kp, Np, x.dtype.itemsize, o_bytes)
    grid = (Bp // tm, Np // tn)

    flops = 2 * Bp * Kp * Np
    bytes_accessed = (Bp * Kp * x.dtype.itemsize
                      + (Bp // tm) * Kp * Np * 2 + Np * 4 + Bp * Np * o_bytes)
    vmem_need = (2 * tm * Kp * x.dtype.itemsize + 2 * Kp * tn * 2
                 + 2 * tm * tn * o_bytes + 4 * tn * 4)

    return pl.pallas_call(
        _linear_kernel,
        out_shape=jax.ShapeDtypeStruct((Bp, Np), out_dtype),
        grid=grid,
        in_specs=[
            pl.BlockSpec((tm, Kp), lambda i, j: (i, 0)),
            pl.BlockSpec((Kp, tn), lambda i, j: (0, j)),
            pl.BlockSpec((1, tn), lambda i, j: (0, j)),
        ],
        out_specs=pl.BlockSpec((tm, tn), lambda i, j: (i, j)),
        compiler_params=_compiler_params(vmem_need, 2),
        cost_estimate=pl.CostEstimate(flops=flops, transcendentals=0,
                                      bytes_accessed=bytes_accessed),
    )(x, w, b)


# ----------------------------- forward --------------------------------------

def projector_forward(x, params, *, out_dtype=jnp.float32):
    """Projector forward. x: (B, rep_size). Returns (B, final_dim).

    out_dtype: prefer jnp.bfloat16 when the consumer (e.g. the Barlow-Twins
    cross-correlation) accumulates in f32 itself -- it cuts ~25% of the final
    layer's HBM traffic.  Default f32 matches the PyTorch module.
    """
    B, K = x.shape
    N1 = params["w1"].shape[1]
    N2 = params["w2"].shape[1]
    N3 = params["w3"].shape[1]

    Bp = _round_up(max(B, _SUBLANE), _SUBLANE)
    Kp = _round_up(K, _FEAT_ALIGN)
    N1p = _round_up(N1, _FEAT_ALIGN)
    N2p = _round_up(N2, _FEAT_ALIGN)
    N3p = _round_up(N3, _FEAT_ALIGN)

    f32, bf16 = jnp.float32, jnp.bfloat16

    def row(v, n):  # 1-D param -> lane-dense padded (1, n) f32 row
        return _pad2d(v.reshape(1, -1).astype(f32), 1, n)

    # Lane/sublane-dense zero padding; matmul operands in bf16.
    xp = _pad2d(x.astype(f32), Bp, Kp).astype(bf16)
    w1 = _pad2d(params["w1"].astype(f32), Kp, N1p).astype(bf16)
    w2 = _pad2d(params["w2"].astype(f32), N1p, N2p).astype(bf16)
    w3 = _pad2d(params["w3"].astype(f32), N2p, N3p).astype(bf16)

    # b1 / b2 are intentionally NOT used: the Linear bias cancels exactly
    # under training-mode BatchNorm.
    h = _fused_layer(xp, w1, row(params["g1"], N1p), row(params["beta1"], N1p),
                     n_valid=B, zero_padded_rows=True, out_dtype=bf16)
    h = _fused_layer(h, w2, row(params["g2"], N2p), row(params["beta2"], N2p),
                     n_valid=B, zero_padded_rows=False, out_dtype=bf16)
    out = _final_linear(h, w3, row(params["b3"], N3p), out_dtype=out_dtype)
    return out[:B, :N3]


# ----------------------------- init & refs ----------------------------------

def init_params(key, rep_size, final_dim):
    """PyTorch nn.Linear-style init. Weights stored transposed: (in, out)."""
    ks = jax.random.split(key, 6)

    def lin(kw, kb, fan_in, fan_out):
        bound = 1.0 / jnp.sqrt(fan_in)
        w = jax.random.uniform(kw, (fan_in, fan_out), jnp.float32, -bound, bound)
        b = jax.random.uniform(kb, (fan_out,), jnp.float32, -bound, bound)
        return w, b

    w1, b1 = lin(ks[0], ks[1], rep_size, final_dim)
    w2, b2 = lin(ks[2], ks[3], final_dim, final_dim)
    w3, b3 = lin(ks[4], ks[5], final_dim, final_dim)
    ones = jnp.ones((final_dim,), jnp.float32)
    zeros = jnp.zeros((final_dim,), jnp.float32)
    return {"w1": w1, "b1": b1, "g1": ones, "beta1": zeros,
            "w2": w2, "b2": b2, "g2": ones, "beta2": zeros,
            "w3": w3, "b3": b3}


def _bn_relu_ref(h, g, beta):
    mu = jnp.mean(h, axis=0, keepdims=True)
    var = jnp.mean((h - mu) ** 2, axis=0, keepdims=True)
    return jnp.maximum((h - mu) * jax.lax.rsqrt(var + BN_EPS) * g + beta, 0.0)


def _reference_forward_f32(x, p):
    h = _bn_relu_ref(x @ p["w1"] + p["b1"], p["g1"], p["beta1"])
    h = _bn_relu_ref(h @ p["w2"] + p["b2"], p["g2"], p["beta2"])
    return h @ p["w3"] + p["b3"]


def _reference_forward_bf16(x, p):
    """Matches the kernel's precision policy (bf16 matmul operands, f32 math)."""
    bf = jnp.bfloat16

    def mm(a, w):
        return jnp.dot(a.astype(bf), w.astype(bf),
                       preferred_element_type=jnp.float32)

    h = _bn_relu_ref(mm(x, p["w1"]) + p["b1"], p["g1"], p["beta1"])
    h = _bn_relu_ref(mm(h, p["w2"]) + p["b2"], p["g2"], p["beta2"])
    return mm(h, p["w3"]) + p["b3"]


if __name__ == "__main__":
    key = jax.random.PRNGKey(0)

    # Config 1: aligned, MXU-friendly shapes (multi-tile N grid).
    # Config 2: deliberately unaligned shapes to exercise padding + padded-row
    #           handling in the BN statistics.
    for (batch, rep_size, final_dim) in ((256, 512, 1024), (10, 48, 96)):
        kx, kp, key = jax.random.split(key, 3)
        x = jax.random.normal(kx, (batch, rep_size), jnp.float32)
        params = init_params(kp, rep_size, final_dim)

        out = jax.block_until_ready(projector_forward(x, params))
        assert out.shape == (batch, final_dim)
        assert out.dtype == jnp.float32

        ref_bf16 = _reference_forward_bf16(x, params)   # same precision policy
        ref_f32 = _reference_forward_f32(x, params)     # full-precision sanity
        assert jnp.allclose(out, ref_bf16, atol=2e-2, rtol=2e-2), \
            "mismatch vs bf16-matched reference"
        assert jnp.allclose(out, ref_f32, atol=1e-1, rtol=1e-1), \
            "mismatch vs f32 reference"

    print("KERNEL_OK")
</pallas_src>

<mosaic_0001>
module attributes {stable_mosaic.version = 11 : i64} {
  func.func @_linear_bn_relu_kernel(%arg0: i32, %arg1: memref<256x512xbf16, #tpu.memory_space<vmem>>, %arg2: memref<512x512xbf16, #tpu.memory_space<vmem>>, %arg3: memref<1x512xf32, #tpu.memory_space<vmem>>, %arg4: memref<1x512xf32, #tpu.memory_space<vmem>>, %arg5: memref<256x512xbf16, #tpu.memory_space<vmem>>) attributes {dimension_semantics = [#tpu.dimension_semantics<parallel>], iteration_bounds = array<i64: 2>, scalar_prefetch = 0 : i64, scratch_operands = 0 : i64, tpu.core_type = #tpu.core_type<tc>, window_params = [{pipeline_mode = #tpu.pipeline_mode<synchronous>, transform_indices = @transform_0, window_bounds = array<i64: 256, 512>}, {transform_indices = @transform_1, window_bounds = array<i64: 512, 512>}, {transform_indices = @transform_2, window_bounds = array<i64: 1, 512>}, {transform_indices = @transform_3, window_bounds = array<i64: 1, 512>}, {transform_indices = @transform_4, window_bounds = array<i64: 256, 512>}]} {
    %c0 = arith.constant 0 : index
    %c0_0 = arith.constant 0 : index
    %0 = vector.load %arg1[%c0, %c0_0] : memref<256x512xbf16, #tpu.memory_space<vmem>>, vector<256x512xbf16>
    %c0_1 = arith.constant 0 : index
    %c0_2 = arith.constant 0 : index
    %1 = vector.load %arg2[%c0_1, %c0_2] : memref<512x512xbf16, #tpu.memory_space<vmem>>, vector<512x512xbf16>
    %cst = arith.constant dense<0.000000e+00> : vector<256x512xf32>
    %2 = tpu.matmul %0, %1, %cst {dimension_numbers = #tpu.dot_dimension_numbers<[1], [0], [0], [1], [0, 0, 1, 1], [], []>} : vector<256x512xbf16>, vector<512x512xbf16>, vector<256x512xf32> -> vector<256x512xf32>
    %cst_3 = arith.constant dense<0.000000e+00> : vector<512xf32>
    %3 = vector.multi_reduction <add>, %2, %cst_3 [0] : vector<256x512xf32> to vector<512xf32>
    %4 = vector.shape_cast %3 : vector<512xf32> to vector<1x512xf32>
    %5 = arith.mulf %2, %2 : vector<256x512xf32>
    %cst_4 = arith.constant dense<0.000000e+00> : vector<512xf32>
    %6 = vector.multi_reduction <add>, %5, %cst_4 [0] : vector<256x512xf32> to vector<512xf32>
    %7 = vector.shape_cast %6 : vector<512xf32> to vector<1x512xf32>
    %cst_5 = arith.constant 3.906250e-03 : f32
    %8 = vector.broadcast %cst_5 : f32 to vector<1x512xf32>
    %9 = arith.mulf %4, %8 : vector<1x512xf32>
    %cst_6 = arith.constant 3.906250e-03 : f32
    %10 = vector.broadcast %cst_6 : f32 to vector<1x512xf32>
    %11 = arith.mulf %7, %10 : vector<1x512xf32>
    %12 = arith.mulf %9, %9 : vector<1x512xf32>
    %13 = arith.subf %11, %12 : vector<1x512xf32>
    %cst_7 = arith.constant 0.000000e+00 : f32
    %14 = vector.broadcast %cst_7 : f32 to vector<1x512xf32>
    %15 = arith.maximumf %13, %14 : vector<1x512xf32>
    %cst_8 = arith.constant 9.99999974E-6 : f32
    %16 = vector.broadcast %cst_8 : f32 to vector<1x512xf32>
    %17 = arith.addf %15, %16 : vector<1x512xf32>
    %18 = math.rsqrt %17 : vector<1x512xf32>
    %c0_9 = arith.constant 0 : index
    %c0_10 = arith.constant 0 : index
    %19 = vector.load %arg3[%c0_9, %c0_10] : memref<1x512xf32, #tpu.memory_space<vmem>>, vector<1x512xf32>
    %20 = arith.mulf %18, %19 : vector<1x512xf32>
    %c0_11 = arith.constant 0 : index
    %c0_12 = arith.constant 0 : index
    %21 = vector.load %arg4[%c0_11, %c0_12] : memref<1x512xf32, #tpu.memory_space<vmem>>, vector<1x512xf32>
    %22 = arith.mulf %9, %20 : vector<1x512xf32>
    %23 = arith.subf %21, %22 : vector<1x512xf32>
    %24 = vector.broadcast %20 : vector<1x512xf32> to vector<256x512xf32>
    %25 = arith.mulf %2, %24 : vector<256x512xf32>
    %26 = vector.broadcast %23 : vector<1x512xf32> to vector<256x512xf32>
    %27 = arith.addf %25, %26 : vector<256x512xf32>
    %cst_13 = arith.constant 0.000000e+00 : f32
    %28 = vector.broadcast %cst_13 : f32 to vector<256x512xf32>
    %29 = arith.maximumf %27, %28 : vector<256x512xf32>
    %30 = arith.truncf %29 : vector<256x512xf32> to vector<256x512xbf16>
    %c0_14 = arith.constant 0 : index
    %c0_15 = arith.constant 0 : index
    %31 = vector.load %arg5[%c0_14, %c0_15] : memref<256x512xbf16, #tpu.memory_space<vmem>>, vector<256x512xbf16>
    tpu.vector_store %arg5[%c0_14, %c0_15], %30 {strides = array<i32>} : memref<256x512xbf16, #tpu.memory_space<vmem>>, vector<256x512xbf16>,
    return
  }
  func.func @transform_0(%arg0: i32) -> (i32, i32) {
    %c0_i32 = arith.constant 0 : i32
    %c0_i32_0 = arith.constant 0 : i32
    %c0_i32_1 = arith.constant 0 : i32
    return %c0_i32, %c0_i32_0 : i32, i32
  }
  func.func @transform_1(%arg0: i32) -> (i32, i32) {
    %c0_i32 = arith.constant 0 : i32
    %c0_i32_0 = arith.constant 0 : i32
    return %c0_i32, %arg0 : i32, i32
  }
  func.func @transform_2(%arg0: i32) -> (i32, i32) {
    %c0_i32 = arith.constant 0 : i32
    %c0_i32_0 = arith.constant 0 : i32
    return %c0_i32, %arg0 : i32, i32
  }
  func.func @transform_3(%arg0: i32) -> (i32, i32) {
    %c0_i32 = arith.constant 0 : i32
    %c0_i32_0 = arith.constant 0 : i32
    return %c0_i32, %arg0 : i32, i32
  }
  func.func @transform_4(%arg0: i32) -> (i32, i32) {
    %c0_i32 = arith.constant 0 : i32
    %c0_i32_0 = arith.constant 0 : i32
    return %c0_i32, %arg0 : i32, i32
  }
}

</mosaic_0001>

<bundles_post_ra>
// kernel: tpu_custom_call.1
= control target key start
LH: loop header
LB: loop body
LE: loop exit
PB: predicated region body
PF: predicated region fallthrough
CT: control target
= control target key end

     0   :  { %s7715_s0 = inlined_call_operand.hbm [shape: bf16[256,512], index: 0, kind: input, shape index: {}]   ;;  %s7716_s1 = inlined_call_operand.hbm [shape: bf16[512,1024], index: 1, kind: input, shape index: {}]   ;;  %s7717_s2 = inlined_call_operand.hbm [shape: f32[1,1024], index: 2, kind: input, shape index: {}]   ;;  %s7718_s3 = inlined_call_operand.hbm [shape: f32[1,1024], index: 3, kind: input, shape index: {}]   ;;  %s7719_s4 = inlined_call_operand.hbm [shape: bf16[256,1024], index: 4, kind: output, shape index: {}]  }
   0x1   :  { %7927 = sst [smem:[#allocation124_spill]] %s7716_s1 }
   0x2   :  { %9 = vsyncpa [#allocation3], 0 }
   0x3   :  { %10 = vsyncpa [#allocation6], 0 }
   0x4   :  { %12 = vsyncpa [#allocation6 + $0x1], 0 }
   0x5   :  { %13 = vsyncpa [#allocation9], 0 }
   0x6   :  { %15 = vsyncpa [#allocation9 + $0x1], 0 }
   0x7   :  { %16 = vsyncpa [#allocation4], 0 }
   0x8   :  { %18 = vsyncpa [#allocation4 + $0x1], 0  ;;  %s4695_s15 = smov 0   ;;  %s4697_s16 = smov 0  }
   0x9   :  { %s4699_s17 = smov 0   ;;  %s4701_s18 = smov 0  }
   0xa LB: > { %s4716_s19 = sadd.s32 1, %s4656_s18   ;;  %s52_s20 = sadd.s32 1, %s4652_s17  ;;  %s4656_s18 = sphi %s4701_s18, %s8685_s18   ;;  %s4652_s17 = sphi %s4699_s17, %s8684_s17   ;;  %s4648_s16 = sphi %s4697_s16, %s8683_s16   ;;  %s4644_s15 = sphi %s4695_s15, %s8682_s15  }
   0xb   : > { %s49_s21 = ssub.s32 %s4656_s18, %s4716_s19  ;;  %p7720_p0 = scmp.ne.s32.totalorder %s4652_s17, %s4648_s16 }
   0xc   : > { %p50_p1 = scmp.eq.s32.totalorder %s49_s21, 0  ;;  %p60_p2 = scmp.eq.s32.totalorder %s4656_s18, 0 }
   0xd   : > { %p4135_p5 = scmp.lt.s32.totalorder %s4656_s18, 2  ;;  %s180_s23 = sand.u32 1, %s4656_s18  }
   0xe   : > { %s4725_s22 = scalar_select %p50_p1, %s4652_s17, %s52_s20  }
   0xf   : > { %p61_p3 = por %p60_p2, %p7720_p0  ;;  %s4734_s24 = sand.u32 1, %s4652_s17  }
  0x10   : > { %7928 = sst [smem:[#allocation15_spill]] %s4725_s22  ;;  %s3760_s25 = sshll.u32 %s4734_s24, 10 }
  0x11   : > { %s4036_s26 = sshll.u32 %s4656_s18, 8  ;;  %s7929_s1 = sld [smem:[#allocation124_spill]] }
  0x12   : > { %s184_s30 = scalar_lea.vmem [#allocation5], %s3760_s25  ;;  %p4743_p6 = pnand %p4135_p5, %p61_p3 }
  0x13   : > { %s191_s5 = sshll.u32 %s184_s30, 4  ;;  %s4749_s7 = scalar_lea.sflag [#allocation6], %s180_s23  ;;  %s4747_s5 = int_to_ptr.vmem [resolvable:$true] %s191_s5 }
  0x14   : > { %p4755_p8 = pneg %p4743_p6 }
  0x17   : > { %s4741_s29 = scalar_lea.hbm %s7929_s1, %s4036_s26  ;;  %s4479_s12 = scalar_lea.hbm %s7929_s1, 32768 }
  0x18   : > { %s4474_s8 = scalar_lea.hbm %s4741_s29, 16384  ;;  %p4480_p11 = scmp.lt.s32.totalorder %s4741_s29, %s7929_s1 }
  0x19   : > { %p4475_p7 = scmp.ne.s32.totalorder %s4741_s29, %s4474_s8  ;;  %p4481_p12 = scmp.lt.s32.totalorder %s4479_s12, %s4474_s8 }
  0x1b   : > { %p4477_p9 = pnand %p4755_p8, %p4475_p7  ;;  %p4482_p13 = por %p4481_p12, %p4480_p11 }
  0x1d   : > { %p4478_p10 = pneg %p4477_p9 }
  0x1f   : > { %p4483_p1 = pnand %p4482_p13, %p4478_p10 }
  0x21   : > { %4486 = shalt.err (!%p4483_p1)
}
  0x22   : > { %s4487_s20 = scalar_lea.vmem %s4747_s5, 16384  ;;  %s4658_s21 = smov [#allocation5]  }
  0x23   : > { %p4488_p2 = scmp.ne.s32.totalorder %s4747_s5, %s4487_s20  ;;  %s4492_s23 = sshll.u32 %s4658_s21, 4  ;;  %s4493_s23 = int_to_ptr.vmem [resolvable:$false] %s4492_s23 }
  0x24   : > { %s4494_s25 = scalar_lea.vmem %s4493_s23, 32768  ;;  %p4495_p7 = scmp.lt.s32.totalorder %s4747_s5, %s4493_s23 }
  0x25   : > { %p4490_p3 = pnand %p4488_p2, %p4755_p8  ;;  %p4496_p9 = scmp.lt.s32.totalorder %s4494_s25, %s4487_s20 }
  0x27   : > { %p4491_p5 = pneg %p4490_p3  ;;  %p4497_p4 = por %p4496_p9, %p4495_p7 }
  0x29   : > { %p4498_p0 = pnand %p4497_p4, %p4491_p5 }
  0x2b   : > { %4501 = shalt.err (!%p4498_p0)
}
  0x2c   : > { %s4659_s26 = smov 512   ;;  %s4660_s27 = smov 256  }
  0x2d   : > { %s4661_s28 = smov 16   ;;  %s4781_s30 = sadd.s32 4294967295, %s4656_s18  }
  0x2e   : > { %4123 = dma.hbm_to_vmem [thread:$0]  (!%p4743_p6), %s4741_s29, 16384, %s4747_s5, %s4749_s7, %s4659_s26, %s4660_s27, %s4661_s28  }
  0x2f   : > { %s3756_s8 = sadd.s32 4294967294, %s4656_s18   ;;  %p65_p0 = scmp.ne.s32.totalorder %s4648_s16, %s4644_s15 }
  0x30   : > { %p7725_p4 = scmp.eq.s32.totalorder %s4781_s30, 0  ;;  %p141_p10 = scmp.eq.s32.totalorder %s4781_s30, 1 }
  0x31   : > { %p147_p11 = scmp.eq.s32.totalorder %s3756_s8, 1  ;;  %p3757_p12 = scmp.ge.s32.totalorder %s4656_s18, 1 }
  0x32   : > { %p4791_p13 = por %p7725_p4, %p65_p0  ;;  %p7933_p1 = scmp.ne.s32.totalorder %s4652_s17, %s4648_s16 }
  0x33   : > { %p4802_p3 = por %p147_p11, %p65_p0  ;;  %p154_p5 = scmp.lt.s32.totalorder %s4656_s18, 3 }
  0x34   : > { %s7932_s10 = scalar_select %p4791_p13, 1, 0 }
  0x35   : > { %p4798_p2 = por %p141_p10, %p7933_p1  ;;  %p4807_p7 = pnand %p3757_p12, %p154_p5 }
  0x36   : > { %s7935_s5 = scalar_select %p4802_p3, 1, 0 }
  0x37   : > { %s7934_s29 = scalar_select %p4798_p2, 1, 0 }
  0x38   : > { %s7936_s11 = scalar_select %p4807_p7, 1, 0 }
  0x39   : > { %s4662_s12 = smov [#allocation2]   ;;  %s7723_s14 = sshll.u32 %s4734_s24, 2 }
  0x3a   : > { %s166_s13 = sshll.u32 %s4662_s12, 4  ;;  %p4116_p9 = pneg %p4807_p7  ;;  %s167_s13 = int_to_ptr.vmem [resolvable:$true] %s166_s13 }
  0x3b   : > { %s7724_s20 = sshll.u32 %s4656_s18, 6  ;;  %s205_s21 = scalar_lea.vmem [#allocation7], %s7723_s14 }
  0x3c   : > { %s213_s23 = sshll.u32 %s205_s21, 4  ;;  %p4117_p0 = pnand %p4116_p9, %p7725_p4  ;;  %s4826_s23 = int_to_ptr.vmem [resolvable:$true] %s213_s23 }
  0x3d   : > { %s4824_s8 = scalar_lea.hbm %s7717_s2, %s7724_s20  ;;  %s4513_s12 = scalar_lea.vmem %s167_s13, 8192 }
  0x3e   : > { %p4504_p10 = pneg %p4117_p0  ;;  %p4514_p11 = scmp.ne.s32.totalorder %s167_s13, %s4513_s12 }
  0x3f   : > { %p4521_p5 = scmp.lt.s32.totalorder %s167_s13, %s167_s13  ;;  %p4522_p3 = scmp.lt.s32.totalorder %s4513_s12, %s4513_s12 }
  0x40   : > { %p4516_p12 = pnand %p4514_p11, %p4504_p10 }
  0x41   : > { %p4523_p2 = por %p4522_p3, %p4521_p5 }
  0x42   : > { %p4517_p1 = pneg %p4516_p12 }
  0x44   : > { %p4524_p13 = pnand %p4523_p2, %p4517_p1 }
  0x46   : > { %4527 = shalt.err (!%p4524_p13)
}
  0x47   : > { %4119 = dma.hbm_to_vmem [thread:$0]  (!%p4117_p0), %s7715_s0, 8192, %s167_s13, [#allocation3], %s4660_s27, %s4660_s27, %s4661_s28  }
  0x48   : > { %s4528_s25 = scalar_lea.hbm %s4824_s8, 64  ;;  %s4533_s20 = scalar_lea.hbm %s7717_s2, 128 }
  0x49   : > { %p4529_p9 = scmp.ne.s32.totalorder %s4824_s8, %s4528_s25  ;;  %p4534_p13 = scmp.lt.s32.totalorder %s4824_s8, %s7717_s2 }
  0x4a   : > { %p4535_p2 = scmp.lt.s32.totalorder %s4533_s20, %s4528_s25 }
  0x4b   : > { %p4531_p10 = pnand %p4529_p9, %p4755_p8 }
  0x4c   : > { %p4536_p3 = por %p4535_p2, %p4534_p13 }
  0x4d   : > { %p4532_p11 = pneg %p4531_p10 }
  0x4f   : > { %p4537_p12 = pnand %p4536_p3, %p4532_p11 }
  0x51   : > { %4540 = shalt.err (!%p4537_p12)
}
  0x52   : > { %s4541_s27 = scalar_lea.vmem %s4826_s23, 64  ;;  %s4663_s28 = smov [#allocation7]  }
  0x53   : > { %p4542_p0 = scmp.ne.s32.totalorder %s4826_s23, %s4541_s27  ;;  %s4546_s13 = sshll.u32 %s4663_s28, 4  ;;  %s4547_s13 = int_to_ptr.vmem [resolvable:$false] %s4546_s13 }
  0x54   : > { %s4548_s14 = scalar_lea.vmem %s4547_s13, 128  ;;  %p4549_p9 = scmp.lt.s32.totalorder %s4826_s23, %s4547_s13 }
  0x55   : > { %p4544_p1 = pnand %p4542_p0, %p4755_p8  ;;  %p4550_p10 = scmp.lt.s32.totalorder %s4548_s14, %s4541_s27 }
  0x57   : > { %p4545_p5 = pneg %p4544_p1  ;;  %p4551_p4 = por %p4550_p10, %p4549_p9 }
  0x59   : > { %p4552_p7 = pnand %p4551_p4, %p4545_p5 }
  0x5b   : > { %4555 = shalt.err (!%p4552_p7)
}
  0x5c   : > { %4126 = dma.hbm_to_vmem [thread:$0]  (!%p4743_p6), %s4824_s8, 64, %s4826_s23, %s4749_s7  }
  0x5d   : > { %s7937_s1 = sshll.u32 %s4656_s18, 6  ;;  %s7938_s25 = sshll.u32 %s4734_s24, 2 }
  0x5e   : > { %s4860_s21 = scalar_lea.hbm %s7718_s3, %s7937_s1  ;;  %s224_s26 = scalar_lea.vmem [#allocation8], %s7938_s25 }
  0x5f   : > { %s232_s12 = sshll.u32 %s224_s26, 4  ;;  %s221_s27 = scalar_lea.sflag [#allocation9], %s4734_s24  ;;  %s233_s12 = int_to_ptr.vmem [resolvable:$true] %s232_s12 }
  0x60   : > { %s4556_s28 = scalar_lea.hbm %s4860_s21, 64  ;;  %s4561_s8 = scalar_lea.hbm %s7718_s3, 128 }
  0x61   : > { %p4557_p4 = scmp.ne.s32.totalorder %s4860_s21, %s4556_s28  ;;  %p4562_p13 = scmp.lt.s32.totalorder %s4860_s21, %s7718_s3 }
  0x62   : > { %p4563_p2 = scmp.lt.s32.totalorder %s4561_s8, %s4556_s28 }
  0x63   : > { %p4559_p7 = pnand %p4557_p4, %p4755_p8 }
  0x64   : > { %p4564_p3 = por %p4563_p2, %p4562_p13 }
  0x65   : > { %p4560_p11 = pneg %p4559_p7 }
  0x67   : > { %p4565_p12 = pnand %p4564_p3, %p4560_p11 }
  0x69   : > { %4568 = shalt.err (!%p4565_p12)
}
  0x6a   : > { %s4569_s1 = scalar_lea.vmem %s233_s12, 64  ;;  %s4664_s24 = smov [#allocation8]  }
  0x6b   : > { %p4570_p0 = scmp.ne.s32.totalorder %s233_s12, %s4569_s1  ;;  %s4574_s22 = sshll.u32 %s4664_s24, 4  ;;  %s4575_s22 = int_to_ptr.vmem [resolvable:$false] %s4574_s22 }
  0x6c   : > { %s4576_s20 = scalar_lea.vmem %s4575_s22, 128  ;;  %p4577_p9 = scmp.lt.s32.totalorder %s233_s12, %s4575_s22 }
  0x6d   : > { %p4572_p1 = pnand %p4570_p0, %p4755_p8  ;;  %p4578_p10 = scmp.lt.s32.totalorder %s4576_s20, %s4569_s1 }
  0x6f   : > { %p4573_p5 = pneg %p4572_p1  ;;  %p4579_p4 = por %p4578_p10, %p4577_p9 }
  0x71   : > { %p4580_p7 = pnand %p4579_p4, %p4573_p5 }
  0x73   : > { %4583 = shalt.err (!%p4580_p7)
}
  0x74   : > { %4129 = dma.hbm_to_vmem [thread:$0]  (!%p4743_p6), %s4860_s21, 64, %s233_s12, %s221_s27  }
  0x75   : > { %p7939_p11 = scmp.ne.s32.totalorder %s7936_s11, 0 }
  0x77   : > { %241 = sbr.rel (%p7939_p11) target bundleno = 838 (0x346), region = 36 }
  0x7c   : > { %p7940_p13 = scmp.eq.s32.totalorder %s4781_s30, 0 }
  0x7e   : > { %4627 = dma.done.wait (%p7940_p13), [#allocation3], 8192   ;;  %p7941_p8 = pmov %p7940_p13 }
  0x7f   : > { %s247_s9 = sand.u32 1, %s4781_s30   ;;  %s4889_s25 = sand.u32 1, %s4648_s16  }
  0x80   : > { %4629 = vsyncadd (%p7941_p8), [#allocation3], 4294959104  ;;  %s3771_s26 = sshll.u32 %s4889_s25, 10  ;;  %s248_s6 = scalar_lea.sflag [#allocation6], %s247_s9 }
  0x81   : > { %s4892_s28 = scalar_lea.vmem [#allocation5], %s3771_s26  ;;  %p7942_p6 = scmp.ne.s32.totalorder %s7932_s10, 0 }
  0x83   : > { %4631 = dma.done.wait (%p7942_p6), %s248_s6, 16448  }
  0x84   : > { %4633 = vsyncadd (%p7942_p6), %s248_s6, 4294950848  ;;  %s3772_s11 = sshll.u32 %s4889_s25, 2  ;;  %s266_s12 = scalar_lea.sflag [#allocation9], %s4889_s25 }
  0x85   : > { %s4899_s21 = scalar_lea.vmem [#allocation7], %s3772_s11  ;;  %s4902_s27 = scalar_lea.vmem [#allocation8], %s3772_s11 }
  0x86   : > { %4635 = dma.done.wait (%p7942_p6), %s266_s12, 64  }
  0x87   : > { %4637 = vsyncadd (%p7942_p6), %s266_s12, 4294967232  ;;  %v4178_v0 = vld [vmem:[%s4892_s28 + $0xe4] ss:$16 sps:$4 sm:$0xff]   ;;  %v4182_v2 = vld [vmem:[%s4892_s28 + $0xe0] ss:$16 sps:$4 sm:$0xff]   ;;  %s3774_s10 = sshll.u32 %s4889_s25, 9 }
  0x88   : > { %v4180_v1 = vld [vmem:[%s4892_s28 + $0x2e4] ss:$16 sps:$4 sm:$0xff]   ;;  %1460 = vmatprep.subr.bf16.mxu0 %v4178_v0  ;;  %v4183_v3 = vld [vmem:[%s4892_s28 + $0x2e0] ss:$16 sps:$4 sm:$0xff]   ;;  %v4960_v51 = vld [vmem:[#allocation2 + $0xc] ss:$16 sps:$4 sm:$0xff]  }
  0x89   : > { %1653 = vmatprep.subr.bf16.mxu1 %v4180_v1  ;;  %v4184_v4 = vld [vmem:[%s4892_s28 + $0xc4] ss:$16 sps:$4 sm:$0xff]   ;;  %1461 = vmatpush1.bf16.msra.mxu0 %v4182_v2  ;;  %v4188_v6 = vld [vmem:[%s4892_s28 + $0xc0] ss:$16 sps:$4 sm:$0xff]   ;;  %v4282_v2 = vld [vmem:[%s4892_s28 + $0xec] ss:$16 sps:$4 sm:$0xff]  }
  0x8a   : > { %1654 = vmatpush1.bf16.msra.mxu1 %v4183_v3  ;;  %v4186_v5 = vld [vmem:[%s4892_s28 + $0x2c4] ss:$16 sps:$4 sm:$0xff]   ;;  %1462 = vmatprep.subr.bf16.mxu0 %v4184_v4  ;;  %v4189_v7 = vld [vmem:[%s4892_s28 + $0x2c0] ss:$16 sps:$4 sm:$0xff]   ;;  %v4285_v3 = vld [vmem:[%s4892_s28 + $0x2ec] ss:$16 sps:$4 sm:$0xff]  }
  0x8b   : > { %1655 = vmatprep.subr.bf16.mxu1 %v4186_v5  ;;  %v4190_v8 = vld [vmem:[%s4892_s28 + $0xa4] ss:$16 sps:$4 sm:$0xff]   ;;  %v4194_v10 = vld [vmem:[%s4892_s28 + $0xa0] ss:$16 sps:$4 sm:$0xff]   ;;  %1685 = vmatprep.mubr.bf16.mxu1 %v4960_v51  ;;  %v4982_v5 = vld [vmem:[#allocation2 + $0x8] ss:$16 sps:$4 sm:$0xff]  }
  0x8c   : > { %v4192_v9 = vld [vmem:[%s4892_s28 + $0x2a4] ss:$16 sps:$4 sm:$0xff]   ;;  %v4195_v11 = vld [vmem:[%s4892_s28 + $0x2a0] ss:$16 sps:$4 sm:$0xff]   ;;  %s6793_s7 = scalar_lea.vmem [#allocation10], %s3774_s10  ;;  %s4103_s23 = sshll.u32 %s4781_s30, 8 }
  0x8d   : > { %1463 = vmatpush1.bf16.msra.mxu0 %v4188_v6  ;;  %v4196_v12 = vld [vmem:[%s4892_s28 + $0x84] ss:$16 sps:$4 sm:$0xff]   ;;  %v4200_v14 = vld [vmem:[%s4892_s28 + $0x80] ss:$16 sps:$4 sm:$0xff]   ;;  %v4280_v6 = vld [vmem:[%s4892_s28 + $0xe8] ss:$16 sps:$4 sm:$0xff]   ;;  %s7622_s14 = scalar_lea.hbm %s7719_s4, %s4103_s23 }
  0x8e   : > { %1656 = vmatpush1.bf16.msra.mxu1 %v4189_v7  ;;  %1464 = vmatprep.subr.bf16.mxu0 %v4190_v8  ;;  %v4198_v13 = vld [vmem:[%s4892_s28 + $0x284] ss:$16 sps:$4 sm:$0xff]   ;;  %v4201_v15 = vld [vmem:[%s4892_s28 + $0x280] ss:$16 sps:$4 sm:$0xff]   ;;  %v4283_v7 = vld [vmem:[%s4892_s28 + $0x2e8] ss:$16 sps:$4 sm:$0xff]  }
  0x8f   : > { %1657 = vmatprep.subr.bf16.mxu1 %v4192_v9  ;;  %v4202_v16 = vld [vmem:[%s4892_s28 + $0x64] ss:$16 sps:$4 sm:$0xff]   ;;  %v4206_v18 = vld [vmem:[%s4892_s28 + $0x60] ss:$16 sps:$4 sm:$0xff]   ;;  %v4988_v9 = vld [vmem:[#allocation2 + $0x2c] ss:$16 sps:$4 sm:$0xff]  }
  0x90   : > { %v4204_v17 = vld [vmem:[%s4892_s28 + $0x264] ss:$16 sps:$4 sm:$0xff]   ;;  %v4207_v19 = vld [vmem:[%s4892_s28 + $0x260] ss:$16 sps:$4 sm:$0xff]   ;;  %s3628_s30 = sshll.u32 %s6793_s7, 4  ;;  %s3615_s1 = scalar_lea.sflag [#allocation4], %s4889_s25  ;;  %s7644_s30 = int_to_ptr.vmem [resolvable:$true] %s3628_s30 }
  0x91   : > { %1465 = vmatpush1.bf16.msra.mxu0 %v4194_v10  ;;  %v4208_v20 = vld [vmem:[%s4892_s28 + $0x44] ss:$16 sps:$4 sm:$0xff]   ;;  %v4212_v22 = vld [vmem:[%s4892_s28 + $0x40] ss:$16 sps:$4 sm:$0xff]   ;;  %v4294_v10 = vld [vmem:[%s4892_s28 + $0xcc] ss:$16 sps:$4 sm:$0xff]  }
  0x92   : > { %1658 = vmatpush1.bf16.msra.mxu1 %v4195_v11  ;;  %1466 = vmatprep.subr.bf16.mxu0 %v4196_v12  ;;  %v4210_v21 = vld [vmem:[%s4892_s28 + $0x244] ss:$16 sps:$4 sm:$0xff]   ;;  %v4213_v23 = vld [vmem:[%s4892_s28 + $0x240] ss:$16 sps:$4 sm:$0xff]   ;;  %v4297_v11 = vld [vmem:[%s4892_s28 + $0x2cc] ss:$16 sps:$4 sm:$0xff]  }
  0x93   : > { %1659 = vmatprep.subr.bf16.mxu1 %v4198_v13  ;;  %v4214_v24 = vld [vmem:[%s4892_s28 + $0x24] ss:$16 sps:$4 sm:$0xff]   ;;  %v4218_v26 = vld [vmem:[%s4892_s28 + $0x20] ss:$16 sps:$4 sm:$0xff]   ;;  %v4292_v12 = vld [vmem:[%s4892_s28 + $0xc8] ss:$16 sps:$4 sm:$0xff]  }
  0x94   : > { %v4216_v25 = vld [vmem:[%s4892_s28 + $0x224] ss:$16 sps:$4 sm:$0xff]   ;;  %v4219_v27 = vld [vmem:[%s4892_s28 + $0x220] ss:$16 sps:$4 sm:$0xff]   ;;  %v4295_v13 = vld [vmem:[%s4892_s28 + $0x2c8] ss:$16 sps:$4 sm:$0xff]  }
  0x95   : > { %1467 = vmatpush1.bf16.msra.mxu0 %v4200_v14  ;;  %v4220_v28 = vld [vmem:[%s4892_s28 + $0x4] ss:$16 sps:$4 sm:$0xff]   ;;  %v4224_v30 = vld [vmem:[%s4892_s28] ss:$16 sps:$4 sm:$0xff]   ;;  %v4306_v14 = vld [vmem:[%s4892_s28 + $0xac] ss:$16 sps:$4 sm:$0xff]  }
  0x96   : > { %1660 = vmatpush1.bf16.msra.mxu1 %v4201_v15  ;;  %1468 = vmatprep.subr.bf16.mxu0 %v4202_v16  ;;  %v4222_v29 = vld [vmem:[%s4892_s28 + $0x204] ss:$16 sps:$4 sm:$0xff]   ;;  %v4225_v31 = vld [vmem:[%s4892_s28 + $0x200] ss:$16 sps:$4 sm:$0xff]   ;;  %v4309_v15 = vld [vmem:[%s4892_s28 + $0x2ac] ss:$16 sps:$4 sm:$0xff]  }
  0x97   : > { %1661 = vmatprep.subr.bf16.mxu1 %v4204_v17  ;;  %v4226_v32 = vld [vmem:[%s4892_s28 + $0x1e4] ss:$16 sps:$4 sm:$0xff]   ;;  %v4230_v34 = vld [vmem:[%s4892_s28 + $0x1e0] ss:$16 sps:$4 sm:$0xff]   ;;  %v5002_v17 = vld [vmem:[#allocation2 + $0x28] ss:$16 sps:$4 sm:$0xff]  }
  0x98   : > { %v4228_v33 = vld [vmem:[%s4892_s28 + $0x3e4] ss:$16 sps:$4 sm:$0xff]   ;;  %v4231_v35 = vld [vmem:[%s4892_s28 + $0x3e0] ss:$16 sps:$4 sm:$0xff]   ;;  %s4584_s24 = scalar_lea.vmem %s7644_s30, 8192  ;;  %p8678_p3 = scmp.ne.s32.totalorder %s7934_s29, 0 }
  0x99   : > { %1469 = vmatpush1.bf16.msra.mxu0 %v4206_v18  ;;  %v4232_v36 = vld [vmem:[%s4892_s28 + $0x1c4] ss:$16 sps:$4 sm:$0xff]   ;;  %v4236_v38 = vld [vmem:[%s4892_s28 + $0x1c0] ss:$16 sps:$4 sm:$0xff]   ;;  %p4585_p2 = scmp.ne.s32.totalorder %s7644_s30, %s4584_s24  ;;  %s4666_s22 = smov [#allocation10]  }
  0x9a   : > { %1662 = vmatpush1.bf16.msra.mxu1 %v4207_v19  ;;  %1470 = vmatprep.subr.bf16.mxu0 %v4208_v20  ;;  %v4234_v37 = vld [vmem:[%s4892_s28 + $0x3c4] ss:$16 sps:$4 sm:$0xff]   ;;  %v4237_v39 = vld [vmem:[%s4892_s28 + $0x3c0] ss:$16 sps:$4 sm:$0xff]   ;;  %v5006_v19 = vld [vmem:[#allocation2 + $0x4c] ss:$16 sps:$4 sm:$0xff]  }
  0x9b   : > { %1663 = vmatprep.subr.bf16.mxu1 %v4210_v21  ;;  %v4238_v40 = vld [vmem:[%s4892_s28 + $0x1a4] ss:$16 sps:$4 sm:$0xff]   ;;  %v4242_v42 = vld [vmem:[%s4892_s28 + $0x1a0] ss:$16 sps:$4 sm:$0xff]   ;;  %v4304_v20 = vld [vmem:[%s4892_s28 + $0xa8] ss:$16 sps:$4 sm:$0xff]   ;;  %p4586_p12 = pnand %p4585_p2, %p8678_p3 }
  0x9c   : > { %v4240_v41 = vld [vmem:[%s4892_s28 + $0x3a4] ss:$16 sps:$4 sm:$0xff]   ;;  %v4243_v43 = vld [vmem:[%s4892_s28 + $0x3a0] ss:$16 sps:$4 sm:$0xff]   ;;  %v4307_v21 = vld [vmem:[%s4892_s28 + $0x2a8] ss:$16 sps:$4 sm:$0xff]  }
  0x9d   : > { %1471 = vmatpush1.bf16.msra.mxu0 %v4212_v22  ;;  %v4244_v44 = vld [vmem:[%s4892_s28 + $0x184] ss:$16 sps:$4 sm:$0xff]   ;;  %v4248_v46 = vld [vmem:[%s4892_s28 + $0x180] ss:$16 sps:$4 sm:$0xff]   ;;  %v4318_v22 = vld [vmem:[%s4892_s28 + $0x8c] ss:$16 sps:$4 sm:$0xff]   ;;  %p4587_p0 = pneg %p4586_p12 }
  0x9e   : > { %1664 = vmatpush1.bf16.msra.mxu1 %v4213_v23  ;;  %1472 = vmatprep.subr.bf16.mxu0 %v4214_v24  ;;  %v4246_v45 = vld [vmem:[%s4892_s28 + $0x384] ss:$16 sps:$4 sm:$0xff]   ;;  %v4249_v47 = vld [vmem:[%s4892_s28 + $0x380] ss:$16 sps:$4 sm:$0xff]   ;;  %v4321_v23 = vld [vmem:[%s4892_s28 + $0x28c] ss:$16 sps:$4 sm:$0xff]  }
  0x9f   : > { %1665 = vmatprep.subr.bf16.mxu1 %v4216_v25  ;;  %v4250_v48 = vld [vmem:[%s4892_s28 + $0x164] ss:$16 sps:$4 sm:$0xff]   ;;  %v4254_v52 = vld [vmem:[%s4892_s28 + $0x160] ss:$16 sps:$4 sm:$0xff]   ;;  %v4316_v24 = vld [vmem:[%s4892_s28 + $0x88] ss:$16 sps:$4 sm:$0xff]  }
  0xa0   : > { %v4957_v49 = vld [vmem:[#allocation2 + $0x4] ss:$16 sps:$4 sm:$0xff]   ;;  %v4255_v53 = vld [vmem:[%s4892_s28 + $0x360] ss:$16 sps:$4 sm:$0xff]   ;;  %s4588_s20 = sshll.u32 %s4666_s22, 4  ;;  %s4589_s20 = int_to_ptr.vmem [resolvable:$false] %s4588_s20 }
  0xa1   : > { %1473 = vmatpush1.bf16.msra.mxu0 %v4218_v26  ;;  %v4252_v50 = vld [vmem:[%s4892_s28 + $0x364] ss:$16 sps:$4 sm:$0xff]   ;;  %1492 = vmatprep.mubr.bf16.mxu0 %v4957_v49  ;;  %v4260_v56 = vld [vmem:[%s4892_s28 + $0x140] ss:$16 sps:$4 sm:$0xff]   ;;  %v5019_v26 = vld [vmem:[#allocation2 + $0x48] ss:$16 sps:$4 sm:$0xff]   ;;  %p4591_p1 = scmp.lt.s32.totalorder %s7644_s30, %s4589_s20 }
  0xa2   : > { %1666 = vmatpush1.bf16.msra.mxu1 %v4219_v27  ;;  %1474 = vmatprep.subr.bf16.mxu0 %v4220_v28  ;;  %v4256_v54 = vld [vmem:[%s4892_s28 + $0x144] ss:$16 sps:$4 sm:$0xff]   ;;  %v4261_v57 = vld [vmem:[%s4892_s28 + $0x340] ss:$16 sps:$4 sm:$0xff]   ;;  %v4319_v27 = vld [vmem:[%s4892_s28 + $0x288] ss:$16 sps:$4 sm:$0xff]  }
  0xa3   : > { %1667 = vmatprep.subr.bf16.mxu1 %v4222_v29  ;;  %v4258_v55 = vld [vmem:[%s4892_s28 + $0x344] ss:$16 sps:$4 sm:$0xff]   ;;  %v4266_v60 = vld [vmem:[%s4892_s28 + $0x120] ss:$16 sps:$4 sm:$0xff]   ;;  %v4330_v28 = vld [vmem:[%s4892_s28 + $0x6c] ss:$16 sps:$4 sm:$0xff]  }
  0xa4   : > { %v4262_v58 = vld [vmem:[%s4892_s28 + $0x124] ss:$16 sps:$4 sm:$0xff]   ;;  %v4267_v61 = vld [vmem:[%s4892_s28 + $0x320] ss:$16 sps:$4 sm:$0xff]   ;;  %v4333_v29 = vld [vmem:[%s4892_s28 + $0x26c] ss:$16 sps:$4 sm:$0xff]  }
  0xa5   : > { %1475 = vmatpush1.bf16.msra.mxu0 %v4224_v30  ;;  %v4264_v59 = vld [vmem:[%s4892_s28 + $0x324] ss:$16 sps:$4 sm:$0xff]   ;;  %v4272_v0 = vld [vmem:[%s4892_s28 + $0x100] ss:$16 sps:$4 sm:$0xff]   ;;  %s4590_s9 = scalar_lea.vmem %s4589_s20, 16384 }
  0xa6   : > { %1668 = vmatpush1.bf16.msra.mxu1 %v4225_v31  ;;  %1476 = vmatprep.subr.bf16.mxu0 %v4226_v32  ;;  %v4268_v62 = vld [vmem:[%s4892_s28 + $0x104] ss:$16 sps:$4 sm:$0xff]   ;;  %v4273_v1 = vld [vmem:[%s4892_s28 + $0x300] ss:$16 sps:$4 sm:$0xff]   ;;  %v5026_v31 = vld [vmem:[#allocation2 + $0x6c] ss:$16 sps:$4 sm:$0xff]   ;;  %p4592_p5 = scmp.lt.s32.totalorder %s4590_s9, %s4584_s24 }
  0xa7   : > { %1669 = vmatprep.subr.bf16.mxu1 %v4228_v33  ;;  %v4270_v63 = vld [vmem:[%s4892_s28 + $0x304] ss:$16 sps:$4 sm:$0xff]   ;;  %v4980_v4 = vld [vmem:[#allocation2] ss:$16 sps:$4 sm:$0xff]   ;;  %v4328_v32 = vld [vmem:[%s4892_s28 + $0x68] ss:$16 sps:$4 sm:$0xff]  }
  0xa8   : > { %v4986_v8 = vld [vmem:[#allocation2 + $0x24] ss:$16 sps:$4 sm:$0xff]   ;;  %v5000_v16 = vld [vmem:[#allocation2 + $0x20] ss:$16 sps:$4 sm:$0xff]   ;;  %v4331_v33 = vld [vmem:[%s4892_s28 + $0x268] ss:$16 sps:$4 sm:$0xff]   ;;  %p4593_p9 = por %p4592_p5, %p4591_p1 }
  0xa9   : > { %1477 = vmatpush2.bf16.msra.mxu0 %v4230_v34  ;;  %v5004_v18 = vld [vmem:[#allocation2 + $0x44] ss:$16 sps:$4 sm:$0xff]   ;;  %v5017_v25 = vld [vmem:[#allocation2 + $0x40] ss:$16 sps:$4 sm:$0xff]   ;;  %v4342_v34 = vld [vmem:[%s4892_s28 + $0x4c] ss:$16 sps:$4 sm:$0xff]  }
  0xaa   : > { %1670 = vmatpush2.bf16.msra.mxu1 %v4231_v35  ;;  %1478 = vmatprep.subr.bf16.mxu0 %v4232_v36  ;;  %v5024_v30 = vld [vmem:[#allocation2 + $0x64] ss:$16 sps:$4 sm:$0xff]   ;;  %v4345_v35 = vld [vmem:[%s4892_s28 + $0x24c] ss:$16 sps:$4 sm:$0xff]   ;;  %v4340_v36 = vld [vmem:[%s4892_s28 + $0x48] ss:$16 sps:$4 sm:$0xff]   ;;  %p4594_p10 = pnand %p4593_p9, %p4587_p0 }
  0xab   : > { %1671 = vmatprep.subr.bf16.mxu1 %v4234_v37  ;;  %v4343_v37 = vld [vmem:[%s4892_s28 + $0x248] ss:$16 sps:$4 sm:$0xff]  }
  0xad   : > { %1479 = vmatpush2.bf16.msra.mxu0 %v4236_v38  ;;  %v5038_v38 = vld [vmem:[#allocation2 + $0x60] ss:$16 sps:$4 sm:$0xff]  }
  0xae   : > { %1672 = vmatpush2.bf16.msra.mxu1 %v4237_v39  ;;  %1480 = vmatprep.subr.bf16.mxu0 %v4238_v40  ;;  %v4354_v39 = vld [vmem:[%s4892_s28 + $0x2c] ss:$16 sps:$4 sm:$0xff]  }
  0xaf   : > { %1673 = vmatprep.subr.bf16.mxu1 %v4240_v41  ;;  %v4357_v40 = vld [vmem:[%s4892_s28 + $0x22c] ss:$16 sps:$4 sm:$0xff]   ;;  %v5042_v41 = vld [vmem:[#allocation2 + $0x68] ss:$16 sps:$4 sm:$0xff]  }
  0xb1   : > { %1481 = vmatpush2.bf16.msra.mxu0 %v4242_v42  ;;  %v5044_v42 = vld [vmem:[#allocation2 + $0x84] ss:$16 sps:$4 sm:$0xff]  }
  0xb2   : > { %1674 = vmatpush2.bf16.msra.mxu1 %v4243_v43  ;;  %1482 = vmatprep.subr.bf16.mxu0 %v4244_v44  ;;  %v5046_v43 = vld [vmem:[#allocation2 + $0x8c] ss:$16 sps:$4 sm:$0xff]   ;;  %v4352_v44 = vld [vmem:[%s4892_s28 + $0x28] ss:$16 sps:$4 sm:$0xff]  }
  0xb3   : > { %1675 = vmatprep.subr.bf16.mxu1 %v4246_v45  ;;  %v4355_v45 = vld [vmem:[%s4892_s28 + $0x228] ss:$16 sps:$4 sm:$0xff]  }
  0xb5   : > { %1483 = vmatpush2.bf16.msra.mxu0 %v4248_v46  ;;  %v4366_v46 = vld [vmem:[%s4892_s28 + $0xc] ss:$16 sps:$4 sm:$0xff]  }
  0xb6   : > { %1676 = vmatpush2.bf16.msra.mxu1 %v4249_v47  ;;  %1484 = vmatprep.subr.bf16.mxu0 %v4250_v48  ;;  %v4369_v47 = vld [vmem:[%s4892_s28 + $0x20c] ss:$16 sps:$4 sm:$0xff]   ;;  %v4364_v48 = vld [vmem:[%s4892_s28 + $0x8] ss:$16 sps:$4 sm:$0xff]  }
  0xb7   : > { %1677 = vmatprep.subr.bf16.mxu1 %v4252_v50  ;;  %v5057_v50 = vld [vmem:[#allocation2 + $0x80] ss:$16 sps:$4 sm:$0xff]  }
  0xb9   : > { %1485 = vmatpush2.bf16.msra.mxu0 %v4254_v52  ;;  %v5059_v52 = vld [vmem:[#allocation2 + $0x88] ss:$16 sps:$4 sm:$0xff]  }
  0xba   : > { %1678 = vmatpush2.bf16.msra.mxu1 %v4255_v53  ;;  %1486 = vmatprep.subr.bf16.mxu0 %v4256_v54  ;;  %v4367_v53 = vld [vmem:[%s4892_s28 + $0x208] ss:$16 sps:$4 sm:$0xff]   ;;  %v4378_v54 = vld [vmem:[%s4892_s28 + $0x1ec] ss:$16 sps:$4 sm:$0xff]  }
  0xbb   : > { %1679 = vmatprep.subr.bf16.mxu1 %v4258_v55  ;;  %v4381_v55 = vld [vmem:[%s4892_s28 + $0x3ec] ss:$16 sps:$4 sm:$0xff]  }
  0xbd   : > { %1487 = vmatpush2.bf16.msra.mxu0 %v4260_v56  ;;  %v5064_v56 = vld [vmem:[#allocation2 + $0xa4] ss:$16 sps:$4 sm:$0xff]  }
  0xbe   : > { %1680 = vmatpush2.bf16.msra.mxu1 %v4261_v57  ;;  %1488 = vmatprep.subr.bf16.mxu0 %v4262_v58  ;;  %v5066_v57 = vld [vmem:[#allocation2 + $0xac] ss:$16 sps:$4 sm:$0xff]   ;;  %v4376_v58 = vld [vmem:[%s4892_s28 + $0x1e8] ss:$16 sps:$4 sm:$0xff]  }
  0xbf   : > { %1681 = vmatprep.subr.bf16.mxu1 %v4264_v59  ;;  %v4379_v59 = vld [vmem:[%s4892_s28 + $0x3e8] ss:$16 sps:$4 sm:$0xff]  }
  0xc1   : > { %1489 = vmatpush2.bf16.msra.mxu0 %v4266_v60  ;;  %v4390_v60 = vld [vmem:[%s4892_s28 + $0x1cc] ss:$16 sps:$4 sm:$0xff]  }
  0xc2   : > { %1682 = vmatpush2.bf16.msra.mxu1 %v4267_v61  ;;  %1490 = vmatprep.subr.bf16.mxu0 %v4268_v62  ;;  %v4393_v61 = vld [vmem:[%s4892_s28 + $0x3cc] ss:$16 sps:$4 sm:$0xff]   ;;  %v4388_v62 = vld [vmem:[%s4892_s28 + $0x1c8] ss:$16 sps:$4 sm:$0xff]  }
  0xc3   : > { %1683 = vmatprep.subr.bf16.mxu1 %v4270_v63  ;;  %v4391_v63 = vld [vmem:[%s4892_s28 + $0x3c8] ss:$16 sps:$4 sm:$0xff]  }
  0xc5   : > { %1491 = vmatpush2.bf16.msra.mxu0 %v4272_v0  ;;  %v5078_v0 = vld [vmem:[#allocation2 + $0xa0] ss:$16 sps:$4 sm:$0xff]  }
  0xc6   : > { %1684 = vmatpush2.bf16.msra.mxu1 %v4273_v1  ;;  %1846 = vmatprep.subr.bf16.mxu0 %v4282_v2  ;;  %v4402_v1 = vld [vmem:[%s4892_s28 + $0x1ac] ss:$16 sps:$4 sm:$0xff]  }
  0xc7   : > { %2039 = vmatprep.subr.bf16.mxu1 %v4285_v3  ;;  %v4405_v2 = vld [vmem:[%s4892_s28 + $0x3ac] ss:$16 sps:$4 sm:$0xff]   ;;  %v5082_v3 = vld [vmem:[#allocation2 + $0xa8] ss:$16 sps:$4 sm:$0xff]  }
  0xc8   : > { %1493 = vmatmul.mubr.bf16.vlgmr.msra.gmra.mxu0 %v4980_v4 }
  0xc9   : > { %1686 = vmatmul.mubr.bf16.vlgmr.msra.gmra.mxu1 %v4982_v5  ;;  %1847 = vmatpush1.bf16.msra.mxu0 %v4280_v6  ;;  %v5084_v6 = vld [vmem:[#allocation2 + $0xc4] ss:$16 sps:$4 sm:$0xff]  }
  0xca   : > { %2040 = vmatpush1.bf16.msra.mxu1 %v4283_v7  ;;  %1502 = vmatprep.mubr.bf16.mxu0 %v4986_v8  ;;  %v5086_v7 = vld [vmem:[#allocation2 + $0xcc] ss:$16 sps:$4 sm:$0xff]  }
  0xcb   : > { %1695 = vmatprep.mubr.bf16.mxu1 %v4988_v9  ;;  %1848 = vmatprep.subr.bf16.mxu0 %v4294_v10  ;;  %v4400_v10 = vld [vmem:[%s4892_s28 + $0x1a8] ss:$16 sps:$4 sm:$0xff]  }
  0xcc   : > { %2041 = vmatprep.subr.bf16.mxu1 %v4297_v11  ;;  %v4403_v11 = vld [vmem:[%s4892_s28 + $0x3a8] ss:$16 sps:$4 sm:$0xff]  }
  0xcd   : > { %1849 = vmatpush1.bf16.msra.mxu0 %v4292_v12  ;;  %v4414_v12 = vld [vmem:[%s4892_s28 + $0x18c] ss:$16 sps:$4 sm:$0xff]  }
  0xce   : > { %2042 = vmatpush1.bf16.msra.mxu1 %v4295_v13  ;;  %1850 = vmatprep.subr.bf16.mxu0 %v4306_v14  ;;  %v4417_v13 = vld [vmem:[%s4892_s28 + $0x38c] ss:$16 sps:$4 sm:$0xff]   ;;  %v4412_v14 = vld [vmem:[%s4892_s28 + $0x188] ss:$16 sps:$4 sm:$0xff]  }
  0xcf   : > { %2043 = vmatprep.subr.bf16.mxu1 %v4309_v15  ;;  %v5097_v15 = vld [vmem:[#allocation2 + $0xc0] ss:$16 sps:$4 sm:$0xff]  }
  0xd0   : > { %1503 = vmatmul.mubr.bf16.gmra.mxu0 %v5000_v16 }
  0xd1   : > { %1696 = vmatmul.mubr.bf16.gmra.mxu1 %v5002_v17  ;;  %1512 = vmatprep.mubr.bf16.mxu0 %v5004_v18 }
  0xd2   : > { %1705 = vmatprep.mubr.bf16.mxu1 %v5006_v19  ;;  %1851 = vmatpush1.bf16.msra.mxu0 %v4304_v20  ;;  %v5099_v20 = vld [vmem:[#allocation2 + $0xc8] ss:$16 sps:$4 sm:$0xff]  }
  0xd3   : > { %2044 = vmatpush1.bf16.msra.mxu1 %v4307_v21  ;;  %1852 = vmatprep.subr.bf16.mxu0 %v4318_v22  ;;  %v4415_v21 = vld [vmem:[%s4892_s28 + $0x388] ss:$16 sps:$4 sm:$0xff]   ;;  %v5102_v22 = vld [vmem:[#allocation2 + $0xe4] ss:$16 sps:$4 sm:$0xff]  }
  0xd4   : > { %2045 = vmatprep.subr.bf16.mxu1 %v4321_v23  ;;  %v4426_v23 = vld [vmem:[%s4892_s28 + $0x16c] ss:$16 sps:$4 sm:$0xff]  }
  0xd6   : > { %1853 = vmatpush1.bf16.msra.mxu0 %v4316_v24  ;;  %v5105_v24 = vld [vmem:[#allocation2 + $0xec] ss:$16 sps:$4 sm:$0xff]  }
  0xd7   : > { %2046 = vmatpush1.bf16.msra.mxu1 %v4319_v27  ;;  %1854 = vmatprep.subr.bf16.mxu0 %v4330_v28  ;;  %v4429_v27 = vld [vmem:[%s4892_s28 + $0x36c] ss:$16 sps:$4 sm:$0xff]   ;;  %v4424_v28 = vld [vmem:[%s4892_s28 + $0x168] ss:$16 sps:$4 sm:$0xff]  }
  0xd8   : > { %2047 = vmatprep.subr.bf16.mxu1 %v4333_v29  ;;  %1513 = vmatmul.mubr.bf16.gmra.mxu0 %v5017_v25  ;;  %v4427_v29 = vld [vmem:[%s4892_s28 + $0x368] ss:$16 sps:$4 sm:$0xff]  }
  0xd9   : > { %1706 = vmatmul.mubr.bf16.gmra.mxu1 %v5019_v26  ;;  %1522 = vmatprep.mubr.bf16.mxu0 %v5024_v30 }
  0xda   : > { %1715 = vmatprep.mubr.bf16.mxu1 %v5026_v31  ;;  %1855 = vmatpush1.bf16.msra.mxu0 %v4328_v32  ;;  %v4436_v32 = vld [vmem:[%s4892_s28 + $0x148] ss:$16 sps:$4 sm:$0xff]  }
  0xdb   : > { %2048 = vmatpush1.bf16.msra.mxu1 %v4331_v33  ;;  %1856 = vmatprep.subr.bf16.mxu0 %v4342_v34  ;;  %v4438_v33 = vld [vmem:[%s4892_s28 + $0x14c] ss:$16 sps:$4 sm:$0xff]   ;;  %v4439_v34 = vld [vmem:[%s4892_s28 + $0x348] ss:$16 sps:$4 sm:$0xff]  }
  0xdc   : > { %2049 = vmatprep.subr.bf16.mxu1 %v4345_v35  ;;  %v4441_v35 = vld [vmem:[%s4892_s28 + $0x34c] ss:$16 sps:$4 sm:$0xff]  }
  0xde   : > { %1857 = vmatpush1.bf16.msra.mxu0 %v4340_v36  ;;  %v5118_v36 = vld [vmem:[#allocation2 + $0xe0] ss:$16 sps:$4 sm:$0xff]  }
  0xdf   : > { %2050 = vmatpush1.bf16.msra.mxu1 %v4343_v37  ;;  %1858 = vmatprep.subr.bf16.mxu0 %v4354_v39  ;;  %v5120_v37 = vld [vmem:[#allocation2 + $0xe8] ss:$16 sps:$4 sm:$0xff]   ;;  %v5122_v39 = vld [vmem:[#allocation2 + $0x104] ss:$16 sps:$4 sm:$0xff]  }
  0xe0   : > { %2051 = vmatprep.subr.bf16.mxu1 %v4357_v40  ;;  %1523 = vmatmul.mubr.bf16.gmra.mxu0 %v5038_v38  ;;  %v5124_v40 = vld [vmem:[#allocation2 + $0x10c] ss:$16 sps:$4 sm:$0xff]  }
  0xe1   : > { %1716 = vmatmul.mubr.bf16.gmra.mxu1 %v5042_v41  ;;  %1532 = vmatprep.mubr.bf16.mxu0 %v5044_v42 }
  0xe2   : > { %1725 = vmatprep.mubr.bf16.mxu1 %v5046_v43  ;;  %1859 = vmatpush1.bf16.msra.mxu0 %v4352_v44  ;;  %v4448_v44 = vld [vmem:[%s4892_s28 + $0x128] ss:$16 sps:$4 sm:$0xff]  }
  0xe3   : > { %2052 = vmatpush1.bf16.msra.mxu1 %v4355_v45  ;;  %1860 = vmatprep.subr.bf16.mxu0 %v4366_v46  ;;  %v4450_v45 = vld [vmem:[%s4892_s28 + $0x12c] ss:$16 sps:$4 sm:$0xff]   ;;  %v4451_v46 = vld [vmem:[%s4892_s28 + $0x328] ss:$16 sps:$4 sm:$0xff]  }
  0xe4   : > { %2053 = vmatprep.subr.bf16.mxu1 %v4369_v47  ;;  %v4453_v47 = vld [vmem:[%s4892_s28 + $0x32c] ss:$16 sps:$4 sm:$0xff]  }
  0xe6   : > { %1861 = vmatpush1.bf16.msra.mxu0 %v4364_v48  ;;  %v5134_v48 = vld [vmem:[#allocation2 + $0x100] ss:$16 sps:$4 sm:$0xff]  }
  0xe7   : > { %2054 = vmatpush1.bf16.msra.mxu1 %v4367_v53  ;;  %1862 = vmatprep.subr.bf16.mxu0 %v4378_v54  ;;  %v5136_v53 = vld [vmem:[#allocation2 + $0x108] ss:$16 sps:$4 sm:$0xff]  }
  0xe8   : > { %2055 = vmatprep.subr.bf16.mxu1 %v4381_v55  ;;  %1533 = vmatmul.mubr.bf16.gmra.mxu0 %v5057_v50  ;;  %v4460_v54 = vld [vmem:[%s4892_s28 + $0x108] ss:$16 sps:$4 sm:$0xff]   ;;  %v4462_v55 = vld [vmem:[%s4892_s28 + $0x10c] ss:$16 sps:$4 sm:$0xff]  }
  0xe9   : > { %1726 = vmatmul.mubr.bf16.gmra.mxu1 %v5059_v52  ;;  %1542 = vmatprep.mubr.bf16.mxu0 %v5064_v56 }
  0xea   : > { %1735 = vmatprep.mubr.bf16.mxu1 %v5066_v57  ;;  %1863 = vmatpush2.bf16.msra.mxu0 %v4376_v58  ;;  %v4463_v58 = vld [vmem:[%s4892_s28 + $0x308] ss:$16 sps:$4 sm:$0xff]  }
  0xeb   : > { %2056 = vmatpush2.bf16.msra.mxu1 %v4379_v59  ;;  %1864 = vmatprep.subr.bf16.mxu0 %v4390_v60  ;;  %v4465_v59 = vld [vmem:[%s4892_s28 + $0x30c] ss:$16 sps:$4 sm:$0xff]   ;;  %v5142_v60 = vld [vmem:[#allocation2 + $0x124] ss:$16 sps:$4 sm:$0xff]  }
  0xec   : > { %2057 = vmatprep.subr.bf16.mxu1 %v4393_v61  ;;  %v5144_v61 = vld [vmem:[#allocation2 + $0x12c] ss:$16 sps:$4 sm:$0xff]  }
  0xee   : > { %1865 = vmatpush2.bf16.msra.mxu0 %v4388_v62  ;;  %v5150_v62 = vld [vmem:[#allocation2 + $0x120] ss:$16 sps:$4 sm:$0xff]  }
  0xef   : > { %2058 = vmatpush2.bf16.msra.mxu1 %v4391_v63  ;;  %1866 = vmatprep.subr.bf16.mxu0 %v4402_v1  ;;  %v5152_v63 = vld [vmem:[#allocation2 + $0x128] ss:$16 sps:$4 sm:$0xff]   ;;  %v5154_v1 = vld [vmem:[#allocation2 + $0x144] ss:$16 sps:$4 sm:$0xff]  }
  0xf0   : > { %2059 = vmatprep.subr.bf16.mxu1 %v4405_v2  ;;  %1543 = vmatmul.mubr.bf16.gmra.mxu0 %v5078_v0  ;;  %v5156_v2 = vld [vmem:[#allocation2 + $0x14c] ss:$16 sps:$4 sm:$0xff]  }
  0xf1   : > { %1736 = vmatmul.mubr.bf16.gmra.mxu1 %v5082_v3  ;;  %1552 = vmatprep.mubr.bf16.mxu0 %v5084_v6 }
  0xf2   : > { %1745 = vmatprep.mubr.bf16.mxu1 %v5086_v7  ;;  %1867 = vmatpush2.bf16.msra.mxu0 %v4400_v10  ;;  %v5162_v10 = vld [vmem:[#allocation2 + $0x140] ss:$16 sps:$4 sm:$0xff]  }
  0xf3   : > { %2060 = vmatpush2.bf16.msra.mxu1 %v4403_v11  ;;  %1868 = vmatprep.subr.bf16.mxu0 %v4414_v12  ;;  %v5164_v11 = vld [vmem:[#allocation2 + $0x148] ss:$16 sps:$4 sm:$0xff]   ;;  %v5166_v12 = vld [vmem:[#allocation2 + $0x164] ss:$16 sps:$4 sm:$0xff]  }
  0xf4   : > { %2061 = vmatprep.subr.bf16.mxu1 %v4417_v13  ;;  %v5168_v13 = vld [vmem:[#allocation2 + $0x16c] ss:$16 sps:$4 sm:$0xff]  }
  0xf6   : > { %1869 = vmatpush2.bf16.msra.mxu0 %v4412_v14  ;;  %v5174_v14 = vld [vmem:[#allocation2 + $0x160] ss:$16 sps:$4 sm:$0xff]  }
  0xf7   : > { %2062 = vmatpush2.bf16.msra.mxu1 %v4415_v21  ;;  %1870 = vmatprep.subr.bf16.mxu0 %v4426_v23  ;;  %v5176_v21 = vld [vmem:[#allocation2 + $0x168] ss:$16 sps:$4 sm:$0xff]   ;;  %v5178_v23 = vld [vmem:[#allocation2 + $0x184] ss:$16 sps:$4 sm:$0xff]  }
  0xf8   : > { %2063 = vmatprep.subr.bf16.mxu1 %v4429_v27  ;;  %1553 = vmatmul.mubr.bf16.gmra.mxu0 %v5097_v15  ;;  %v5180_v27 = vld [vmem:[#allocation2 + $0x18c] ss:$16 sps:$4 sm:$0xff]  }
  0xf9   : > { %1746 = vmatmul.mubr.bf16.gmra.mxu1 %v5099_v20  ;;  %1562 = vmatprep.mubr.bf16.mxu0 %v5102_v22 }
  0xfa   : > { %1755 = vmatprep.mubr.bf16.mxu1 %v5105_v24  ;;  %1871 = vmatpush2.bf16.msra.mxu0 %v4424_v28  ;;  %v5186_v28 = vld [vmem:[#allocation2 + $0x180] ss:$16 sps:$4 sm:$0xff]  }
  0xfb   : > { %2064 = vmatpush2.bf16.msra.mxu1 %v4427_v29  ;;  %1872 = vmatprep.subr.bf16.mxu0 %v4438_v33  ;;  %v5188_v29 = vld [vmem:[#allocation2 + $0x188] ss:$16 sps:$4 sm:$0xff]   ;;  %v5192_v33 = vld [vmem:[#allocation2 + $0x1ac] ss:$16 sps:$4 sm:$0xff]  }
  0xfc   : > { %2065 = vmatprep.subr.bf16.mxu1 %v4441_v35  ;;  %v5200_v35 = vld [vmem:[#allocation2 + $0x1a8] ss:$16 sps:$4 sm:$0xff]  }
  0xfe   : > { %1873 = vmatpush2.bf16.msra.mxu0 %v4436_v32  ;;  %v5190_v32 = vld [vmem:[#allocation2 + $0x1a4] ss:$16 sps:$4 sm:$0xff]  }
  0xff   : > { %2066 = vmatpush2.bf16.msra.mxu1 %v4439_v34  ;;  %1874 = vmatprep.subr.bf16.mxu0 %v4450_v45  ;;  %v5198_v34 = vld [vmem:[#allocation2 + $0x1a0] ss:$16 sps:$4 sm:$0xff]   ;;  %v5204_v45 = vld [vmem:[#allocation2 + $0x1cc] ss:$16 sps:$4 sm:$0xff]  }
 0x100   : > { %1563 = vmatmul.mubr.bf16.gmra.mxu0 %v5118_v36  ;;  %2067 = vmatprep.subr.bf16.mxu1 %v4453_v47  ;;  %v5212_v47 = vld [vmem:[#allocation2 + $0x1c8] ss:$16 sps:$4 sm:$0xff]  }
 0x101   : > { %1756 = vmatmul.mubr.bf16.gmra.mxu1 %v5120_v37  ;;  %1572 = vmatprep.mubr.bf16.mxu0 %v5122_v39 }
 0x102   : > { %1765 = vmatprep.mubr.bf16.mxu1 %v5124_v40  ;;  %1875 = vmatpush2.bf16.msra.mxu0 %v4448_v44  ;;  %v5202_v44 = vld [vmem:[#allocation2 + $0x1c4] ss:$16 sps:$4 sm:$0xff]  }
 0x103   : > { %2068 = vmatpush2.bf16.msra.mxu1 %v4451_v46  ;;  %1876 = vmatprep.subr.bf16.mxu0 %v4462_v55  ;;  %v5210_v46 = vld [vmem:[#allocation2 + $0x1c0] ss:$16 sps:$4 sm:$0xff]   ;;  %v5216_v55 = vld [vmem:[#allocation2 + $0x1ec] ss:$16 sps:$4 sm:$0xff]  }
 0x104   : > { %2069 = vmatprep.subr.bf16.mxu1 %v4465_v59  ;;  %v5224_v59 = vld [vmem:[#allocation2 + $0x1e8] ss:$16 sps:$4 sm:$0xff]  }
 0x106   : > { %1877 = vmatpush2.bf16.msra.mxu0 %v4460_v54  ;;  %v5214_v54 = vld [vmem:[#allocation2 + $0x1e4] ss:$16 sps:$4 sm:$0xff]  }
 0x107   : > { %2070 = vmatpush2.bf16.msra.mxu1 %v4463_v58  ;;  %v5222_v58 = vld [vmem:[#allocation2 + $0x1e0] ss:$16 sps:$4 sm:$0xff]  }
 0x108   : > { %1573 = vmatmul.mubr.bf16.gmra.mxu0 %v5134_v48 }
 0x109   : > { %1766 = vmatmul.mubr.bf16.gmra.mxu1 %v5136_v53  ;;  %1582 = vmatprep.mubr.bf16.mxu0 %v5142_v60 }
 0x10a   : > { %1775 = vmatprep.mubr.bf16.mxu1 %v5144_v61 }
 0x110   : > { %1583 = vmatmul.mubr.bf16.gmra.mxu0 %v5150_v62 }
 0x111   : > { %1776 = vmatmul.mubr.bf16.gmra.mxu1 %v5152_v63  ;;  %1592 = vmatprep.mubr.bf16.mxu0 %v5154_v1 }
 0x112   : > { %1785 = vmatprep.mubr.bf16.mxu1 %v5156_v2 }
 0x118   : > { %1593 = vmatmul.mubr.bf16.gmra.mxu0 %v5162_v10 }
 0x119   : > { %1786 = vmatmul.mubr.bf16.gmra.mxu1 %v5164_v11  ;;  %1602 = vmatprep.mubr.bf16.mxu0 %v5166_v12 }
 0x11a   : > { %1795 = vmatprep.mubr.bf16.mxu1 %v5168_v13 }
 0x120   : > { %1603 = vmatmul.mubr.bf16.gmra.mxu0 %v5174_v14 }
 0x121   : > { %1796 = vmatmul.mubr.bf16.gmra.mxu1 %v5176_v21  ;;  %1612 = vmatprep.mubr.bf16.mxu0 %v5178_v23 }
 0x122   : > { %1805 = vmatprep.mubr.bf16.mxu1 %v5180_v27 }
 0x128   : > { %1613 = vmatmul.mubr.bf16.gmra.mxu0 %v5186_v28 }
 0x129   : > { %1806 = vmatmul.mubr.bf16.gmra.mxu1 %v5188_v29  ;;  %1622 = vmatprep.mubr.bf16.mxu0 %v5190_v32 }
 0x12a   : > { %1815 = vmatprep.mubr.bf16.mxu1 %v5192_v33 }
 0x130   : > { %1623 = vmatmul.mubr.bf16.gmra.mxu0 %v5198_v34 }
 0x131   : > { %1816 = vmatmul.mubr.bf16.gmra.mxu1 %v5200_v35  ;;  %1632 = vmatprep.mubr.bf16.mxu0 %v5202_v44 }
 0x132   : > { %1825 = vmatprep.mubr.bf16.mxu1 %v5204_v45 }
 0x138   : > { %1633 = vmatmul.mubr.bf16.gmra.mxu0 %v5210_v46 }
 0x139   : > { %1826 = vmatmul.mubr.bf16.gmra.mxu1 %v5212_v47  ;;  %1642 = vmatprep.mubr.bf16.mxu0 %v5214_v54 }
 0x13a   : > { %1835 = vmatprep.mubr.bf16.mxu1 %v5216_v55 }
 0x140   : > { %1643 = vmatmul.mubr.bf16.gmra.mxu0 %v5222_v58 }
 0x141   : > { %1836 = vmatmul.mubr.bf16.gmra.mxu1 %v5224_v59  ;;  %1878 = vmatprep.mubr.bf16.mxu0 %v4957_v49 }
 0x142   : > { %2071 = vmatprep.mubr.bf16.mxu1 %v4960_v51 }
 0x148   : > { %1879 = vmatmul.mubr.bf16.vlgmr.msra.gmra.mxu0 %v4980_v4 }
 0x149   : > { %2072 = vmatmul.mubr.bf16.vlgmr.msra.gmra.mxu1 %v4982_v5  ;;  %1888 = vmatprep.mubr.bf16.mxu0 %v4986_v8 }
 0x14a   : > { %2081 = vmatprep.mubr.bf16.mxu1 %v4988_v9 }
 0x150   : > { %1889 = vmatmul.mubr.bf16.gmra.mxu0 %v5000_v16 }
 0x151   : > { %2082 = vmatmul.mubr.bf16.gmra.mxu1 %v5002_v17  ;;  %1898 = vmatprep.mubr.bf16.mxu0 %v5004_v18 }
 0x152   : > { %2091 = vmatprep.mubr.bf16.mxu1 %v5006_v19 }
 0x158   : > { %1899 = vmatmul.mubr.bf16.gmra.mxu0 %v5017_v25 }
 0x159   : > { %2092 = vmatmul.mubr.bf16.gmra.mxu1 %v5019_v26  ;;  %1908 = vmatprep.mubr.bf16.mxu0 %v5024_v30 }
 0x15a   : > { %2101 = vmatprep.mubr.bf16.mxu1 %v5026_v31 }
 0x160   : > { %1909 = vmatmul.mubr.bf16.gmra.mxu0 %v5038_v38 }
 0x161   : > { %2102 = vmatmul.mubr.bf16.gmra.mxu1 %v5042_v41  ;;  %1918 = vmatprep.mubr.bf16.mxu0 %v5044_v42 }
 0x162   : > { %2111 = vmatprep.mubr.bf16.mxu1 %v5046_v43 }
 0x168   : > { %1919 = vmatmul.mubr.bf16.gmra.mxu0 %v5057_v50 }
 0x169   : > { %2112 = vmatmul.mubr.bf16.gmra.mxu1 %v5059_v52  ;;  %1928 = vmatprep.mubr.bf16.mxu0 %v5064_v56 }
 0x16a   : > { %2121 = vmatprep.mubr.bf16.mxu1 %v5066_v57 }
 0x170   : > { %1929 = vmatmul.mubr.bf16.gmra.mxu0 %v5078_v0 }
 0x171   : > { %2122 = vmatmul.mubr.bf16.gmra.mxu1 %v5082_v3  ;;  %1938 = vmatprep.mubr.bf16.mxu0 %v5084_v6 }
 0x172   : > { %2131 = vmatprep.mubr.bf16.mxu1 %v5086_v7 }
 0x178   : > { %1939 = vmatmul.mubr.bf16.gmra.mxu0 %v5097_v15 }
 0x179   : > { %2132 = vmatmul.mubr.bf16.gmra.mxu1 %v5099_v20  ;;  %1948 = vmatprep.mubr.bf16.mxu0 %v5102_v22 }
 0x17a   : > { %2141 = vmatprep.mubr.bf16.mxu1 %v5105_v24 }
 0x180   : > { %1949 = vmatmul.mubr.bf16.gmra.mxu0 %v5118_v36 }
 0x181   : > { %2142 = vmatmul.mubr.bf16.gmra.mxu1 %v5120_v37  ;;  %1958 = vmatprep.mubr.bf16.mxu0 %v5122_v39 }
 0x182   : > { %2151 = vmatprep.mubr.bf16.mxu1 %v5124_v40 }
 0x188   : > { %v1494_v49 = vpop.f32.mrf.mxu0  ;;  %1959 = vmatmul.mubr.bf16.gmra.mxu0 %v5134_v48 }
 0x189   : > { %v1687_v51 = vpop.f32.mrf.mxu1  ;;  %2152 = vmatmul.mubr.bf16.gmra.mxu1 %v5136_v53  ;;  %1968 = vmatprep.mubr.bf16.mxu0 %v5142_v60 }
 0x18a   : > { %v5264_v4 = vadd.f32 %v1687_v51, %v1494_v49  ;;  %2161 = vmatprep.mubr.bf16.mxu1 %v5144_v61  ;;  %v1496_v5 = vpop.f32.mrf.mxu0 }
 0x18b   : > { %v1689_v8 = vpop.f32.mrf.mxu1 }
 0x18c   : > { %7943 = vst [vmem:[#allocation16_spill] sm:$0xff] %v5264_v4  ;;  %v5268_v9 = vadd.f32 %v1689_v8, %v1496_v5  ;;  %v1498_v16 = vpop.f32.mrf.mxu0 }
 0x18d   : > { %v1691_v17 = vpop.f32.mrf.mxu1 }
 0x18e   : > { %7944 = vst [vmem:[#allocation17_spill] sm:$0xff] %v5268_v9  ;;  %v5270_v18 = vadd.f32 %v1691_v17, %v1498_v16  ;;  %v1500_v19 = vpop.f32.mrf.mxu0 }
 0x18f   : > { %v1693_v25 = vpop.f32.mrf.mxu1 }
 0x190   : > { %7945 = vst [vmem:[#allocation18_spill] sm:$0xff] %v5270_v18  ;;  %v5272_v26 = vadd.f32 %v1693_v25, %v1500_v19  ;;  %v1504_v30 = vpop.f32.mrf.mxu0  ;;  %1969 = vmatmul.mubr.bf16.gmra.mxu0 %v5150_v62 }
 0x191   : > { %v1697_v31 = vpop.f32.mrf.mxu1  ;;  %2162 = vmatmul.mubr.bf16.gmra.mxu1 %v5152_v63  ;;  %1978 = vmatprep.mubr.bf16.mxu0 %v5154_v1 }
 0x192   : > { %7946 = vst [vmem:[#allocation19_spill] sm:$0xff] %v5272_v26  ;;  %v5276_v38 = vadd.f32 %v1697_v31, %v1504_v30  ;;  %v1506_v41 = vpop.f32.mrf.mxu0  ;;  %2171 = vmatprep.mubr.bf16.mxu1 %v5156_v2 }
 0x193   : > { %v1699_v42 = vpop.f32.mrf.mxu1 }
 0x194   : > { %7947 = vst [vmem:[#allocation20_spill] sm:$0xff] %v5276_v38  ;;  %v5280_v43 = vadd.f32 %v1699_v42, %v1506_v41  ;;  %v1508_v50 = vpop.f32.mrf.mxu0 }
 0x195   : > { %v1701_v52 = vpop.f32.mrf.mxu1 }
 0x196   : > { %7948 = vst [vmem:[#allocation21_spill] sm:$0xff] %v5280_v43  ;;  %v5282_v56 = vadd.f32 %v1701_v52, %v1508_v50  ;;  %v1510_v57 = vpop.f32.mrf.mxu0 }
 0x197   : > { %v1703_v0 = vpop.f32.mrf.mxu1 }
 0x198   : > { %7949 = vst [vmem:[#allocation22_spill] sm:$0xff] %v5282_v56  ;;  %v5284_v3 = vadd.f32 %v1703_v0, %v1510_v57  ;;  %v1514_v6 = vpop.f32.mrf.mxu0  ;;  %1979 = vmatmul.mubr.bf16.gmra.mxu0 %v5162_v10 }
 0x199   : > { %v1707_v7 = vpop.f32.mrf.mxu1  ;;  %2172 = vmatmul.mubr.bf16.gmra.mxu1 %v5164_v11  ;;  %1988 = vmatprep.mubr.bf16.mxu0 %v5166_v12 }
 0x19a   : > { %7950 = vst [vmem:[#allocation23_spill] sm:$0xff] %v5284_v3  ;;  %v5288_v15 = vadd.f32 %v1707_v7, %v1514_v6  ;;  %v1516_v20 = vpop.f32.mrf.mxu0  ;;  %2181 = vmatprep.mubr.bf16.mxu1 %v5168_v13 }
 0x19b   : > { %v1709_v22 = vpop.f32.mrf.mxu1 }
 0x19c   : > { %7951 = vst [vmem:[#allocation24_spill] sm:$0xff] %v5288_v15  ;;  %v5292_v24 = vadd.f32 %v1709_v22, %v1516_v20  ;;  %v1518_v36 = vpop.f32.mrf.mxu0 }
 0x19d   : > { %v1711_v37 = vpop.f32.mrf.mxu1 }
 0x19e   : > { %7952 = vst [vmem:[#allocation25_spill] sm:$0xff] %v5292_v24  ;;  %v5294_v39 = vadd.f32 %v1711_v37, %v1518_v36  ;;  %v1520_v40 = vpop.f32.mrf.mxu0 }
 0x19f   : > { %v1713_v48 = vpop.f32.mrf.mxu1 }
 0x1a0   : > { %7953 = vst [vmem:[#allocation26_spill] sm:$0xff] %v5294_v39  ;;  %v5296_v53 = vadd.f32 %v1713_v48, %v1520_v40  ;;  %v1524_v60 = vpop.f32.mrf.mxu0  ;;  %1989 = vmatmul.mubr.bf16.gmra.mxu0 %v5174_v14 }
 0x1a1   : > { %v1717_v61 = vpop.f32.mrf.mxu1  ;;  %2182 = vmatmul.mubr.bf16.gmra.mxu1 %v5176_v21  ;;  %1998 = vmatprep.mubr.bf16.mxu0 %v5178_v23 }
 0x1a2   : > { %7954 = vst [vmem:[#allocation27_spill] sm:$0xff] %v5296_v53  ;;  %v5300_v62 = vadd.f32 %v1717_v61, %v1524_v60  ;;  %v1526_v63 = vpop.f32.mrf.mxu0  ;;  %2191 = vmatprep.mubr.bf16.mxu1 %v5180_v27 }
 0x1a3   : > { %v1719_v1 = vpop.f32.mrf.mxu1 }
 0x1a4   : > { %7955 = vst [vmem:[#allocation28_spill] sm:$0xff] %v5300_v62  ;;  %v5304_v2 = vadd.f32 %v1719_v1, %v1526_v63  ;;  %v1528_v10 = vpop.f32.mrf.mxu0 }
 0x1a5   : > { %v1721_v11 = vpop.f32.mrf.mxu1 }
 0x1a6   : > { %7956 = vst [vmem:[#allocation29_spill] sm:$0xff] %v5304_v2  ;;  %v5306_v12 = vadd.f32 %v1721_v11, %v1528_v10  ;;  %v1530_v13 = vpop.f32.mrf.mxu0 }
 0x1a7   : > { %v1723_v49 = vpop.f32.mrf.mxu1 }
 0x1a8   : > { %7957 = vst [vmem:[#allocation30_spill] sm:$0xff] %v5306_v12  ;;  %v5308_v51 = vadd.f32 %v1723_v49, %v1530_v13  ;;  %v1534_v14 = vpop.f32.mrf.mxu0  ;;  %1999 = vmatmul.mubr.bf16.gmra.mxu0 %v5186_v28  ;;  %v2384_v13 = vmul.f32 %v5270_v18, %v5270_v18 }
 0x1a9   : > { %v1727_v21 = vpop.f32.mrf.mxu1  ;;  %2192 = vmatmul.mubr.bf16.gmra.mxu1 %v5188_v29  ;;  %2008 = vmatprep.mubr.bf16.mxu0 %v5190_v32 }
 0x1aa   : > { %7958 = vst [vmem:[#allocation31_spill] sm:$0xff] %v5308_v51  ;;  %v5312_v23 = vadd.f32 %v1727_v21, %v1534_v14  ;;  %v1536_v27 = vpop.f32.mrf.mxu0  ;;  %2201 = vmatprep.mubr.bf16.mxu1 %v5192_v33 }
 0x1ab   : > { %v1729_v5 = vpop.f32.mrf.mxu1 }
 0x1ac   : > { %7959 = vst [vmem:[#allocation32_spill] sm:$0xff] %v5312_v23  ;;  %v5316_v8 = vadd.f32 %v1729_v5, %v1536_v27  ;;  %v1538_v16 = vpop.f32.mrf.mxu0  ;;  %v2388_v27 = vmul.f32 %v5276_v38, %v5276_v38 }
 0x1ad   : > { %v1731_v17 = vpop.f32.mrf.mxu1 }
 0x1ae   : > { %7960 = vst [vmem:[#allocation33_spill] sm:$0xff] %v5316_v8  ;;  %v5318_v19 = vadd.f32 %v1731_v17, %v1538_v16  ;;  %v1540_v25 = vpop.f32.mrf.mxu0 }
 0x1af   : > { %v1733_v30 = vpop.f32.mrf.mxu1 }
 0x1b0   : > { %7961 = vst [vmem:[#allocation34_spill] sm:$0xff] %v5318_v19  ;;  %v5320_v31 = vadd.f32 %v1733_v30, %v1540_v25  ;;  %v1544_v28 = vpop.f32.mrf.mxu0  ;;  %2009 = vmatmul.mubr.bf16.gmra.mxu0 %v5198_v34 }
 0x1b1   : > { %v1737_v29 = vpop.f32.mrf.mxu1  ;;  %2202 = vmatmul.mubr.bf16.gmra.mxu1 %v5200_v35  ;;  %2018 = vmatprep.mubr.bf16.mxu0 %v5202_v44 }
 0x1b2   : > { %7962 = vst [vmem:[#allocation35_spill] sm:$0xff] %v5320_v31  ;;  %v5324_v32 = vadd.f32 %v1737_v29, %v1544_v28  ;;  %v1546_v33 = vpop.f32.mrf.mxu0  ;;  %2211 = vmatprep.mubr.bf16.mxu1 %v5204_v45  ;;  %v2392_v28 = vmul.f32 %v5282_v56, %v5282_v56 }
 0x1b3   : > { %v1739_v41 = vpop.f32.mrf.mxu1 }
 0x1b4   : > { %7963 = vst [vmem:[#allocation36_spill] sm:$0xff] %v5324_v32  ;;  %v5328_v42 = vadd.f32 %v1739_v41, %v1546_v33  ;;  %v1548_v50 = vpop.f32.mrf.mxu0  ;;  %v2385_v33 = vmul.f32 %v5272_v26, %v5272_v26 }
 0x1b5   : > { %v1741_v52 = vpop.f32.mrf.mxu1 }
 0x1b6   : > { %7964 = vst [vmem:[#allocation37_spill] sm:$0xff] %v5328_v42  ;;  %v5330_v57 = vadd.f32 %v1741_v52, %v1548_v50  ;;  %v1550_v0 = vpop.f32.mrf.mxu0 }
 0x1b7   : > { %v1743_v6 = vpop.f32.mrf.mxu1 }
 0x1b8   : > { %7965 = vst [vmem:[#allocation38_spill] sm:$0xff] %v5330_v57  ;;  %v5332_v7 = vadd.f32 %v1743_v6, %v1550_v0  ;;  %v1554_v34 = vpop.f32.mrf.mxu0  ;;  %2019 = vmatmul.mubr.bf16.gmra.mxu0 %v5210_v46  ;;  %v2396_v6 = vmul.f32 %v5288_v15, %v5288_v15 }
 0x1b9   : > { %v1747_v35 = vpop.f32.mrf.mxu1  ;;  %2212 = vmatmul.mubr.bf16.gmra.mxu1 %v5212_v47  ;;  %2028 = vmatprep.mubr.bf16.mxu0 %v5214_v54 }
 0x1ba   : > { %7966 = vst [vmem:[#allocation39_spill] sm:$0xff] %v5332_v7  ;;  %v5336_v44 = vadd.f32 %v1747_v35, %v1554_v34  ;;  %v1556_v45 = vpop.f32.mrf.mxu0  ;;  %2221 = vmatprep.mubr.bf16.mxu1 %v5216_v55  ;;  %v2381_v35 = vmul.f32 %v5268_v9, %v5268_v9 }
 0x1bb   : > { %v1749_v20 = vpop.f32.mrf.mxu1 }
 0x1bc   : > { %7967 = vst [vmem:[#allocation40_spill] sm:$0xff] %v5336_v44  ;;  %v5340_v22 = vadd.f32 %v1749_v20, %v1556_v45  ;;  %v1558_v36 = vpop.f32.mrf.mxu0  ;;  %v2269_v45 = vadd.f32 %v5272_v26, %v5268_v9  ;;  %v2389_v20 = vmul.f32 %v5280_v43, %v5280_v43 }
 0x1bd   : > { %v1751_v37 = vpop.f32.mrf.mxu1 }
 0x1be   : > { %7968 = vst [vmem:[#allocation41_spill] sm:$0xff] %v5340_v22  ;;  %v5342_v40 = vadd.f32 %v1751_v37, %v1558_v36  ;;  %v1560_v48 = vpop.f32.mrf.mxu0 }
 0x1bf   : > { %v1753_v60 = vpop.f32.mrf.mxu1 }
 0x1c0   : > { %7969 = vst [vmem:[#allocation42_spill] sm:$0xff] %v5342_v40  ;;  %v5344_v61 = vadd.f32 %v1753_v60, %v1560_v48  ;;  %v1564_v46 = vpop.f32.mrf.mxu0  ;;  %2029 = vmatmul.mubr.bf16.gmra.mxu0 %v5222_v58  ;;  %v2380_v58 = vmul.f32 %v5264_v4, %v5264_v4 }
 0x1c1   : > { %v1757_v47 = vpop.f32.mrf.mxu1  ;;  %2222 = vmatmul.mubr.bf16.gmra.mxu1 %v5224_v59  ;;  %v2232_v59 = vadd.f32 %v5270_v18, %v5264_v4 }
 0x1c2   : > { %7970 = vst [vmem:[#allocation43_spill] sm:$0xff] %v5344_v61  ;;  %v5348_v54 = vadd.f32 %v1757_v47, %v1564_v46  ;;  %v1566_v63 = vpop.f32.mrf.mxu0  ;;  %v2508_v25 = vadd.f32 %v2384_v13, %v2380_v58  ;;  %v2400_v46 = vmul.f32 %v5294_v39, %v5294_v39  ;;  %v2404_v58 = vmul.f32 %v5300_v62, %v5300_v62 }
 0x1c3   : > { %v1759_v55 = vpop.f32.mrf.mxu1  ;;  %v2233_v30 = vadd.f32 %v2232_v59, %v5276_v38 }
 0x1c4   : > { %7971 = vst [vmem:[#allocation44_spill] sm:$0xff] %v5348_v54  ;;  %v5350_v1 = vadd.f32 %v1759_v55, %v1566_v63  ;;  %v1568_v10 = vpop.f32.mrf.mxu0  ;;  %v2509_v52 = vadd.f32 %v2508_v25, %v2388_v27  ;;  %v2545_v63 = vadd.f32 %v2385_v33, %v2381_v35  ;;  %v2270_v55 = vadd.f32 %v2269_v45, %v5280_v43 }
 0x1c5   : > { %v1761_v11 = vpop.f32.mrf.mxu1  ;;  %v2234_v0 = vadd.f32 %v2233_v30, %v5282_v56 }
 0x1c6   : > { %7972 = vst [vmem:[#allocation45_spill] sm:$0xff] %v5350_v1  ;;  %v5354_v49 = vadd.f32 %v1761_v11, %v1568_v10  ;;  %v1570_v14 = vpop.f32.mrf.mxu0  ;;  %v2510_v48 = vadd.f32 %v2509_v52, %v2392_v28  ;;  %v2393_v10 = vmul.f32 %v5284_v3, %v5284_v3  ;;  %v2546_v27 = vadd.f32 %v2545_v63, %v2389_v20 }
 0x1c7   : > { %v1763_v21 = vpop.f32.mrf.mxu1  ;;  %v2235_v60 = vadd.f32 %v2234_v0, %v5288_v15  ;;  %v2405_v63 = vmul.f32 %v5304_v2, %v5304_v2 }
 0x1c8   : > { %7973 = vst [vmem:[#allocation46_spill] sm:$0xff] %v5354_v49  ;;  %v5362_v5 = vadd.f32 %v1763_v21, %v1570_v14  ;;  %v1574_v16 = vpop.f32.mrf.mxu0  ;;  %v2511_v14 = vadd.f32 %v2510_v48, %v2396_v6  ;;  %v2547_v52 = vadd.f32 %v2546_v27, %v2393_v10  ;;  %v2401_v6 = vmul.f32 %v5296_v53, %v5296_v53 }
 0x1c9   : > { %v1767_v17 = vpop.f32.mrf.mxu1  ;;  %v2236_v21 = vadd.f32 %v2235_v60, %v5294_v39 }
 0x1ca   : > { %7974 = vst [vmem:[#allocation47_spill] sm:$0xff] %v5362_v5  ;;  %v5367_v29 = vadd.f32 %v1767_v17, %v1574_v16  ;;  %v1576_v41 = vpop.f32.mrf.mxu0  ;;  %v2271_v16 = vadd.f32 %v2270_v55, %v5284_v3  ;;  %v2397_v17 = vmul.f32 %v5292_v24, %v5292_v24  ;;  %v2512_v28 = vadd.f32 %v2511_v14, %v2400_v46 }
 0x1cb   : > { %v1769_v50 = vpop.f32.mrf.mxu1  ;;  %v2237_v33 = vadd.f32 %v2236_v21, %v5300_v62  ;;  %v2416_v14 = vmul.f32 %v5318_v19, %v5318_v19 }
 0x1cc   : > { %7975 = vst [vmem:[#allocation48_spill] sm:$0xff] %v5367_v29  ;;  %v5374_v34 = vadd.f32 %v1769_v50, %v1576_v41  ;;  %v1578_v36 = vpop.f32.mrf.mxu0  ;;  %v2408_v41 = vmul.f32 %v5306_v12, %v5306_v12  ;;  %v2272_v0 = vadd.f32 %v2271_v16, %v5292_v24  ;;  %v2513_v20 = vadd.f32 %v2512_v28, %v2404_v58 }
 0x1cd   : > { %v1771_v37 = vpop.f32.mrf.mxu1  ;;  %v2548_v60 = vadd.f32 %v2547_v52, %v2397_v17  ;;  %v2409_v16 = vmul.f32 %v5308_v51, %v5308_v51 }
 0x1ce   : > { %7976 = vst [vmem:[#allocation49_spill] sm:$0xff] %v5374_v34  ;;  %v5385_v47 = vadd.f32 %v1771_v37, %v1578_v36  ;;  %v1580_v11 = vpop.f32.mrf.mxu0  ;;  %v2238_v36 = vadd.f32 %v2237_v33, %v5306_v12  ;;  %v2412_v37 = vmul.f32 %v5312_v23, %v5312_v23  ;;  %v2273_v46 = vadd.f32 %v2272_v0, %v5296_v53 }
 0x1cf   : > { %v1773_v13 = vpop.f32.mrf.mxu1  ;;  %v2549_v58 = vadd.f32 %v2548_v60, %v2401_v6  ;;  %v2420_v33 = vmul.f32 %v5324_v32, %v5324_v32  ;;  %v2413_v6 = vmul.f32 %v5316_v8, %v5316_v8 }
 0x1d0   : > { %7977 = vst [vmem:[#allocation50_spill] sm:$0xff] %v5385_v47  ;;  %v5393_v59 = vadd.f32 %v1773_v13, %v1580_v11  ;;  %v1584_v25 = vpop.f32.mrf.mxu0  ;;  %v2514_v11 = vadd.f32 %v2513_v20, %v2408_v41  ;;  %v2239_v13 = vadd.f32 %v2238_v36, %v5312_v23  ;;  %v2274_v27 = vadd.f32 %v2273_v46, %v5304_v2 }
 0x1d1   : > { %v1777_v30 = vpop.f32.mrf.mxu1  ;;  %v2550_v52 = vadd.f32 %v2549_v58, %v2405_v63  ;;  %v2417_v63 = vmul.f32 %v5320_v31, %v5320_v31 }
 0x1d2   : > { %7978 = vst [vmem:[#allocation51_spill] sm:$0xff] %v5393_v59  ;;  %v5401_v50 = vadd.f32 %v1777_v30, %v1584_v25  ;;  %v1586_v35 = vpop.f32.mrf.mxu0  ;;  %v2515_v30 = vadd.f32 %v2514_v11, %v2412_v37  ;;  %v2240_v28 = vadd.f32 %v2239_v13, %v5318_v19  ;;  %v2275_v0 = vadd.f32 %v2274_v27, %v5308_v51 }
 0x1d3   : > { %v1779_v45 = vpop.f32.mrf.mxu1  ;;  %v2424_v37 = vmul.f32 %v5330_v57, %v5330_v57  ;;  %v2551_v46 = vadd.f32 %v2550_v52, %v2409_v16  ;;  %v2421_v16 = vmul.f32 %v5328_v42, %v5328_v42 }
 0x1d4   : > { %7979 = vst [vmem:[#allocation52_spill] sm:$0xff] %v5401_v50  ;;  %v5409_v48 = vadd.f32 %v1779_v45, %v1586_v35  ;;  %v1588_v55 = vpop.f32.mrf.mxu0  ;;  %v2516_v20 = vadd.f32 %v2515_v30, %v2416_v14  ;;  %v2241_v36 = vadd.f32 %v2240_v28, %v5324_v32  ;;  %v2428_v14 = vmul.f32 %v5336_v44, %v5336_v44 }
 0x1d5   : > { %v1781_v10 = vpop.f32.mrf.mxu1 }
 0x1d6   : > { %7980 = vst [vmem:[#allocation53_spill] sm:$0xff] %v5409_v48  ;;  %v5417_v21 = vadd.f32 %v1781_v10, %v1588_v55  ;;  %v1590_v17 = vpop.f32.mrf.mxu0  ;;  %v2276_v55 = vadd.f32 %v2275_v0, %v5316_v8  ;;  %v2517_v13 = vadd.f32 %v2516_v20, %v2420_v33  ;;  %v2242_v58 = vadd.f32 %v2241_v36, %v5330_v57 }
 0x1d7   : > { %v1783_v25 = vpop.f32.mrf.mxu1  ;;  %v2432_v33 = vmul.f32 %v5342_v40, %v5342_v40 }
 0x1d8   : > { %7981 = vst [vmem:[#allocation54_spill] sm:$0xff] %v5417_v21  ;;  %v5425_v41 = vadd.f32 %v1783_v25, %v1590_v17  ;;  %v1594_v35 = vpop.f32.mrf.mxu0  ;;  %v2552_v17 = vadd.f32 %v2551_v46, %v2413_v6  ;;  %v2277_v25 = vadd.f32 %v2276_v55, %v5320_v31  ;;  %v2518_v52 = vadd.f32 %v2517_v13, %v2424_v37 }
 0x1d9   : > { %v1787_v45 = vpop.f32.mrf.mxu1  ;;  %v2243_v0 = vadd.f32 %v2242_v58, %v5336_v44  ;;  %v2425_v6 = vmul.f32 %v5332_v7, %v5332_v7  ;;  %v2436_v37 = vmul.f32 %v5348_v54, %v5348_v54 }
 0x1da   : > { %7982 = vst [vmem:[#allocation55_spill] sm:$0xff] %v5425_v41  ;;  %v5433_v60 = vadd.f32 %v1787_v45, %v1594_v35  ;;  %v1596_v10 = vpop.f32.mrf.mxu0  ;;  %v2553_v45 = vadd.f32 %v2552_v17, %v2417_v63  ;;  %v2278_v20 = vadd.f32 %v2277_v25, %v5328_v42  ;;  %v2519_v55 = vadd.f32 %v2518_v52, %v2428_v14 }
 0x1db   : > { %v1789_v11 = vpop.f32.mrf.mxu1  ;;  %v2429_v63 = vmul.f32 %v5340_v22, %v5340_v22  ;;  %v2440_v14 = vmul.f32 %v5354_v49, %v5354_v49 }
 0x1dc   : > { %7983 = vst [vmem:[#allocation56_spill] sm:$0xff] %v5433_v60  ;;  %v5441_v27 = vadd.f32 %v1789_v11, %v1596_v10  ;;  %v1598_v30 = vpop.f32.mrf.mxu0  ;;  %v2244_v10 = vadd.f32 %v2243_v0, %v5342_v40  ;;  %v2554_v13 = vadd.f32 %v2553_v45, %v2421_v16  ;;  %v2279_v58 = vadd.f32 %v2278_v20, %v5332_v7 }
 0x1dd   : > { %v1791_v28 = vpop.f32.mrf.mxu1  ;;  %v2433_v16 = vmul.f32 %v5344_v61, %v5344_v61 }
 0x1de   : > { %7984 = vst [vmem:[#allocation57_spill] sm:$0xff] %v5441_v27  ;;  %v5449_v35 = vadd.f32 %v1791_v28, %v1598_v30  ;;  %v1600_v36 = vpop.f32.mrf.mxu0  ;;  %v2520_v30 = vadd.f32 %v2519_v55, %v2432_v33  ;;  %v2245_v28 = vadd.f32 %v2244_v10, %v5348_v54  ;;  %v2555_v0 = vadd.f32 %v2554_v13, %v2425_v6 }
 0x1df   : > { %v1793_v46 = vpop.f32.mrf.mxu1  ;;  %v2444_v33 = vmul.f32 %v5367_v29, %v5367_v29  ;;  %v2437_v6 = vmul.f32 %v5350_v1, %v5350_v1 }
 0x1e0   : > { %7985 = vst [vmem:[#allocation58_spill] sm:$0xff] %v5449_v35  ;;  %v5457_v11 = vadd.f32 %v1793_v46, %v1600_v36  ;;  %v1604_v17 = vpop.f32.mrf.mxu0  ;;  %v2280_v36 = vadd.f32 %v2279_v58, %v5340_v22  ;;  %v2521_v46 = vadd.f32 %v2520_v30, %v2436_v37  ;;  %v2246_v7 = vadd.f32 %v2245_v28, %v5354_v49 }
 0x1e1   : > { %v1797_v25 = vpop.f32.mrf.mxu1  ;;  %v2556_v10 = vadd.f32 %v2555_v0, %v2429_v63  ;;  %v2448_v37 = vmul.f32 %v5385_v47, %v5385_v47  ;;  %v2441_v63 = vmul.f32 %v5362_v5, %v5362_v5 }
 0x1e2   : > { %7986 = vst [vmem:[#allocation59_spill] sm:$0xff] %v5457_v11  ;;  %v5465_v52 = vadd.f32 %v1797_v25, %v1604_v17  ;;  %v1606_v45 = vpop.f32.mrf.mxu0  ;;  %v2281_v17 = vadd.f32 %v2280_v36, %v5344_v61  ;;  %v2522_v25 = vadd.f32 %v2521_v46, %v2440_v14  ;;  %v2247_v22 = vadd.f32 %v2246_v7, %v5367_v29 }
 0x1e3   : > { %v1799_v20 = vpop.f32.mrf.mxu1  ;;  %v2557_v28 = vadd.f32 %v2556_v10, %v2433_v16  ;;  %v2452_v14 = vmul.f32 %v5401_v50, %v5401_v50  ;;  %v2445_v16 = vmul.f32 %v5374_v34, %v5374_v34 }
 0x1e4   : > { %7987 = vst [vmem:[#allocation60_spill] sm:$0xff] %v5465_v52  ;;  %v5473_v55 = vadd.f32 %v1799_v20, %v1606_v45  ;;  %v1608_v13 = vpop.f32.mrf.mxu0  ;;  %v2282_v45 = vadd.f32 %v2281_v17, %v5350_v1  ;;  %v2523_v20 = vadd.f32 %v2522_v25, %v2444_v33  ;;  %v2248_v61 = vadd.f32 %v2247_v22, %v5385_v47 }
 0x1e5   : > { %v1801_v58 = vpop.f32.mrf.mxu1  ;;  %v2558_v46 = vadd.f32 %v2557_v28, %v2437_v6  ;;  %v2456_v33 = vmul.f32 %v5417_v21, %v5417_v21  ;;  %v2449_v6 = vmul.f32 %v5393_v59, %v5393_v59 }
 0x1e6   : > { %7988 = vst [vmem:[#allocation61_spill] sm:$0xff] %v5473_v55  ;;  %v5481_v30 = vadd.f32 %v1801_v58, %v1608_v13  ;;  %v1610_v0 = vpop.f32.mrf.mxu0  ;;  %v2283_v13 = vadd.f32 %v2282_v45, %v5362_v5  ;;  %v2524_v58 = vadd.f32 %v2523_v20, %v2448_v37  ;;  %v2249_v1 = vadd.f32 %v2248_v61, %v5401_v50 }
 0x1e7   : > { %v1803_v36 = vpop.f32.mrf.mxu1  ;;  %v2559_v25 = vadd.f32 %v2558_v46, %v2441_v63  ;;  %v2460_v37 = vmul.f32 %v5433_v60, %v5433_v60  ;;  %v2453_v63 = vmul.f32 %v5409_v48, %v5409_v48 }
 0x1e8   : > { %7989 = vst [vmem:[#allocation62_spill] sm:$0xff] %v5481_v30  ;;  %v5489_v7 = vadd.f32 %v1803_v36, %v1610_v0  ;;  %v1614_v10 = vpop.f32.mrf.mxu0  ;;  %v2284_v0 = vadd.f32 %v2283_v13, %v5374_v34  ;;  %v2525_v36 = vadd.f32 %v2524_v58, %v2452_v14  ;;  %v2250_v5 = vadd.f32 %v2249_v1, %v5417_v21 }
 0x1e9   : > { %v1807_v17 = vpop.f32.mrf.mxu1  ;;  %v2560_v20 = vadd.f32 %v2559_v25, %v2445_v16  ;;  %v2464_v14 = vmul.f32 %v5449_v35, %v5449_v35  ;;  %v2457_v16 = vmul.f32 %v5425_v41, %v5425_v41 }
 0x1ea   : > { %7990 = vst [vmem:[#allocation63_spill] sm:$0xff] %v5489_v7  ;;  %v5497_v22 = vadd.f32 %v1807_v17, %v1614_v10  ;;  %v1616_v28 = vpop.f32.mrf.mxu0  ;;  %v2285_v10 = vadd.f32 %v2284_v0, %v5393_v59  ;;  %v2526_v17 = vadd.f32 %v2525_v36, %v2456_v33  ;;  %v2251_v34 = vadd.f32 %v2250_v5, %v5433_v60 }
 0x1eb   : > { %v1809_v45 = vpop.f32.mrf.mxu1  ;;  %v2561_v58 = vadd.f32 %v2560_v20, %v2449_v6  ;;  %v2468_v33 = vmul.f32 %v5465_v52, %v5465_v52  ;;  %v2461_v6 = vmul.f32 %v5441_v27, %v5441_v27 }
 0x1ec   : > { %7991 = vst [vmem:[#allocation64_spill] sm:$0xff] %v5497_v22  ;;  %v5505_v61 = vadd.f32 %v1809_v45, %v1616_v28  ;;  %v1618_v46 = vpop.f32.mrf.mxu0  ;;  %v2286_v28 = vadd.f32 %v2285_v10, %v5409_v48  ;;  %v2527_v45 = vadd.f32 %v2526_v17, %v2460_v37  ;;  %v2252_v59 = vadd.f32 %v2251_v34, %v5449_v35 }
 0x1ed   : > { %v1811_v13 = vpop.f32.mrf.mxu1  ;;  %v2562_v36 = vadd.f32 %v2561_v58, %v2453_v63  ;;  %v2472_v37 = vmul.f32 %v5481_v30, %v5481_v30  ;;  %v2465_v63 = vmul.f32 %v5457_v11, %v5457_v11 }
 0x1ee   : > { %7992 = vst [vmem:[#allocation65_spill] sm:$0xff] %v5505_v61  ;;  %v5513_v1 = vadd.f32 %v1811_v13, %v1618_v46  ;;  %v1620_v25 = vpop.f32.mrf.mxu0  ;;  %v2287_v46 = vadd.f32 %v2286_v28, %v5425_v41  ;;  %v2528_v13 = vadd.f32 %v2527_v45, %v2464_v14  ;;  %v2253_v48 = vadd.f32 %v2252_v59, %v5465_v52 }
 0x1ef   : > { %v1813_v0 = vpop.f32.mrf.mxu1  ;;  %v2563_v17 = vadd.f32 %v2562_v36, %v2457_v16  ;;  %v2476_v14 = vmul.f32 %v5497_v22, %v5497_v22  ;;  %v2469_v16 = vmul.f32 %v5473_v55, %v5473_v55 }
 0x1f0   : > { %7993 = vst [vmem:[#allocation66_spill] sm:$0xff] %v5513_v1  ;;  %v5521_v5 = vadd.f32 %v1813_v0, %v1620_v25  ;;  %v1624_v20 = vpop.f32.mrf.mxu0  ;;  %v2288_v25 = vadd.f32 %v2287_v46, %v5441_v27  ;;  %v2529_v0 = vadd.f32 %v2528_v13, %v2468_v33  ;;  %v2254_v41 = vadd.f32 %v2253_v48, %v5481_v30 }
 0x1f1   : > { %v1817_v10 = vpop.f32.mrf.mxu1  ;;  %v2564_v45 = vadd.f32 %v2563_v17, %v2461_v6  ;;  %v2480_v33 = vmul.f32 %v5513_v1, %v5513_v1  ;;  %v2473_v6 = vmul.f32 %v5489_v7, %v5489_v7 }
 0x1f2   : > { %7994 = vst [vmem:[#allocation67_spill] sm:$0xff] %v5521_v5  ;;  %v5529_v34 = vadd.f32 %v1817_v10, %v1624_v20  ;;  %v1626_v58 = vpop.f32.mrf.mxu0  ;;  %v2289_v20 = vadd.f32 %v2288_v25, %v5457_v11  ;;  %v2530_v10 = vadd.f32 %v2529_v0, %v2472_v37  ;;  %v2255_v27 = vadd.f32 %v2254_v41, %v5497_v22 }
 0x1f3   : > { %v1819_v28 = vpop.f32.mrf.mxu1  ;;  %v2565_v13 = vadd.f32 %v2564_v45, %v2465_v63  ;;  %v2477_v63 = vmul.f32 %v5505_v61, %v5505_v61 }
 0x1f4   : > { %7995 = vst [vmem:[#allocation68_spill] sm:$0xff] %v5529_v34  ;;  %v5537_v59 = vadd.f32 %v1819_v28, %v1626_v58  ;;  %v1628_v36 = vpop.f32.mrf.mxu0  ;;  %v2290_v58 = vadd.f32 %v2289_v20, %v5473_v55  ;;  %v2531_v28 = vadd.f32 %v2530_v10, %v2476_v14  ;;  %v2256_v11 = vadd.f32 %v2255_v27, %v5513_v1 }
 0x1f5   : > { %v1821_v46 = vpop.f32.mrf.mxu1  ;;  %v2484_v37 = vmul.f32 %v5529_v34, %v5529_v34  ;;  %v2566_v0 = vadd.f32 %v2565_v13, %v2469_v16  ;;  %v2481_v16 = vmul.f32 %v5521_v5, %v5521_v5 }
 0x1f6   : > { %7996 = vst [vmem:[#allocation69_spill] sm:$0xff] %v5537_v59  ;;  %v5545_v48 = vadd.f32 %v1821_v46, %v1628_v36  ;;  %v1630_v17 = vpop.f32.mrf.mxu0  ;;  %v2291_v36 = vadd.f32 %v2290_v58, %v5489_v7  ;;  %v2532_v46 = vadd.f32 %v2531_v28, %v2480_v33  ;;  %v2257_v55 = vadd.f32 %v2256_v11, %v5529_v34 }
 0x1f7   : > { %v1823_v25 = vpop.f32.mrf.mxu1  ;;  %v2567_v10 = vadd.f32 %v2566_v0, %v2473_v6  ;;  %v2485_v6 = vmul.f32 %v5537_v59, %v5537_v59 }
 0x1f8   : > { %7997 = vst [vmem:[#allocation70_spill] sm:$0xff] %v5545_v48  ;;  %v5553_v41 = vadd.f32 %v1823_v25, %v1630_v17  ;;  %v1634_v45 = vpop.f32.mrf.mxu0  ;;  %v2488_v14 = vmul.f32 %v5545_v48, %v5545_v48  ;;  %v2292_v17 = vadd.f32 %v2291_v36, %v5505_v61  ;;  %v2533_v25 = vadd.f32 %v2532_v46, %v2484_v37 }
 0x1f9   : > { %v1827_v20 = vpop.f32.mrf.mxu1  ;;  %v2258_v7 = vadd.f32 %v2257_v55, %v5545_v48  ;;  %v2568_v28 = vadd.f32 %v2567_v10, %v2477_v63 }
 0x1fa   : > { %7998 = vst [vmem:[#allocation71_spill] sm:$0xff] %v5553_v41  ;;  %v5561_v27 = vadd.f32 %v1827_v20, %v1634_v45  ;;  %v1636_v13 = vpop.f32.mrf.mxu0  ;;  %v2293_v45 = vadd.f32 %v2292_v17, %v5521_v5  ;;  %v2534_v20 = vadd.f32 %v2533_v25, %v2488_v14  ;;  %v2489_v46 = vmul.f32 %v5553_v41, %v5553_v41 }
 0x1fb   : > { %v1829_v58 = vpop.f32.mrf.mxu1  ;;  %v2569_v37 = vadd.f32 %v2568_v28, %v2481_v16 }
 0x1fc   : > { %v2492_v33 = vmul.f32 %v5561_v27, %v5561_v27  ;;  %v5569_v11 = vadd.f32 %v1829_v58, %v1636_v13  ;;  %v1638_v0 = vpop.f32.mrf.mxu0  ;;  %v2259_v61 = vadd.f32 %v2258_v7, %v5561_v27  ;;  %v2294_v55 = vadd.f32 %v2293_v45, %v5537_v59 }
 0x1fd   : > { %v1831_v36 = vpop.f32.mrf.mxu1  ;;  %v2570_v14 = vadd.f32 %v2569_v37, %v2485_v6 }
 0x1fe   : > { %7999 = vst [vmem:[#allocation72_spill] sm:$0xff] %v5569_v11  ;;  %v5575_v42 = vadd.f32 %v1831_v36, %v1638_v0  ;;  %v1640_v13 = vpop.f32.mrf.mxu0  ;;  %v2535_v10 = vadd.f32 %v2534_v20, %v2492_v33  ;;  %v2493_v7 = vmul.f32 %v5569_v11, %v5569_v11  ;;  %v2295_v28 = vadd.f32 %v2294_v55, %v5553_v41 }
 0x1ff   : > { %v1833_v63 = vpop.f32.mrf.mxu1  ;;  %v2571_v36 = vadd.f32 %v2570_v14, %v2489_v46 }
 0x200   : > { %v2260_v17 = vadd.f32 %v2259_v61, %v5575_v42  ;;  %v2496_v58 = vmul.f32 %v5575_v42, %v5575_v42  ;;  %v5583_v5 = vadd.f32 %v1833_v63, %v1640_v13  ;;  %v1644_v16 = vpop.f32.mrf.mxu0  ;;  %v2296_v13 = vadd.f32 %v2295_v28, %v5569_v11 }
 0x201   : > { %v1837_v25 = vpop.f32.mrf.mxu1  ;;  %v2572_v59 = vadd.f32 %v2571_v36, %v2493_v7 }
 0x202   : > { %8000 = vst [vmem:[#allocation73_spill] sm:$0xff] %v5583_v5  ;;  %v2536_v45 = vadd.f32 %v2535_v10, %v2496_v58  ;;  %v5588_v0 = vadd.f32 %v1837_v25, %v1644_v16  ;;  %v2497_v61 = vmul.f32 %v5583_v5, %v5583_v5  ;;  %v1646_v33 = vpop.f32.mrf.mxu0  ;;  %v2297_v58 = vadd.f32 %v2296_v13, %v5583_v5 }
 0x203   : > { %v1839_v20 = vpop.f32.mrf.mxu1 }
 0x204   : > { %v2261_v6 = vadd.f32 %v2260_v17, %v5588_v0  ;;  %v2500_v37 = vmul.f32 %v5588_v0, %v5588_v0  ;;  %v5596_v63 = vadd.f32 %v1839_v20, %v1646_v33  ;;  %v1648_v55 = vpop.f32.mrf.mxu0  ;;  %v2573_v25 = vadd.f32 %v2572_v59, %v2497_v61 }
 0x205   : > { %v1841_v10 = vpop.f32.mrf.mxu1 }
 0x206   : > { %v2537_v46 = vadd.f32 %v2536_v45, %v2500_v37  ;;  %v2501_v14 = vmul.f32 %v5596_v63, %v5596_v63  ;;  %v5601_v16 = vadd.f32 %v1841_v10, %v1648_v55  ;;  %v1650_v28 = vpop.f32.mrf.mxu0  ;;  %v2298_v17 = vadd.f32 %v2297_v58, %v5596_v63 }
 0x207   : > { %v1843_v11 = vpop.f32.mrf.mxu1 }
 0x208   : > { %v2262_v41 = vadd.f32 %v2261_v6, %v5601_v16  ;;  %v2504_v7 = vmul.f32 %v5601_v16, %v5601_v16  ;;  %v5607_v36 = vadd.f32 %v1843_v11, %v1650_v28  ;;  %v2574_v33 = vadd.f32 %v2573_v25, %v2501_v14  ;;  %v1880_v20 = vpop.f32.mrf.mxu0 }
 0x209   : > { %v2073_v45 = vpop.f32.mrf.mxu1 }
 0x20a   : > { %v2263_v13 = vrot.slane %v2262_v41, 4  ;;  %v2538_v37 = vadd.f32 %v2537_v46, %v2504_v7  ;;  %v2299_v55 = vadd.f32 %v2298_v17, %v5607_v36  ;;  %v2505_v59 = vmul.f32 %v5607_v36, %v5607_v36  ;;  %v1882_v10 = vpop.f32.mrf.mxu0 }
 0x20b   : > { %v5612_v61 = vadd.f32 %v2073_v45, %v1880_v20  ;;  %v2075_v58 = vpop.f32.mrf.mxu1 }
 0x20c   : > { %v2264_v6 = vadd.f32 %v2263_v13, %v2262_v41  ;;  %v2539_v5 = vrot.slane %v2538_v37, 4  ;;  %v2300_v31 = vrot.slane %v2299_v55, 4  ;;  %v2575_v8 = vadd.f32 %v2574_v33, %v2505_v59  ;;  %v5616_v14 = vpop.f32.mrf.mxu0 }
 0x20d   : > { %8001 = vst [vmem:[#allocation74_spill] sm:$0xff] %v5612_v61  ;;  %v5614_v11 = vadd.f32 %v2075_v58, %v1882_v10  ;;  %v5618_v25 = vpop.f32.mrf.mxu1 }
 0x20e   : > { %v2265_v46 = vrot.slane %v2264_v6, 2  ;;  %v2540_v28 = vadd.f32 %v2539_v5, %v2538_v37  ;;  %v2301_v17 = vadd.f32 %v2300_v31, %v2299_v55  ;;  %v2576_v7 = vrot.slane %v2575_v8, 4  ;;  %v5620_v51 = vpop.f32.mrf.mxu0 }
 0x20f   : > { %8002 = vst [vmem:[#allocation75_spill] sm:$0xff] %v5614_v11  ;;  %v5622_v20 = vpop.f32.mrf.mxu1 }
 0x210   : > { %v2266_v45 = vadd.f32 %v2265_v46, %v2264_v6  ;;  %v2541_v2 = vrot.slane %v2540_v28, 2  ;;  %v2302_v41 = vrot.slane %v2301_v17, 2  ;;  %v2577_v13 = vadd.f32 %v2576_v7, %v2575_v8  ;;  %v5624_v53 = vpop.f32.mrf.mxu0 }
 0x211   : > { %v5626_v33 = vpop.f32.mrf.mxu1 }
 0x212   : > { %v2267_v59 = vrot.slane %v2266_v45, 1  ;;  %v2542_v10 = vadd.f32 %v2541_v2, %v2540_v28  ;;  %v2303_v58 = vadd.f32 %v2302_v41, %v2301_v17  ;;  %v2578_v24 = vrot.slane %v2577_v13, 2  ;;  %v5628_v3 = vpop.f32.mrf.mxu0 }
 0x213   : > { %v5630_v31 = vpop.f32.mrf.mxu1 }
 0x214   : > { %v2268_v5 = vadd.f32 %v2267_v59, %v2266_v45  ;;  %v2543_v37 = vrot.slane %v2542_v10, 1  ;;  %v2304_v55 = vrot.slane %v2303_v58, 1  ;;  %v2579_v43 = vadd.f32 %v2578_v24, %v2577_v13  ;;  %v5632_v6 = vpop.f32.mrf.mxu0 }
 0x215   : > { %v5634_v46 = vpop.f32.mrf.mxu1 }
 0x216   : > { %v2544_v8 = vadd.f32 %v2543_v37, %v2542_v10  ;;  %v2656_v7 = vmul.f32 0.00390625, %v2268_v5  ;;  %v2305_v26 = vadd.f32 %v2304_v55, %v2303_v58  ;;  %v2580_v9 = vrot.slane %v2579_v43, 1  ;;  %v5636_v48 = vpop.f32.mrf.mxu0 }
 0x217   : > { %v5638_v2 = vpop.f32.mrf.mxu1 }
 0x218   : > { %v2660_v28 = vmul.f32 0.00390625, %v2544_v8  ;;  %v2664_v17 = vmul.f32 %v2656_v7, %v2656_v7  ;;  %v2581_v41 = vadd.f32 %v2580_v9, %v2579_v43  ;;  %v2657_v34 = vmul.f32 0.00390625, %v2305_v26  ;;  %v5640_v45 = vpop.f32.mrf.mxu0 }
 0x219   : > { %v5642_v59 = vpop.f32.mrf.mxu1  ;;  %v2686_v9 = vlaneseq }
 0x21a   : > { %v2668_v24 = vsub.f32 %v2660_v28, %v2664_v17  ;;  %v2661_v13 = vmul.f32 0.00390625, %v2581_v41  ;;  %v2665_v1 = vmul.f32 %v2657_v34, %v2657_v34  ;;  %v5644_v22 = vpop.f32.mrf.mxu0 }
 0x21b   : > { %v5646_v10 = vpop.f32.mrf.mxu1  ;;  %v5660_v41 = vshrl.u32 %v2686_v9, 7 }
 0x21c   : > { %v2672_v58 = vmax.f32 %v2668_v24, 0.0  ;;  %v2669_v5 = vsub.f32 %v2661_v13, %v2665_v1  ;;  %v5648_v37 = vpop.f32.mrf.mxu0 }
 0x21d   : > { %v5650_v55 = vpop.f32.mrf.mxu1  ;;  %8003 = vst [vmem:[#allocation76_spill] sm:$0xff] %v5660_v41  ;;  %v7784_v40 = vsub.s32 1, %v5660_v41 }
 0x21e   : > { %v2676_v8 = vadd.f32 1e-05, %v2672_v58  ;;  %v2673_v26 = vmax.f32 %v2669_v5, 0.0  ;;  %v5652_v43 = vpop.f32.mrf.mxu0  ;;  %v5671_v5 = vsub.s32 0, %v5660_v41 }
 0x21f   : > { %v5654_v30 = vpop.f32.mrf.mxu1 }
 0x220   : > { %4466 = vrsqrt.f32 %v2676_v8  ;;  %v5656_v28 = vpop.f32.mrf.mxu0  ;;  %v2677_v1 = vadd.f32 1e-05, %v2673_v26  ;;  %8004 = vst [vmem:[#allocation77_spill] sm:$0xff] %v5671_v5  ;;  %v5674_v8 = vld [vmem:[%s4899_s21] sm:$0xf] }
 0x221   : > { %v5658_v17 = vpop.f32.mrf.mxu1  ;;  %8005 = vst [vmem:[#allocation78_spill] sm:$0xff] %v5674_v8  ;;  %v2689_v21 = vrot.slane %v5674_v8, %v5671_v5 }
 0x222   : > { %v5662_v24 = vpop.f32.mrf.mxu0  ;;  %4468 = vrsqrt.f32 %v2677_v1 }
 0x223   : > { %v5664_v13 = vpop.f32.mrf.mxu1 }
 0x224   : > { %v5666_v58 = vpop.f32.mrf.mxu0 }
 0x225   : > { %v5668_v52 = vpop.f32.mrf.mxu1 }
 0x226   : > { %v5676_v35 = vpop.f32.mrf.mxu0 }
 0x227   : > { %v5678_v60 = vpop.f32.mrf.mxu1 }
 0x228   : > { %v5680_v9 = vpop.f32.mrf.mxu0 }
 0x229   : > { %v5682_v26 = vpop.f32.mrf.mxu1 }
 0x22a   : > { %v5686_v50 = vpop.f32.mrf.mxu0 }
 0x22b   : > { %v5688_v47 = vpop.f32.mrf.mxu1 }
 0x22c   : > { %v5690_v49 = vpop.f32.mrf.mxu0 }
 0x22d   : > { %v4467_v29 = vpop.eup %4466  ;;  %v5692_v1 = vpop.f32.mrf.mxu1 }
 0x22e   : > { %v2706_v54 = vmul.f32 %v4467_v29, %v2689_v21  ;;  %v5695_v44 = vpop.f32.mrf.mxu0  ;;  %v2693_v29 = vrot.slane %v5674_v8, %v7784_v40 }
 0x22f   : > { %v5697_v57 = vpop.f32.mrf.mxu1  ;;  %v4469_v21 = vpop.eup %4468 }
 0x230   : > { %v5699_v32 = vmul.f32 %v2706_v54, %v2656_v7  ;;  %v5702_v19 = vrot.slane %v2706_v54, %v5671_v5  ;;  %v5704_v23 = vpop.f32.mrf.mxu0  ;;  %v2707_v56 = vmul.f32 %v4469_v21, %v2693_v29 }
 0x231   : > { %v5706_v12 = vpop.f32.mrf.mxu1 }
 0x232   : > { %8006 = vst [vmem:[#allocation79_spill] sm:$0xff] %v5699_v32  ;;  %8007 = vst [vmem:[#allocation80_spill] sm:$0xff] %v5702_v19  ;;  %v5710_v62 = vmul.f32 %v5702_v19, %v5601_v16  ;;  %v5715_v39 = vpop.f32.mrf.mxu0  ;;  %v5729_v16 = vmul.f32 %v5702_v19, %v5561_v27  ;;  %v5733_v40 = vmul.f32 %v5702_v19, %v5575_v42 }
 0x233   : > { %v5717_v7 = vpop.f32.mrf.mxu1  ;;  %v5743_v29 = vmul.f32 %v2707_v56, %v2657_v34  ;;  %v5746_v21 = vrot.slane %v2707_v56, %v5671_v5  ;;  %v5780_v42 = vadd.f32 %v5618_v25, %v5616_v14  ;;  %v5806_v25 = vadd.f32 %v5634_v46, %v5632_v6 }
 0x234   : > { %8008 = vst [vmem:[#allocation81_spill] sm:$0xff] %v5710_v62  ;;  %v5719_v15 = vpop.f32.mrf.mxu0  ;;  %8009 = vst [vmem:[#allocation82_spill] sm:$0xff] %v5729_v16  ;;  %v5737_v62 = vmul.f32 %v5702_v19, %v5588_v0  ;;  %v5824_v6 = vadd.f32 %v5642_v59, %v5640_v45  ;;  %v2383_v46 = vmul.f32 %v5614_v11, %v5614_v11 }
 0x235   : > { %v5721_v54 = vpop.f32.mrf.mxu1  ;;  %8010 = vst [vmem:[#allocation83_spill] sm:$0xff] %v5733_v40  ;;  %8012 = vst [vmem:[#allocation85_spill] sm:$0xff] %v5743_v29  ;;  %v5756_v0 = vmul.f32 %v5746_v21, %v5607_v36  ;;  %v5776_v36 = vmul.f32 %v5746_v21, %v5596_v63  ;;  %v5796_v63 = vadd.f32 %v5630_v31, %v5628_v3 }
 0x236   : > { %v5723_v38 = vpop.f32.mrf.mxu0  ;;  %8011 = vst [vmem:[#allocation84_spill] sm:$0xff] %v5737_v62  ;;  %8013 = vst [vmem:[#allocation86_spill] sm:$0xff] %v5746_v21  ;;  %v2382_v31 = vmul.f32 %v5612_v61, %v5612_v61  ;;  %v2394_v59 = vmul.f32 %v5806_v25, %v5806_v25 }
 0x237   : > { %v5725_v18 = vpop.f32.mrf.mxu1  ;;  %8015 = vst [vmem:[#allocation88_spill] sm:$0xff] %v5756_v0  ;;  %8017 = vst [vmem:[#allocation90_spill] sm:$0xff] %v5776_v36  ;;  %v5784_v0 = vadd.f32 %v5622_v20, %v5620_v51  ;;  %v2386_v51 = vmul.f32 %v5780_v42, %v5780_v42 }
 0x238   : > { %v5739_v8 = vpop.f32.mrf.mxu0  ;;  %8018 = vst [vmem:[#allocation91_spill] sm:$0xff] %v5780_v42 }
 0x239   : > { %v5741_v4 = vpop.f32.mrf.mxu1  ;;  %8019 = vst [vmem:[#allocation92_spill] sm:$0xff] %v5784_v0  ;;  %v2387_v20 = vmul.f32 %v5784_v0, %v5784_v0  ;;  %v2343_v45 = vadd.f32 %v5784_v0, %v5614_v11 }
 0x23a   : > { %v5748_v41 = vpop.f32.mrf.mxu0 }
 0x23b   : > { %v5750_v27 = vpop.f32.mrf.mxu1  ;;  %v2344_v11 = vadd.f32 %v2343_v45, %v5796_v63 }
 0x23c   : > { %8014 = vst [vmem:[#allocation87_spill] sm:$0xff] %v5750_v27  ;;  %v5758_v62 = vpop.f32.mrf.mxu0 }
 0x23d   : > { %v5760_v40 = vpop.f32.mrf.mxu1 }
 0x23e   : > { %v5762_v34 = vpop.f32.mrf.mxu0 }
 0x23f   : > { %v5764_v16 = vpop.f32.mrf.mxu1 }
 0x240   : > { %v5766_v56 = vpop.f32.mrf.mxu0 }
 0x241   : > { %v5768_v5 = vpop.f32.mrf.mxu1 }
 0x242   : > { %v5770_v19 = vpop.f32.mrf.mxu0 }
 0x243   : > { %8016 = vst [vmem:[#allocation89_spill] sm:$0xff] %v5770_v19  ;;  %v5772_v27 = vpop.f32.mrf.mxu1  ;;  %v5792_v19 = vadd.f32 %v5626_v33, %v5624_v53  ;;  %v5812_v53 = vadd.f32 %v5638_v2, %v5636_v48  ;;  %v2306_v48 = vadd.f32 %v5780_v42, %v5612_v61  ;;  %v2391_v2 = vmul.f32 %v5796_v63, %v5796_v63 }
 0x244   : > { %v5786_v29 = vpop.f32.mrf.mxu0  ;;  %v5846_v42 = vadd.f32 %v5650_v55, %v5648_v37  ;;  %v2619_v61 = vadd.f32 %v2387_v20, %v2383_v46  ;;  %v2398_v37 = vmul.f32 %v5824_v6, %v5824_v6  ;;  %v5864_v55 = vadd.f32 %v5658_v17, %v5656_v28 }
 0x245   : > { %v5788_v32 = vpop.f32.mrf.mxu1  ;;  %v2390_v21 = vmul.f32 %v5792_v19, %v5792_v19  ;;  %v2345_v45 = vadd.f32 %v2344_v11, %v5812_v53 }
 0x246   : > { %8020 = vst [vmem:[#allocation93_spill] sm:$0xff] %v5788_v32  ;;  %v5798_v36 = vpop.f32.mrf.mxu0  ;;  %v2307_v32 = vadd.f32 %v2306_v48, %v5792_v19  ;;  %v2620_v20 = vadd.f32 %v2619_v61, %v2391_v2  ;;  %v2402_v28 = vmul.f32 %v5846_v42, %v5846_v42 }
 0x247   : > { %8021 = vst [vmem:[#allocation94_spill] sm:$0xff] %v5798_v36  ;;  %v5800_v14 = vpop.f32.mrf.mxu1  ;;  %v2582_v36 = vadd.f32 %v2386_v51, %v2382_v31 }
 0x248   : > { %8022 = vst [vmem:[#allocation95_spill] sm:$0xff] %v5800_v14  ;;  %v5814_v3 = vpop.f32.mrf.mxu0  ;;  %v2308_v46 = vadd.f32 %v2307_v32, %v5806_v25  ;;  %v5882_v32 = vadd.f32 %v5668_v52, %v5666_v58  ;;  %v2406_v52 = vmul.f32 %v5864_v55, %v5864_v55  ;;  %v5900_v58 = vadd.f32 %v5682_v26, %v5680_v9 }
 0x249   : > { %8023 = vst [vmem:[#allocation96_spill] sm:$0xff] %v5814_v3  ;;  %v5816_v33 = vpop.f32.mrf.mxu1  ;;  %v2583_v0 = vadd.f32 %v2582_v36, %v2390_v21  ;;  %v5918_v26 = vadd.f32 %v5692_v1, %v5690_v49  ;;  %v5936_v1 = vadd.f32 %v5706_v12, %v5704_v23  ;;  %v5954_v23 = vadd.f32 %v5721_v54, %v5719_v15 }
 0x24a   : > { %8024 = vst [vmem:[#allocation97_spill] sm:$0xff] %v5816_v33  ;;  %v5834_v33 = vadd.f32 %v5646_v10, %v5644_v22  ;;  %v5836_v3 = vpop.f32.mrf.mxu0  ;;  %v2395_v22 = vmul.f32 %v5812_v53, %v5812_v53  ;;  %v5853_v10 = vadd.f32 %v5654_v30, %v5652_v43  ;;  %v5871_v43 = vadd.f32 %v5664_v13, %v5662_v24 }
 0x24b   : > { %v5838_v14 = vpop.f32.mrf.mxu1  ;;  %v2584_v48 = vadd.f32 %v2583_v0, %v2394_v59  ;;  %v2309_v17 = vadd.f32 %v2308_v46, %v5824_v6  ;;  %v5889_v13 = vadd.f32 %v5678_v60, %v5676_v35  ;;  %v5907_v35 = vadd.f32 %v5688_v47, %v5686_v50 }
 0x24c   : > { %v5855_v51 = vpop.f32.mrf.mxu0  ;;  %v2399_v30 = vmul.f32 %v5834_v33, %v5834_v33  ;;  %8025 = vst [vmem:[#allocation98_spill] sm:$0xff] %v5871_v43  ;;  %v2621_v61 = vadd.f32 %v2620_v20, %v2395_v22  ;;  %v2403_v24 = vmul.f32 %v5853_v10, %v5853_v10  ;;  %v2346_v59 = vadd.f32 %v2345_v45, %v5834_v33 }
 0x24d   : > { %v5857_v31 = vpop.f32.mrf.mxu1  ;;  %8026 = vst [vmem:[#allocation99_spill] sm:$0xff] %v5889_v13  ;;  %v2585_v2 = vadd.f32 %v2584_v48, %v2398_v37  ;;  %v2310_v20 = vadd.f32 %v2309_v17, %v5846_v42  ;;  %v2407_v60 = vmul.f32 %v5871_v43, %v5871_v43  ;;  %8027 = vst [vmem:[#allocation100_spill] sm:$0xff] %v5907_v35 }
 0x24e   : > { %v5873_v21 = vpop.f32.mrf.mxu0  ;;  %v2622_v22 = vadd.f32 %v2621_v61, %v2399_v30  ;;  %v2347_v45 = vadd.f32 %v2346_v59, %v5853_v10  ;;  %v2410_v9 = vmul.f32 %v5882_v32, %v5882_v32  ;;  %v2411_v47 = vmul.f32 %v5889_v13, %v5889_v13 }
 0x24f   : > { %v5875_v36 = vpop.f32.mrf.mxu1  ;;  %v2586_v48 = vadd.f32 %v2585_v2, %v2402_v28  ;;  %v2311_v61 = vadd.f32 %v2310_v20, %v5864_v55  ;;  %v5925_v50 = vadd.f32 %v5697_v57, %v5695_v44  ;;  %v2414_v49 = vmul.f32 %v5900_v58, %v5900_v58 }
 0x250   : > { %v5891_v0 = vpop.f32.mrf.mxu0  ;;  %v2623_v30 = vadd.f32 %v2622_v22, %v2403_v24  ;;  %v2348_v59 = vadd.f32 %v2347_v45, %v5871_v43  ;;  %v2415_v57 = vmul.f32 %v5907_v35, %v5907_v35  ;;  %v5943_v44 = vadd.f32 %v5717_v7, %v5715_v39 }
 0x251   : > { %v5893_v11 = vpop.f32.mrf.mxu1  ;;  %8028 = vst [vmem:[#allocation101_spill] sm:$0xff] %v5925_v50  ;;  %v2587_v2 = vadd.f32 %v2586_v48, %v2406_v52  ;;  %v2312_v22 = vadd.f32 %v2311_v61, %v5882_v32  ;;  %v2418_v12 = vmul.f32 %v5918_v26, %v5918_v26  ;;  %v2419_v39 = vmul.f32 %v5925_v50, %v5925_v50 }
 0x252   : > { %v5909_v37 = vpop.f32.mrf.mxu0  ;;  %v2624_v24 = vadd.f32 %v2623_v30, %v2407_v60  ;;  %8029 = vst [vmem:[#allocation102_spill] sm:$0xff] %v5943_v44  ;;  %v2349_v45 = vadd.f32 %v2348_v59, %v5889_v13  ;;  %v5961_v7 = vadd.f32 %v5725_v18, %v5723_v38  ;;  %v2422_v15 = vmul.f32 %v5936_v1, %v5936_v1  ;;  %v8031_v38 = vld [vmem:[#allocation87_spill] sm:$0xff] }
 0x253   : > { %v5911_v46 = vpop.f32.mrf.mxu1  ;;  %v2588_v48 = vadd.f32 %v2587_v2, %v2410_v9  ;;  %v2313_v30 = vadd.f32 %v2312_v22, %v5900_v58  ;;  %v5972_v54 = vadd.f32 %v5741_v4, %v5739_v8  ;;  %v2423_v18 = vmul.f32 %v5943_v44, %v5943_v44 }
 0x254   : > { %v5927_v28 = vpop.f32.mrf.mxu0  ;;  %v2625_v60 = vadd.f32 %v2624_v24, %v2411_v47  ;;  %8030 = vst [vmem:[#allocation103_spill] sm:$0xff] %v5961_v7  ;;  %v2350_v59 = vadd.f32 %v2349_v45, %v5907_v35  ;;  %v5979_v22 = vadd.f32 %v8031_v38, %v5748_v41  ;;  %v2426_v4 = vmul.f32 %v5954_v23, %v5954_v23 }
 0x255   : > { %v5929_v17 = vpop.f32.mrf.mxu1  ;;  %v2589_v2 = vadd.f32 %v2588_v48, %v2414_v49  ;;  %v2314_v24 = vadd.f32 %v2313_v30, %v5918_v26  ;;  %v5990_v8 = vadd.f32 %v5760_v40, %v5758_v62  ;;  %v2427_v41 = vmul.f32 %v5961_v7, %v5961_v7 }
 0x256   : > { %v5945_v52 = vpop.f32.mrf.mxu0  ;;  %v2626_v47 = vadd.f32 %v2625_v60, %v2415_v57  ;;  %8032 = vst [vmem:[#allocation87_spill] sm:$0xff] %v5979_v22  ;;  %v2351_v35 = vadd.f32 %v2350_v59, %v5925_v50  ;;  %v5997_v30 = vadd.f32 %v5764_v16, %v5762_v34  ;;  %v2430_v62 = vmul.f32 %v5972_v54, %v5972_v54  ;;  %v8034_v34 = vld [vmem:[#allocation89_spill] sm:$0xff]  ;;  %v8037_v50 = vld [vmem:[#allocation95_spill] sm:$0xff] }
 0x257   : > { %v5947_v20 = vpop.f32.mrf.mxu1  ;;  %v2590_v45 = vadd.f32 %v2589_v2, %v2418_v12  ;;  %v2315_v60 = vadd.f32 %v2314_v24, %v5936_v1  ;;  %v6008_v40 = vadd.f32 %v5768_v5, %v5766_v56  ;;  %v2431_v16 = vmul.f32 %v5979_v22, %v5979_v22  ;;  %v8035_v56 = vld [vmem:[#allocation93_spill] sm:$0xff] }
 0x258   : > { %v5963_v9 = vpop.f32.mrf.mxu0  ;;  %v2627_v57 = vadd.f32 %v2626_v47, %v2419_v39  ;;  %8033 = vst [vmem:[#allocation104_spill] sm:$0xff] %v5997_v30  ;;  %v2352_v38 = vadd.f32 %v2351_v35, %v5943_v44  ;;  %v6015_v24 = vadd.f32 %v5772_v27, %v8034_v34  ;;  %v2434_v5 = vmul.f32 %v5990_v8, %v5990_v8  ;;  %v8036_v34 = vld [vmem:[#allocation94_spill] sm:$0xff] }
 0x259   : > { %v5965_v61 = vpop.f32.mrf.mxu1  ;;  %v2591_v59 = vadd.f32 %v2590_v45, %v2422_v15  ;;  %v2316_v47 = vadd.f32 %v2315_v60, %v5954_v23  ;;  %v2435_v27 = vmul.f32 %v5997_v30, %v5997_v30  ;;  %v6033_v13 = vadd.f32 %v8037_v50, %v8036_v34 }
 0x25a   : > { %v5981_v49 = vpop.f32.mrf.mxu0  ;;  %v2628_v39 = vadd.f32 %v2627_v57, %v2423_v18  ;;  %v2353_v44 = vadd.f32 %v2352_v38, %v5961_v7  ;;  %v6026_v18 = vadd.f32 %v8035_v56, %v5786_v29  ;;  %v2438_v29 = vmul.f32 %v6008_v40, %v6008_v40 }
 0x25b   : > { %v5983_v48 = vpop.f32.mrf.mxu1  ;;  %v2592_v45 = vadd.f32 %v2591_v59, %v2426_v4  ;;  %v2317_v60 = vadd.f32 %v2316_v47, %v5972_v54  ;;  %v2439_v50 = vmul.f32 %v6015_v24, %v6015_v24  ;;  %v6051_v34 = vadd.f32 %v5838_v14, %v5836_v3 }
 0x25c   : > { %v5999_v12 = vpop.f32.mrf.mxu0  ;;  %v2629_v57 = vadd.f32 %v2628_v39, %v2427_v41  ;;  %v2354_v7 = vadd.f32 %v2353_v44, %v5979_v22  ;;  %v8038_v41 = vld [vmem:[#allocation96_spill] sm:$0xff]  ;;  %v8039_v39 = vld [vmem:[#allocation97_spill] sm:$0xff]  ;;  %v2443_v14 = vmul.f32 %v6033_v13, %v6033_v13  ;;  %v6067_v3 = vadd.f32 %v5875_v36, %v5873_v21 }
 0x25d   : > { %v6001_v2 = vpop.f32.mrf.mxu1  ;;  %v2593_v38 = vadd.f32 %v2592_v45, %v2430_v62  ;;  %v6044_v47 = vadd.f32 %v8039_v39, %v8038_v41  ;;  %v2318_v43 = vadd.f32 %v2317_v60, %v5990_v8  ;;  %v2442_v41 = vmul.f32 %v6026_v18, %v6026_v18 }
 0x25e   : > { %v6017_v15 = vpop.f32.mrf.mxu0  ;;  %v2630_v56 = vadd.f32 %v2629_v57, %v2431_v16  ;;  %v2355_v22 = vadd.f32 %v2354_v7, %v5997_v30  ;;  %v6060_v16 = vadd.f32 %v5857_v31, %v5855_v51  ;;  %8040 = vst [vmem:[#allocation89_spill] sm:$0xff] %v6067_v3  ;;  %v6074_v51 = vadd.f32 %v5893_v11, %v5891_v0 }
 0x25f   : > { %v6019_v35 = vpop.f32.mrf.mxu1  ;;  %v2594_v45 = vadd.f32 %v2593_v38, %v2434_v5  ;;  %v2319_v60 = vadd.f32 %v2318_v43, %v6008_v40  ;;  %v2446_v30 = vmul.f32 %v6044_v47, %v6044_v47  ;;  %v6081_v21 = vadd.f32 %v5911_v46, %v5909_v37 }
 0x260   : > { %v6035_v4 = vpop.f32.mrf.mxu0  ;;  %v2631_v57 = vadd.f32 %v2630_v56, %v2435_v27  ;;  %v2356_v39 = vadd.f32 %v2355_v22, %v6015_v24  ;;  %v2447_v27 = vmul.f32 %v6051_v34, %v6051_v34  ;;  %v6088_v0 = vadd.f32 %v5929_v17, %v5927_v28 }
 0x261   : > { %v6037_v59 = vpop.f32.mrf.mxu1  ;;  %v2595_v7 = vadd.f32 %v2594_v45, %v2438_v29  ;;  %v2320_v43 = vadd.f32 %v2319_v60, %v6026_v18  ;;  %8041 = vst [vmem:[#allocation93_spill] sm:$0xff] %v6081_v21  ;;  %v2450_v45 = vmul.f32 %v6060_v16, %v6060_v16  ;;  %v6095_v37 = vadd.f32 %v5947_v20, %v5945_v52 }
 0x262   : > { %v6053_v62 = vpop.f32.mrf.mxu0  ;;  %v2632_v31 = vadd.f32 %v2631_v57, %v2439_v50  ;;  %v2357_v56 = vadd.f32 %v2356_v39, %v6033_v13  ;;  %v2451_v57 = vmul.f32 %v6067_v3, %v6067_v3  ;;  %v2454_v39 = vmul.f32 %v6074_v51, %v6074_v51 }
 0x263   : > { %v2185_v44 = vpop.f32.mrf.mxu1  ;;  %v2596_v22 = vadd.f32 %v2595_v7, %v2442_v41  ;;  %v2321_v50 = vadd.f32 %v2320_v43, %v6044_v47  ;;  %8042 = vst [vmem:[#allocation94_spill] sm:$0xff] %v6095_v37  ;;  %v6102_v28 = vadd.f32 %v5965_v61, %v5963_v9  ;;  %v6109_v52 = vadd.f32 %v5983_v48, %v5981_v49 }
 0x264   : > { %v1994_v5 = vpop.f32.mrf.mxu0  ;;  %v2633_v11 = vadd.f32 %v2632_v31, %v2443_v14  ;;  %v2358_v7 = vadd.f32 %v2357_v56, %v6051_v34  ;;  %v2455_v31 = vmul.f32 %v6081_v21, %v6081_v21  ;;  %v2458_v56 = vmul.f32 %v6088_v0, %v6088_v0 }
 0x265   : > { %v2187_v38 = vpop.f32.mrf.mxu1  ;;  %v2597_v60 = vadd.f32 %v2596_v22, %v2446_v30  ;;  %v2322_v14 = vadd.f32 %v2321_v50, %v6060_v16  ;;  %8043 = vst [vmem:[#allocation95_spill] sm:$0xff] %v6109_v52  ;;  %v6116_v9 = vadd.f32 %v6001_v2, %v5999_v12  ;;  %v6123_v49 = vadd.f32 %v6019_v35, %v6017_v15 }
 0x266   : > { %v1996_v36 = vpop.f32.mrf.mxu0  ;;  %v2634_v17 = vadd.f32 %v2633_v11, %v2447_v27  ;;  %v2359_v22 = vadd.f32 %v2358_v7, %v6067_v3  ;;  %v2459_v11 = vmul.f32 %v6095_v37, %v6095_v37  ;;  %v6129_v12 = vadd.f32 %v6037_v59, %v6035_v4 }
 0x267   : > { %v2189_v29 = vpop.f32.mrf.mxu1  ;;  %v2598_v43 = vadd.f32 %v2597_v60, %v2450_v45  ;;  %v2323_v27 = vadd.f32 %v2322_v14, %v6074_v51  ;;  %8044 = vst [vmem:[#allocation96_spill] sm:$0xff] %v6123_v49  ;;  %v2462_v60 = vmul.f32 %v6102_v28, %v6102_v28  ;;  %v6140_v3 = vadd.f32 %v2187_v38, %v1994_v5 }
 0x268   : > { %v2000_v46 = vpop.f32.mrf.mxu0  ;;  %v2635_v61 = vadd.f32 %v2634_v17, %v2451_v57  ;;  %v2360_v2 = vadd.f32 %v2359_v22, %v6081_v21  ;;  %v2463_v17 = vmul.f32 %v6109_v52, %v6109_v52  ;;  %v2467_v22 = vmul.f32 %v6123_v49, %v6123_v49 }
 0x269   : > { %v2193_v41 = vpop.f32.mrf.mxu1  ;;  %v2599_v50 = vadd.f32 %v2598_v43, %v2454_v39  ;;  %v2324_v7 = vadd.f32 %v2323_v27, %v6088_v0  ;;  %v2466_v39 = vmul.f32 %v6116_v9, %v6116_v9  ;;  %v6138_v43 = vadd.f32 %v2185_v44, %v6053_v62 }
 0x26a   : > { %v2002_v20 = vpop.f32.mrf.mxu0  ;;  %v2636_v57 = vadd.f32 %v2635_v61, %v2455_v31  ;;  %v2361_v4 = vadd.f32 %v2360_v2, %v6095_v37  ;;  %v6150_v62 = vadd.f32 %v2193_v41, %v2000_v46 }
 0x26b   : > { %v2195_v30 = vpop.f32.mrf.mxu1  ;;  %v2600_v14 = vadd.f32 %v2599_v50, %v2458_v56  ;;  %8045 = vst [vmem:[#allocation97_spill] sm:$0xff] %v6138_v43  ;;  %v2325_v31 = vadd.f32 %v2324_v7, %v6102_v28  ;;  %v2470_v56 = vmul.f32 %v6129_v12, %v6129_v12  ;;  %v6148_v50 = vadd.f32 %v2189_v29, %v1996_v36 }
 0x26c   : > { %v2004_v48 = vpop.f32.mrf.mxu0  ;;  %v2637_v59 = vadd.f32 %v2636_v57, %v2459_v11  ;;  %v2362_v44 = vadd.f32 %v2361_v4, %v6109_v52  ;;  %v2471_v7 = vmul.f32 %v6138_v43, %v6138_v43 }
 0x26d   : > { %v2197_v45 = vpop.f32.mrf.mxu1  ;;  %v2601_v21 = vadd.f32 %v2600_v14, %v2462_v60  ;;  %8046 = vst [vmem:[#allocation105_spill] sm:$0xff] %v6148_v50  ;;  %v2326_v38 = vadd.f32 %v2325_v31, %v6116_v9  ;;  %v2474_v60 = vmul.f32 %v6140_v3, %v6140_v3  ;;  %v6158_v14 = vadd.f32 %v2195_v30, %v2002_v20 }
 0x26e   : > { %v2006_v15 = vpop.f32.mrf.mxu0  ;;  %v2638_v5 = vadd.f32 %v2637_v59, %v2463_v17  ;;  %v2363_v36 = vadd.f32 %v2362_v44, %v6123_v49  ;;  %v6161_v46 = vadd.f32 %v2197_v45, %v2004_v48 }
 0x26f   : > { %v2199_v35 = vpop.f32.mrf.mxu1  ;;  %v2602_v57 = vadd.f32 %v2601_v21, %v2466_v39  ;;  %8047 = vst [vmem:[#allocation106_spill] sm:$0xff] %v6158_v14  ;;  %v2327_v4 = vadd.f32 %v2326_v38, %v6129_v12  ;;  %v2475_v21 = vmul.f32 %v6148_v50, %v6148_v50  ;;  %v2478_v39 = vmul.f32 %v6150_v62, %v6150_v62 }
 0x270   : > { %v2010_v61 = vpop.f32.mrf.mxu0  ;;  %v2639_v29 = vadd.f32 %v2638_v5, %v2467_v22  ;;  %v2364_v31 = vadd.f32 %v2363_v36, %v6138_v43  ;;  %v6169_v20 = vadd.f32 %v2199_v35, %v2006_v15  ;;  %v2482_v38 = vmul.f32 %v6161_v46, %v6161_v46 }
 0x271   : > { %v2203_v27 = vpop.f32.mrf.mxu1  ;;  %v2603_v59 = vadd.f32 %v2602_v57, %v2470_v56  ;;  %v2328_v44 = vadd.f32 %v2327_v4, %v6140_v3  ;;  %v2479_v56 = vmul.f32 %v6158_v14, %v6158_v14 }
 0x272   : > { %v2012_v11 = vpop.f32.mrf.mxu0  ;;  %8048 = vst [vmem:[#allocation107_spill] sm:$0xff] %v6169_v20  ;;  %v6171_v30 = vadd.f32 %v2203_v27, %v2010_v61  ;;  %v2640_v45 = vadd.f32 %v2639_v29, %v2471_v7  ;;  %v2365_v61 = vadd.f32 %v2364_v31, %v6148_v50 }
 0x273   : > { %v2205_v2 = vpop.f32.mrf.mxu1  ;;  %v2604_v5 = vadd.f32 %v2603_v59, %v2474_v60  ;;  %v2329_v7 = vadd.f32 %v2328_v44, %v6150_v62  ;;  %v2483_v60 = vmul.f32 %v6169_v20, %v6169_v20 }
 0x274   : > { %v2014_v41 = vpop.f32.mrf.mxu0  ;;  %v6178_v57 = vadd.f32 %v2205_v2, %v2012_v11  ;;  %v2641_v27 = vadd.f32 %v2640_v45, %v2475_v21  ;;  %v2486_v29 = vmul.f32 %v6171_v30, %v6171_v30 }
 0x275   : > { %v2207_v17 = vpop.f32.mrf.mxu1  ;;  %v2605_v36 = vadd.f32 %v2604_v5, %v2478_v39  ;;  %v2330_v21 = vadd.f32 %v2329_v7, %v6161_v46 }
 0x276   : > { %v2016_v22 = vpop.f32.mrf.mxu0  ;;  %8049 = vst [vmem:[#allocation108_spill] sm:$0xff] %v6178_v57  ;;  %v6180_v49 = vadd.f32 %v2207_v17, %v2014_v41  ;;  %v2366_v17 = vadd.f32 %v2365_v61, %v6158_v14  ;;  %v2642_v59 = vadd.f32 %v2641_v27, %v2479_v56  ;;  %v2487_v39 = vmul.f32 %v6178_v57, %v6178_v57 }
 0x277   : > { %v2209_v48 = vpop.f32.mrf.mxu1  ;;  %v2606_v31 = vadd.f32 %v2605_v36, %v2482_v38 }
 0x278   : > { %v2020_v15 = vpop.f32.mrf.mxu0  ;;  %v6188_v4 = vadd.f32 %v2209_v48, %v2016_v22  ;;  %v2490_v45 = vmul.f32 %v6180_v49, %v6180_v49  ;;  %v2367_v5 = vadd.f32 %v2366_v17, %v6169_v20  ;;  %v2643_v56 = vadd.f32 %v2642_v59, %v2483_v60 }
 0x279   : > { %v2213_v35 = vpop.f32.mrf.mxu1  ;;  %v2607_v61 = vadd.f32 %v2606_v31, %v2486_v29 }
 0x27a   : > { %8050 = vst [vmem:[#allocation109_spill] sm:$0xff] %v6188_v4  ;;  %v6190_v11 = vadd.f32 %v2213_v35, %v2020_v15  ;;  %v2022_v2 = vpop.f32.mrf.mxu0  ;;  %v2331_v15 = vadd.f32 %v2330_v21, %v6171_v30  ;;  %v2491_v38 = vmul.f32 %v6188_v4, %v6188_v4  ;;  %v2644_v17 = vadd.f32 %v2643_v56, %v2487_v39 }
 0x27b   : > { %v2215_v41 = vpop.f32.mrf.mxu1  ;;  %v2608_v21 = vadd.f32 %v2607_v61, %v2490_v45 }
 0x27c   : > { %v6198_v44 = vadd.f32 %v2215_v41, %v2022_v2  ;;  %v2024_v22 = vpop.f32.mrf.mxu0  ;;  %v2494_v27 = vmul.f32 %v6190_v11, %v6190_v11  ;;  %v2368_v2 = vadd.f32 %v2367_v5, %v6178_v57  ;;  %v2332_v41 = vadd.f32 %v2331_v15, %v6180_v49 }
 0x27d   : > { %v2217_v48 = vpop.f32.mrf.mxu1  ;;  %v2645_v5 = vadd.f32 %v2644_v17, %v2491_v38 }
 0x27e   : > { %8051 = vst [vmem:[#allocation110_spill] sm:$0xff] %v6198_v44  ;;  %v6202_v35 = vadd.f32 %v2217_v48, %v2024_v22  ;;  %v2026_v7 = vpop.f32.mrf.mxu0  ;;  %v2495_v60 = vmul.f32 %v6198_v44, %v6198_v44  ;;  %v2369_v22 = vadd.f32 %v2368_v2, %v6188_v4  ;;  %v2333_v48 = vadd.f32 %v2332_v41, %v6190_v11 }
 0x27f   : > { %v2219_v36 = vpop.f32.mrf.mxu1  ;;  %v2609_v15 = vadd.f32 %v2608_v21, %v2494_v27 }
 0x280   : > { %v6210_v14 = vadd.f32 %v2219_v36, %v2026_v7  ;;  %v2498_v29 = vmul.f32 %v6202_v35, %v6202_v35  ;;  %v2030_v59 = vpop.f32.mrf.mxu0  ;;  %v2370_v61 = vadd.f32 %v2369_v22, %v6198_v44  ;;  %v2334_v7 = vadd.f32 %v2333_v48, %v6202_v35 }
 0x281   : > { %v2223_v31 = vpop.f32.mrf.mxu1  ;;  %v2646_v2 = vadd.f32 %v2645_v5, %v2495_v60 }
 0x282   : > { %8052 = vst [vmem:[#allocation111_spill] sm:$0xff] %v6210_v14  ;;  %v6218_v20 = vadd.f32 %v2223_v31, %v2030_v59  ;;  %v2499_v39 = vmul.f32 %v6210_v14, %v6210_v14  ;;  %v2032_v45 = vpop.f32.mrf.mxu0  ;;  %v2610_v41 = vadd.f32 %v2609_v15, %v2498_v29  ;;  %v2371_v38 = vadd.f32 %v2370_v61, %v6210_v14 }
 0x283   : > { %v2225_v56 = vpop.f32.mrf.mxu1 }
 0x284   : > { %v2502_v36 = vmul.f32 %v6218_v20, %v6218_v20  ;;  %v6226_v57 = vadd.f32 %v2225_v56, %v2032_v45  ;;  %v2034_v59 = vpop.f32.mrf.mxu0  ;;  %v2335_v27 = vadd.f32 %v2334_v7, %v6218_v20  ;;  %v2647_v22 = vadd.f32 %v2646_v2, %v2499_v39 }
 0x285   : > { %v2227_v31 = vpop.f32.mrf.mxu1 }
 0x286   : > { %8053 = vst [vmem:[#allocation112_spill] sm:$0xff] %v6226_v57  ;;  %v2503_v17 = vmul.f32 %v6226_v57, %v6226_v57  ;;  %v6232_v21 = vadd.f32 %v2227_v31, %v2034_v59  ;;  %v2611_v48 = vadd.f32 %v2610_v41, %v2502_v36  ;;  %v2036_v44 = vpop.f32.mrf.mxu0  ;;  %v2372_v45 = vadd.f32 %v2371_v38, %v6226_v57 }
 0x287   : > { %v2229_v4 = vpop.f32.mrf.mxu1 }
 0x288   : > { %v2336_v60 = vadd.f32 %v2335_v27, %v6232_v21  ;;  %v2506_v29 = vmul.f32 %v6232_v21, %v6232_v21  ;;  %v6238_v5 = vadd.f32 %v2229_v4, %v2036_v44  ;;  %v2648_v15 = vadd.f32 %v2647_v22, %v2503_v17 }
 0x28a   : > { %v2337_v56 = vrot.slane %v2336_v60, 4  ;;  %v2612_v61 = vadd.f32 %v2611_v48, %v2506_v29  ;;  %v2373_v7 = vadd.f32 %v2372_v45, %v6238_v5  ;;  %v2507_v39 = vmul.f32 %v6238_v5, %v6238_v5 }
 0x28c   : > { %v2338_v36 = vadd.f32 %v2337_v56, %v2336_v60  ;;  %v2613_v2 = vrot.slane %v2612_v61, 4  ;;  %v2374_v41 = vrot.slane %v2373_v7, 4  ;;  %v2649_v59 = vadd.f32 %v2648_v15, %v2507_v39 }
 0x28e   : > { %v2339_v31 = vrot.slane %v2338_v36, 2  ;;  %v2614_v38 = vadd.f32 %v2613_v2, %v2612_v61  ;;  %v2375_v27 = vadd.f32 %v2374_v41, %v2373_v7  ;;  %v2650_v14 = vrot.slane %v2649_v59, 4 }
 0x28f   : > { %v4665_v41 = vmov 1966171168  }
 0x290   : > { %v2340_v57 = vadd.f32 %v2339_v31, %v2338_v36  ;;  %v2615_v50 = vrot.slane %v2614_v38, 2  ;;  %v2376_v4 = vrot.slane %v2375_v27, 2  ;;  %v2651_v44 = vadd.f32 %v2650_v14, %v2649_v59 }
 0x291   : > { %v2722_v59 = vunpack.c.l.s4 %v4665_v41  ;;  %v8065_v41 = vld [vmem:[#allocation26_spill] sm:$0xff] }
 0x292   : > { %v2341_v17 = vrot.slane %v2340_v57, 1  ;;  %v2616_v22 = vadd.f32 %v2615_v50, %v2614_v38  ;;  %v2377_v48 = vadd.f32 %v2376_v4, %v2375_v27  ;;  %v2652_v29 = vrot.slane %v2651_v44, 2  ;;  %v8054_v4 = vld [vmem:[#allocation76_spill] sm:$0xff] }
 0x294   : > { %v2342_v45 = vadd.f32 %v2341_v17, %v2340_v57  ;;  %v2617_v43 = vrot.slane %v2616_v22, 1  ;;  %v2378_v52 = vrot.slane %v2377_v48, 1  ;;  %v2653_v37 = vadd.f32 %v2652_v29, %v2651_v44 }
 0x295   : > { %v7824_v44 = vsub.s32 2, %v8054_v4 }
 0x296   : > { %v2618_v60 = vadd.f32 %v2617_v43, %v2616_v22  ;;  %v6243_v56 = vmul.f32 0.00390625, %v2342_v45  ;;  %v2379_v15 = vadd.f32 %v2378_v52, %v2377_v48  ;;  %v2654_v39 = vrot.slane %v2653_v37, 1  ;;  %v8055_v22 = vld [vmem:[#allocation16_spill] sm:$0xff]  ;;  %v8057_v45 = vld [vmem:[#allocation78_spill] sm:$0xff] }
 0x297   : > { %v2723_v52 = vunpack.c.0.s8 %v2722_v59 }
 0x298   : > { %v2662_v61 = vmul.f32 0.00390625, %v2618_v60  ;;  %v2666_v7 = vmul.f32 %v6243_v56, %v6243_v56  ;;  %v2655_v36 = vadd.f32 %v2654_v39, %v2653_v37  ;;  %v6247_v2 = vmul.f32 0.00390625, %v2379_v15  ;;  %v8056_v37 = vld [vmem:[#allocation80_spill] sm:$0xff]  ;;  %v8058_v15 = vld [vmem:[#allocation18_spill] sm:$0xff] }
 0x299   : > { %v6254_v48 = vmul.f32 %v8056_v37, %v8055_v22  ;;  %v6257_v29 = vsub.s32 %v2723_v52, %v8054_v4  ;;  %v2697_v60 = vrot.slane %v8057_v45, %v7824_v44  ;;  %v6264_v39 = vmul.f32 %v8056_v37, %v8058_v15  ;;  %v8071_v52 = vld [vmem:[#allocation32_spill] sm:$0xff]  ;;  %v8081_v44 = vld [vmem:[#allocation42_spill] sm:$0xff] }
 0x29a   : > { %v2670_v14 = vsub.f32 %v2662_v61, %v2666_v7  ;;  %v2663_v50 = vmul.f32 0.00390625, %v2655_v36  ;;  %v2667_v57 = vmul.f32 %v6247_v2, %v6247_v2  ;;  %v8059_v61 = vld [vmem:[#allocation20_spill] sm:$0xff]  ;;  %v8061_v36 = vld [vmem:[#allocation22_spill] sm:$0xff]  ;;  %v6280_v59 = vmul.f32 %v8056_v37, %v8065_v41 }
 0x29b   : > { %v6268_v7 = vmul.f32 %v8056_v37, %v8059_v61  ;;  %v6292_v22 = vmul.f32 %v8056_v37, %v8071_v52  ;;  %v8075_v61 = vld [vmem:[#allocation36_spill] sm:$0xff]  ;;  %v6312_v52 = vmul.f32 %v8056_v37, %v8081_v44 }
 0x29c   : > { %v2674_v31 = vmax.f32 %v2670_v14, 0.0  ;;  %v2671_v43 = vsub.f32 %v2663_v50, %v2667_v57  ;;  %v6272_v14 = vmul.f32 %v8056_v37, %v8061_v36  ;;  %v8063_v50 = vld [vmem:[#allocation24_spill] sm:$0xff]  ;;  %8066 = vst [vmem:[#allocation78_spill] sm:$0xff] %v6280_v59  ;;  %v6300_v36 = vmul.f32 %v8056_v37, %v8075_v61 }
 0x29d   : > { %8060 = vst [vmem:[#allocation76_spill] sm:$0xff] %v6268_v7  ;;  %v6276_v57 = vmul.f32 %v8056_v37, %v8063_v50  ;;  %8072 = vst [vmem:[#allocation22_spill] sm:$0xff] %v6292_v22  ;;  %v8077_v50 = vld [vmem:[#allocation38_spill] sm:$0xff]  ;;  %v8083_v22 = vld [vmem:[#allocation44_spill] sm:$0xff] }
 0x29e   : > { %v2678_v38 = vadd.f32 1e-05, %v2674_v31  ;;  %v2675_v27 = vmax.f32 %v2671_v43, 0.0  ;;  %8062 = vst [vmem:[#allocation16_spill] sm:$0xff] %v6272_v14  ;;  %v8067_v31 = vld [vmem:[#allocation28_spill] sm:$0xff]  ;;  %8076 = vst [vmem:[#allocation26_spill] sm:$0xff] %v6300_v36  ;;  %v6304_v41 = vmul.f32 %v8056_v37, %v8077_v50 }
 0x29f   : > { %8064 = vst [vmem:[#allocation80_spill] sm:$0xff] %v6276_v57  ;;  %v6284_v43 = vmul.f32 %v8056_v37, %v8067_v31  ;;  %v8079_v31 = vld [vmem:[#allocation40_spill] sm:$0xff]  ;;  %8082 = vst [vmem:[#allocation32_spill] sm:$0xff] %v6312_v52  ;;  %v8093_v52 = vld [vmem:[#allocation54_spill] sm:$0xff] }
 0x2a0   : > { %4470 = vrsqrt.f32 %v2678_v38  ;;  %v2679_v17 = vadd.f32 1e-05, %v2675_v27  ;;  %v8069_v38 = vld [vmem:[#allocation30_spill] sm:$0xff]  ;;  %8078 = vst [vmem:[#allocation28_spill] sm:$0xff] %v6304_v41  ;;  %v8087_v36 = vld [vmem:[#allocation48_spill] sm:$0xff]  ;;  %v8126_v14 = vld [vmem:[#allocation29_spill] sm:$0xff] }
 0x2a1   : > { %8068 = vst [vmem:[#allocation18_spill] sm:$0xff] %v6284_v43  ;;  %v6288_v27 = vmul.f32 %v8056_v37, %v8069_v38  ;;  %v6308_v38 = vmul.f32 %v8056_v37, %v8079_v31  ;;  %v6324_v50 = vmul.f32 %v8056_v37, %v8087_v36  ;;  %v8089_v41 = vld [vmem:[#allocation50_spill] sm:$0xff]  ;;  %v8162_v7 = vld [vmem:[#allocation63_spill] sm:$0xff] }
 0x2a2   : > { %4472 = vrsqrt.f32 %v2679_v17  ;;  %v8073_v17 = vld [vmem:[#allocation34_spill] sm:$0xff]  ;;  %v6328_v31 = vmul.f32 %v8056_v37, %v8089_v41 }
 0x2a3   : > { %8070 = vst [vmem:[#allocation20_spill] sm:$0xff] %v6288_v27  ;;  %v6296_v15 = vmul.f32 %v8056_v37, %v8073_v17  ;;  %8080 = vst [vmem:[#allocation30_spill] sm:$0xff] %v6308_v38  ;;  %v6316_v17 = vmul.f32 %v8056_v37, %v8083_v22  ;;  %v8091_v38 = vld [vmem:[#allocation52_spill] sm:$0xff]  ;;  %v6336_v22 = vmul.f32 %v8056_v37, %v8093_v52  ;;  %v8112_v27 = vld [vmem:[#allocation86_spill] sm:$0xff] }
 0x2a4   : > { %8088 = vst [vmem:[#allocation38_spill] sm:$0xff] %v6324_v50  ;;  %8090 = vst [vmem:[#allocation40_spill] sm:$0xff] %v6328_v31  ;;  %v6332_v44 = vmul.f32 %v8056_v37, %v8091_v38  ;;  %v8099_v50 = vld [vmem:[#allocation60_spill] sm:$0xff]  ;;  %v8101_v31 = vld [vmem:[#allocation62_spill] sm:$0xff] }
 0x2a5   : > { %8074 = vst [vmem:[#allocation24_spill] sm:$0xff] %v6296_v15  ;;  %8084 = vst [vmem:[#allocation34_spill] sm:$0xff] %v6316_v17  ;;  %v8085_v15 = vld [vmem:[#allocation46_spill] sm:$0xff]  ;;  %v8095_v17 = vld [vmem:[#allocation56_spill] sm:$0xff]  ;;  %v6348_v41 = vmul.f32 %v8056_v37, %v8099_v50  ;;  %v6352_v38 = vmul.f32 %v8056_v37, %v8101_v31 }
 0x2a6   : > { %v6320_v61 = vmul.f32 %v8056_v37, %v8085_v15  ;;  %8092 = vst [vmem:[#allocation42_spill] sm:$0xff] %v6332_v44  ;;  %8094 = vst [vmem:[#allocation44_spill] sm:$0xff] %v6336_v22  ;;  %v6340_v15 = vmul.f32 %v8056_v37, %v8095_v17  ;;  %v8103_v44 = vld [vmem:[#allocation64_spill] sm:$0xff]  ;;  %v8105_v22 = vld [vmem:[#allocation66_spill] sm:$0xff] }
 0x2a7   : > { %8100 = vst [vmem:[#allocation50_spill] sm:$0xff] %v6348_v41  ;;  %8102 = vst [vmem:[#allocation52_spill] sm:$0xff] %v6352_v38  ;;  %v6356_v52 = vmul.f32 %v8056_v37, %v8103_v44  ;;  %v6360_v17 = vmul.f32 %v8056_v37, %v8105_v22  ;;  %v8111_v41 = vld [vmem:[#allocation17_spill] sm:$0xff]  ;;  %v8113_v38 = vld [vmem:[#allocation19_spill] sm:$0xff] }
 0x2a8   : > { %8086 = vst [vmem:[#allocation36_spill] sm:$0xff] %v6320_v61  ;;  %8096 = vst [vmem:[#allocation46_spill] sm:$0xff] %v6340_v15  ;;  %v8097_v61 = vld [vmem:[#allocation58_spill] sm:$0xff]  ;;  %v8107_v15 = vld [vmem:[#allocation68_spill] sm:$0xff]  ;;  %v6372_v31 = vmul.f32 %v8112_v27, %v8111_v41  ;;  %v6376_v44 = vmul.f32 %v8112_v27, %v8113_v38 }
 0x2a9   : > { %v6344_v36 = vmul.f32 %v8056_v37, %v8097_v61  ;;  %8104 = vst [vmem:[#allocation54_spill] sm:$0xff] %v6356_v52  ;;  %8106 = vst [vmem:[#allocation56_spill] sm:$0xff] %v6360_v17  ;;  %v6364_v61 = vmul.f32 %v8056_v37, %v8107_v15  ;;  %v8115_v52 = vld [vmem:[#allocation21_spill] sm:$0xff]  ;;  %v8117_v17 = vld [vmem:[#allocation23_spill] sm:$0xff] }
 0x2aa   : > { %8114 = vst [vmem:[#allocation62_spill] sm:$0xff] %v6376_v44  ;;  %v6380_v22 = vmul.f32 %v8112_v27, %v8115_v52  ;;  %v6384_v15 = vmul.f32 %v8112_v27, %v8117_v17  ;;  %v8122_v41 = vld [vmem:[#allocation25_spill] sm:$0xff]  ;;  %v8124_v38 = vld [vmem:[#allocation27_spill] sm:$0xff]  ;;  %v6403_v17 = vmul.f32 %v8112_v27, %v8126_v14 }
 0x2ab   : > { %8098 = vst [vmem:[#allocation48_spill] sm:$0xff] %v6344_v36  ;;  %8108 = vst [vmem:[#allocation58_spill] sm:$0xff] %v6364_v61  ;;  %v8109_v36 = vld [vmem:[#allocation70_spill] sm:$0xff]  ;;  %v6394_v59 = vmul.f32 %v8112_v27, %v8122_v41  ;;  %v6398_v57 = vmul.f32 %v8112_v27, %v8124_v38  ;;  %v8132_v41 = vld [vmem:[#allocation35_spill] sm:$0xff] }
 0x2ac   : > { %v6368_v50 = vmul.f32 %v8056_v37, %v8109_v36  ;;  %8116 = vst [vmem:[#allocation64_spill] sm:$0xff] %v6380_v22  ;;  %8118 = vst [vmem:[#allocation66_spill] sm:$0xff] %v6384_v15  ;;  %v8119_v37 = vld [vmem:[#allocation79_spill] sm:$0xff]  ;;  %v8120_v36 = vld [vmem:[#allocation85_spill] sm:$0xff] }
 0x2ad   : > { %v4471_v61 = vpop.eup %4470  ;;  %8123 = vst [vmem:[#allocation68_spill] sm:$0xff] %v6394_v59  ;;  %8125 = vst [vmem:[#allocation70_spill] sm:$0xff] %v6398_v57  ;;  %v8128_v15 = vld [vmem:[#allocation31_spill] sm:$0xff]  ;;  %v6415_v59 = vmul.f32 %v8112_v27, %v8132_v41  ;;  %v8134_v38 = vld [vmem:[#allocation37_spill] sm:$0xff] }
 0x2ae   : > { %8110 = vst [vmem:[#allocation60_spill] sm:$0xff] %v6368_v50  ;;  %v8121_v50 = vcombine.low %v8119_v37, %v8120_v36  ;;  %8127 = vst [vmem:[#allocation17_spill] sm:$0xff] %v6403_v17  ;;  %v6407_v22 = vmul.f32 %v8112_v27, %v8128_v15  ;;  %v2708_v36 = vmul.f32 %v4471_v61, %v2697_v60  ;;  %v8136_v57 = vld [vmem:[#allocation39_spill] sm:$0xff]  ;;  %v8138_v17 = vld [vmem:[#allocation41_spill] sm:$0xff] }
 0x2af   : > { %8133 = vst [vmem:[#allocation21_spill] sm:$0xff] %v6415_v59  ;;  %v6419_v52 = vmul.f32 %v8112_v27, %v8134_v38  ;;  %v6423_v14 = vmul.f32 %v8112_v27, %v8136_v57  ;;  %v6427_v15 = vmul.f32 %v8112_v27, %v8138_v17  ;;  %v8142_v60 = vld [vmem:[#allocation45_spill] sm:$0xff]  ;;  %v8144_v41 = vld [vmem:[#allocation47_spill] sm:$0xff] }
 0x2b0   : > { %v6390_v43 = vrot.slane %v8121_v50, %v6257_v29  ;;  %8129 = vst [vmem:[#allocation86_spill] sm:$0xff] %v6407_v22  ;;  %v8130_v50 = vld [vmem:[#allocation33_spill] sm:$0xff]  ;;  %v8140_v22 = vld [vmem:[#allocation43_spill] sm:$0xff]  ;;  %v6435_v61 = vmul.f32 %v8112_v27, %v8142_v60  ;;  %v6439_v38 = vmul.f32 %v8112_v27, %v8144_v41  ;;  %v8153_v60 = vsub.s32 3, %v8054_v4  ;;  %v4473_v41 = vpop.eup %4472 }
 0x2b1   : > { %v6411_v37 = vmul.f32 %v8112_v27, %v8130_v50  ;;  %8135 = vst [vmem:[#allocation23_spill] sm:$0xff] %v6419_v52  ;;  %8137 = vst [vmem:[#allocation79_spill] sm:$0xff] %v6423_v14  ;;  %v6431_v50 = vmul.f32 %v8112_v27, %v8140_v22  ;;  %v8146_v52 = vld [vmem:[#allocation49_spill] sm:$0xff]  ;;  %v8148_v14 = vld [vmem:[#allocation51_spill] sm:$0xff] }
 0x2b2   : > { %8139 = vst [vmem:[#allocation85_spill] sm:$0xff] %v6427_v15  ;;  %8143 = vst [vmem:[#allocation27_spill] sm:$0xff] %v6435_v61  ;;  %v6443_v57 = vmul.f32 %v8112_v27, %v8146_v52  ;;  %v6447_v17 = vmul.f32 %v8112_v27, %v8148_v14  ;;  %v8150_v15 = vld [vmem:[#allocation53_spill] sm:$0xff]  ;;  %v2701_v61 = vrot.slane %v8057_v45, %v8153_v60  ;;  %v8158_v14 = vld [vmem:[#allocation59_spill] sm:$0xff] }
 0x2b3   : > { %8131 = vst [vmem:[#allocation19_spill] sm:$0xff] %v6411_v37  ;;  %8141 = vst [vmem:[#allocation25_spill] sm:$0xff] %v6431_v50  ;;  %v6451_v22 = vmul.f32 %v8112_v27, %v8150_v15  ;;  %v8152_v50 = vld [vmem:[#allocation77_spill] sm:$0xff]  ;;  %v6475_v45 = vmul.f32 %v8112_v27, %v8162_v7 }
 0x2b4   : > { %8145 = vst [vmem:[#allocation29_spill] sm:$0xff] %v6439_v38  ;;  %8147 = vst [vmem:[#allocation31_spill] sm:$0xff] %v6443_v57  ;;  %v2756_v59 = vrot.slane %v2708_v36, %v8152_v50  ;;  %v8154_v38 = vld [vmem:[#allocation55_spill] sm:$0xff]  ;;  %v8156_v52 = vld [vmem:[#allocation57_spill] sm:$0xff] }
 0x2b5   : > { %8149 = vst [vmem:[#allocation33_spill] sm:$0xff] %v6447_v17  ;;  %8151 = vst [vmem:[#allocation35_spill] sm:$0xff] %v6451_v22  ;;  %v6459_v37 = vmul.f32 %v8112_v27, %v8154_v38  ;;  %v6463_v57 = vmul.f32 %v8112_v27, %v8156_v52  ;;  %v6467_v17 = vmul.f32 %v8112_v27, %v8158_v14  ;;  %v8160_v15 = vld [vmem:[#allocation61_spill] sm:$0xff] }
 0x2b6   : > { %v6471_v22 = vmul.f32 %v8112_v27, %v8160_v15  ;;  %8163 = vst [vmem:[#allocation45_spill] sm:$0xff] %v6475_v45  ;;  %v8164_v60 = vld [vmem:[#allocation65_spill] sm:$0xff] }
 0x2b7   : > { %8155 = vst [vmem:[#allocation37_spill] sm:$0xff] %v6459_v37  ;;  %8157 = vst [vmem:[#allocation39_spill] sm:$0xff] %v6463_v57  ;;  %v6479_v38 = vmul.f32 %v8112_v27, %v8164_v60  ;;  %v8166_v37 = vld [vmem:[#allocation67_spill] sm:$0xff]  ;;  %v8168_v57 = vld [vmem:[#allocation69_spill] sm:$0xff] }
 0x2b8   : > { %8159 = vst [vmem:[#allocation41_spill] sm:$0xff] %v6467_v17  ;;  %8161 = vst [vmem:[#allocation43_spill] sm:$0xff] %v6471_v22  ;;  %v6483_v52 = vmul.f32 %v8112_v27, %v8166_v37  ;;  %v6487_v14 = vmul.f32 %v8112_v27, %v8168_v57  ;;  %v8170_v17 = vld [vmem:[#allocation71_spill] sm:$0xff]  ;;  %v8172_v22 = vld [vmem:[#allocation72_spill] sm:$0xff]  ;;  %v6503_v37 = vmul.f32 %v2756_v59, %v6232_v21 }
 0x2b9   : > { %8165 = vst [vmem:[#allocation47_spill] sm:$0xff] %v6479_v38  ;;  %v6491_v15 = vmul.f32 %v8112_v27, %v8170_v17  ;;  %v6495_v7 = vmul.f32 %v8112_v27, %v8172_v22  ;;  %v8173_v45 = vld [vmem:[#allocation73_spill] sm:$0xff]  ;;  %v2713_v38 = vmul.f32 %v2708_v36, %v6243_v56  ;;  %v2709_v17 = vmul.f32 %v4473_v41, %v2701_v61 }
 0x2ba   : > { %8167 = vst [vmem:[#allocation49_spill] sm:$0xff] %v6483_v52  ;;  %8169 = vst [vmem:[#allocation51_spill] sm:$0xff] %v6487_v14  ;;  %v6499_v60 = vmul.f32 %v8112_v27, %v8173_v45  ;;  %v8174_v52 = vld [vmem:[#allocation74_spill] sm:$0xff]  ;;  %v8175_v14 = vld [vmem:[#allocation91_spill] sm:$0xff]  ;;  %v6515_v22 = vmul.f32 %v2756_v59, %v5806_v25  ;;  %v6518_v27 = vmul.f32 %v2756_v59, %v5824_v6 }
 0x2bb   : > { %8171 = vst [vmem:[#allocation53_spill] sm:$0xff] %v6491_v15  ;;  %v6506_v57 = vmul.f32 %v2756_v59, %v8174_v52  ;;  %v6509_v44 = vmul.f32 %v2756_v59, %v8175_v14  ;;  %v6512_v15 = vmul.f32 %v2756_v59, %v5792_v19  ;;  %v6521_v56 = vmul.f32 %v2756_v59, %v5846_v42 }
 0x2bc   : > { %v6524_v21 = vmul.f32 %v2756_v59, %v5864_v55  ;;  %v6527_v36 = vmul.f32 %v2756_v59, %v5882_v32  ;;  %v6530_v61 = vmul.f32 %v2756_v59, %v5900_v58  ;;  %v6533_v19 = vmul.f32 %v2756_v59, %v5918_v26 }
 0x2bd   : > { %v6536_v25 = vmul.f32 %v2756_v59, %v5936_v1  ;;  %v6539_v6 = vmul.f32 %v2756_v59, %v5954_v23  ;;  %v6542_v42 = vmul.f32 %v2756_v59, %v5972_v54  ;;  %v6545_v55 = vmul.f32 %v2756_v59, %v5990_v8 }
 0x2be   : > { %v6548_v32 = vmul.f32 %v2756_v59, %v6008_v40  ;;  %v6551_v58 = vmul.f32 %v2756_v59, %v6190_v11  ;;  %v6554_v26 = vmul.f32 %v2756_v59, %v6202_v35  ;;  %v6557_v1 = vmul.f32 %v2756_v59, %v6218_v20 }
 0x2bf   : > { %v6560_v23 = vmul.f32 %v2756_v59, %v6026_v18  ;;  %v6563_v54 = vmul.f32 %v2756_v59, %v6044_v47  ;;  %v2714_v8 = vmul.f32 %v2709_v17, %v6247_v2  ;;  %v2760_v40 = vrot.slane %v2709_v17, %v8152_v50 }
 0x2c0   : > { %v6568_v41 = vmul.f32 %v2756_v59, %v6060_v16  ;;  %v6571_v11 = vmul.f32 %v2756_v59, %v6074_v51  ;;  %v6574_v35 = vmul.f32 %v2756_v59, %v6088_v0  ;;  %v6577_v20 = vmul.f32 %v2756_v59, %v6102_v28 }
 0x2c1   : > { %v6580_v18 = vmul.f32 %v2756_v59, %v6116_v9  ;;  %v6583_v47 = vmul.f32 %v2756_v59, %v6129_v12  ;;  %v6586_v2 = vmul.f32 %v2756_v59, %v6140_v3  ;;  %v2720_v16 = vcombine.low %v2713_v38, %v2714_v8  ;;  %v8176_v3 = vld [vmem:[#allocation75_spill] sm:$0xff]  ;;  %v8177_v38 = vld [vmem:[#allocation92_spill] sm:$0xff] }
 0x2c2   : > { %v6589_v45 = vmul.f32 %v2756_v59, %v6150_v62  ;;  %v6592_v51 = vmul.f32 %v2756_v59, %v6161_v46  ;;  %v6595_v0 = vmul.f32 %v2756_v59, %v6171_v30  ;;  %v6598_v28 = vmul.f32 %v2756_v59, %v6180_v49  ;;  %v8181_v59 = vld [vmem:[#allocation98_spill] sm:$0xff]  ;;  %v8182_v8 = vld [vmem:[#allocation99_spill] sm:$0xff] }
 0x2c3   : > { %v2734_v9 = vrot.slane %v2720_v16, %v6257_v29  ;;  %v2888_v12 = vmul.f32 %v2760_v40, %v6238_v5  ;;  %v6603_v52 = vmul.f32 %v2760_v40, %v8176_v3  ;;  %v6606_v62 = vmul.f32 %v2760_v40, %v8177_v38  ;;  %v8184_v3 = vld [vmem:[#allocation100_spill] sm:$0xff]  ;;  %v2710_v38 = vld [vmem:[%s4902_s27] sm:$0xf] }
 0x2c4   : > { %v6609_v14 = vmul.f32 %v2760_v40, %v5796_v63  ;;  %v6612_v46 = vmul.f32 %v2760_v40, %v5812_v53  ;;  %v6615_v30 = vmul.f32 %v2760_v40, %v5834_v33  ;;  %v6618_v49 = vmul.f32 %v2760_v40, %v5853_v10  ;;  %v8185_v53 = vld [vmem:[#allocation101_spill] sm:$0xff]  ;;  %v8186_v33 = vld [vmem:[#allocation102_spill] sm:$0xff]  ;;  %v8188_v10 = vld [vmem:[#allocation103_spill] sm:$0xff] }
 0x2c5   : > { %v2735_v5 = vcombine.low %v6390_v43, %v2734_v9  ;;  %v6622_v17 = vmul.f32 %v2760_v40, %v8181_v59  ;;  %v6625_v16 = vmul.f32 %v2760_v40, %v8182_v8  ;;  %v6628_v63 = vmul.f32 %v2760_v40, %v8184_v3  ;;  %v8190_v43 = vld [vmem:[#allocation87_spill] sm:$0xff]  ;;  %v8192_v8 = vld [vmem:[#allocation104_spill] sm:$0xff] }
 0x2c6   : > { %8178 = vst [vmem:[#allocation77_spill] sm:$0xff] %v6612_v46  ;;  %8179 = vst [vmem:[#allocation55_spill] sm:$0xff] %v6615_v30  ;;  %v6632_v46 = vmul.f32 %v2760_v40, %v8185_v53  ;;  %v6635_v30 = vmul.f32 %v2760_v40, %v8186_v33  ;;  %v6641_v9 = vmul.f32 %v2760_v40, %v8190_v43 }
 0x2c7   : > { %8180 = vst [vmem:[#allocation57_spill] sm:$0xff] %v6618_v49  ;;  %8183 = vst [vmem:[#allocation59_spill] sm:$0xff] %v6625_v16  ;;  %v6638_v49 = vmul.f32 %v2760_v40, %v8188_v10  ;;  %v2742_v59 = vrot.slane %v2735_v5, %v6257_v29  ;;  %v6645_v16 = vmul.f32 %v2760_v40, %v8192_v8  ;;  %v8201_v8 = vld [vmem:[#allocation95_spill] sm:$0xff] }
 0x2c8   : > { %8187 = vst [vmem:[#allocation61_spill] sm:$0xff] %v6635_v30  ;;  %8191 = vst [vmem:[#allocation65_spill] sm:$0xff] %v6641_v9  ;;  %v6648_v3 = vmul.f32 %v2760_v40, %v6015_v24  ;;  %v6651_v53 = vmul.f32 %v2760_v40, %v6033_v13  ;;  %v6654_v33 = vmul.f32 %v2760_v40, %v6051_v34  ;;  %v8196_v30 = vld [vmem:[#allocation89_spill] sm:$0xff]  ;;  %v8200_v9 = vld [vmem:[#allocation94_spill] sm:$0xff] }
 0x2c9   : > { %8189 = vst [vmem:[#allocation63_spill] sm:$0xff] %v6638_v49  ;;  %v6657_v10 = vmul.f32 %v2760_v40, %v8196_v30  ;;  %v8198_v49 = vld [vmem:[#allocation93_spill] sm:$0xff]  ;;  %v6663_v29 = vmul.f32 %v2760_v40, %v8200_v9  ;;  %v2744_v5 = vsub.f32 %v2710_v38, %v2742_v59  ;;  %v6666_v24 = vmul.f32 %v2760_v40, %v8201_v8  ;;  %v8212_v38 = vld [vmem:[#allocation112_spill] sm:$0xff] }
 0x2ca   : > { %8193 = vst [vmem:[#allocation67_spill] sm:$0xff] %v6648_v3  ;;  %8194 = vst [vmem:[#allocation69_spill] sm:$0xff] %v6651_v53  ;;  %v6660_v43 = vmul.f32 %v2760_v40, %v8198_v49  ;;  %v8202_v3 = vld [vmem:[#allocation96_spill] sm:$0xff]  ;;  %v8204_v53 = vld [vmem:[#allocation97_spill] sm:$0xff]  ;;  %v6684_v59 = vmul.f32 %v2760_v40, %v8212_v38 }
 0x2cb   : > { %8195 = vst [vmem:[#allocation71_spill] sm:$0xff] %v6654_v33  ;;  %8197 = vst [vmem:[#allocation72_spill] sm:$0xff] %v6657_v10  ;;  %v6669_v13 = vmul.f32 %v2760_v40, %v8202_v3  ;;  %v6672_v34 = vmul.f32 %v2760_v40, %v8204_v53  ;;  %v8206_v33 = vld [vmem:[#allocation105_spill] sm:$0xff]  ;;  %v8208_v10 = vld [vmem:[#allocation106_spill] sm:$0xff]  ;;  %v6687_v8 = vrot.slane %v2744_v5, %v8152_v50  ;;  %v8214_v3 = vsub.s32 1, %v8054_v4 }
 0x2cc   : > { %8199 = vst [vmem:[#allocation73_spill] sm:$0xff] %v6660_v43  ;;  %v6675_v30 = vmul.f32 %v2760_v40, %v8206_v33  ;;  %v6678_v49 = vmul.f32 %v2760_v40, %v8208_v10  ;;  %v8210_v43 = vld [vmem:[#allocation107_spill] sm:$0xff]  ;;  %8213 = vst [vmem:[#allocation99_spill] sm:$0xff] %v6684_v59  ;;  %v8215_v53 = vsub.s32 2, %v8054_v4  ;;  %v8216_v10 = vsub.s32 3, %v8054_v4  ;;  %v8218_v38 = vld [vmem:[#allocation109_spill] sm:$0xff] }
 0x2cd   : > { %8203 = vst [vmem:[#allocation74_spill] sm:$0xff] %v6669_v13  ;;  %8205 = vst [vmem:[#allocation91_spill] sm:$0xff] %v6672_v34  ;;  %v6681_v9 = vmul.f32 %v2760_v40, %v8210_v43  ;;  %v6691_v13 = vrot.slane %v2744_v5, %v8214_v3  ;;  %v8217_v43 = vld [vmem:[#allocation108_spill] sm:$0xff]  ;;  %v6705_v59 = vmul.f32 %v2760_v40, %v8218_v38  ;;  %v8219_v50 = vld [vmem:[#allocation110_spill] sm:$0xff] }
 0x2ce   : > { %8207 = vst [vmem:[#allocation75_spill] sm:$0xff] %v6675_v30  ;;  %8209 = vst [vmem:[#allocation92_spill] sm:$0xff] %v6678_v49  ;;  %v6695_v33 = vrot.slane %v2744_v5, %v8215_v53  ;;  %v6699_v49 = vrot.slane %v2744_v5, %v8216_v10  ;;  %v6708_v30 = vmul.f32 %v2760_v40, %v8219_v50  ;;  %v8220_v34 = vld [vmem:[#allocation111_spill] sm:$0xff] }
 0x2cf   : > { %8211 = vst [vmem:[#allocation98_spill] sm:$0xff] %v6681_v9  ;;  %v6702_v9 = vmul.f32 %v2760_v40, %v8217_v43  ;;  %v6711_v3 = vmul.f32 %v2760_v40, %v8220_v34  ;;  %v6719_v5 = vadd.f32 %v6687_v8, %v6254_v48  ;;  %v6723_v10 = vadd.f32 %v6691_v13, %v6372_v31  ;;  %v8223_v34 = vld [vmem:[#allocation62_spill] sm:$0xff]  ;;  %v8225_v31 = vld [vmem:[#allocation76_spill] sm:$0xff] }
 0x2d0   : > { %v3036_v53 = vadd.f32 %v6695_v33, %v6503_v37  ;;  %v3037_v4 = vadd.f32 %v6699_v49, %v2888_v12  ;;  %v6727_v43 = vadd.f32 %v6695_v33, %v6506_v57  ;;  %v6731_v40 = vadd.f32 %v6687_v8, %v6264_v39  ;;  %v8227_v57 = vld [vmem:[#allocation64_spill] sm:$0xff] }
 0x2d1   : > { %8221 = vst [vmem:[#allocation100_spill] sm:$0xff] %v6723_v10  ;;  %v6735_v37 = vadd.f32 %v6691_v13, %v8223_v34  ;;  %v6739_v48 = vadd.f32 %v6695_v33, %v6509_v44  ;;  %v6743_v50 = vadd.f32 %v6687_v8, %v8225_v31  ;;  %v6751_v39 = vadd.f32 %v6695_v33, %v6512_v15  ;;  %v8229_v34 = vld [vmem:[#allocation16_spill] sm:$0xff]  ;;  %v8231_v44 = vld [vmem:[#allocation66_spill] sm:$0xff] }
 0x2d2   : > { %8222 = vst [vmem:[#allocation101_spill] sm:$0xff] %v6727_v43  ;;  %v3164_v12 = vmax.f32 %v3036_v53, 0.0  ;;  %v3165_v38 = vmax.f32 %v3037_v4, 0.0  ;;  %v6747_v43 = vadd.f32 %v6691_v13, %v8227_v57  ;;  %v6759_v53 = vadd.f32 %v6691_v13, %v8231_v44 }
 0x2d3   : > { %8224 = vst [vmem:[#allocation102_spill] sm:$0xff] %v6735_v37  ;;  %8226 = vst [vmem:[#allocation103_spill] sm:$0xff] %v6743_v50  ;;  %v6755_v37 = vadd.f32 %v6687_v8, %v8229_v34  ;;  %v6763_v4 = vadd.f32 %v6695_v33, %v6515_v22  ;;  %v8234_v50 = vld [vmem:[#allocation80_spill] sm:$0xff]  ;;  %v6775_v34 = vadd.f32 %v6695_v33, %v6518_v27  ;;  %v8244_v27 = vld [vmem:[#allocation17_spill] sm:$0xff] }
 0x2d4   : > { %8228 = vst [vmem:[#allocation87_spill] sm:$0xff] %v6747_v43  ;;  %8232 = vst [vmem:[#allocation89_spill] sm:$0xff] %v6759_v53  ;;  %v4102_v31 = vpack.c.bf16 %v3165_v38, %v3164_v12  ;;  %v6767_v57 = vadd.f32 %v6687_v8, %v8234_v50  ;;  %v8235_v43 = vld [vmem:[#allocation68_spill] sm:$0xff]  ;;  %v8239_v53 = vld [vmem:[#allocation70_spill] sm:$0xff]  ;;  %v6787_v12 = vadd.f32 %v6695_v33, %v6521_v56 }
 0x2d5   : > { %8230 = vst [vmem:[#allocation104_spill] sm:$0xff] %v6755_v37  ;;  %8233 = vst [vmem:[#allocation93_spill] sm:$0xff] %v6763_v4  ;;  %v6771_v15 = vadd.f32 %v6691_v13, %v8235_v43  ;;  %v8238_v37 = vld [vmem:[#allocation78_spill] sm:$0xff]  ;;  %v6783_v22 = vadd.f32 %v6691_v13, %v8239_v53  ;;  %v6802_v50 = vadd.f32 %v6695_v33, %v6524_v21  ;;  %v8247_v53 = vld [vmem:[#allocation20_spill] sm:$0xff] }
 0x2d6   : > { %8237 = vst [vmem:[#allocation95_spill] sm:$0xff] %v6775_v34  ;;  %v6779_v44 = vadd.f32 %v6687_v8, %v8238_v37  ;;  %8241 = vst [vmem:[#allocation97_spill] sm:$0xff] %v6787_v12  ;;  %v8242_v38 = vld [vmem:[#allocation18_spill] sm:$0xff]  ;;  %v6798_v37 = vadd.f32 %v6691_v13, %v8244_v27  ;;  %v6806_v56 = vadd.f32 %v6687_v8, %v8247_v53 }
 0x2d7   : > { %8236 = vst [vmem:[#allocation94_spill] sm:$0xff] %v6771_v15  ;;  %8240 = vst [vmem:[#allocation96_spill] sm:$0xff] %v6783_v22  ;;  %v6791_v43 = vadd.f32 %v6687_v8, %v8242_v38  ;;  %v8249_v12 = vld [vmem:[#allocation86_spill] sm:$0xff]  ;;  %v6826_v53 = vadd.f32 %v6695_v33, %v6530_v61 }
 0x2d8   : > { %3613 = vst [vmem:[%s6793_s7 + $0x1f8] sm:$0xff] %v4102_v31  ;;  %8245 = vst [vmem:[#allocation106_spill] sm:$0xff] %v6798_v37  ;;  %v6810_v38 = vadd.f32 %v6691_v13, %v8249_v12  ;;  %v8252_v31 = vld [vmem:[#allocation22_spill] sm:$0xff]  ;;  %v8254_v37 = vld [vmem:[#allocation19_spill] sm:$0xff] }
 0x2d9   : > { %8243 = vst [vmem:[#allocation105_spill] sm:$0xff] %v6791_v43  ;;  %8246 = vst [vmem:[#allocation107_spill] sm:$0xff] %v6802_v50  ;;  %v6814_v43 = vadd.f32 %v6695_v33, %v6527_v36  ;;  %v6818_v27 = vadd.f32 %v6687_v8, %v8252_v31  ;;  %v6822_v21 = vadd.f32 %v6691_v13, %v8254_v37 }
 0x2da   : > { %8248 = vst [vmem:[#allocation112_spill] sm:$0xff] %v6806_v56  ;;  %8250 = vst [vmem:[#allocation108_spill] sm:$0xff] %v6810_v38  ;;  %v8257_v56 = vld [vmem:[#allocation24_spill] sm:$0xff]  ;;  %v8259_v38 = vld [vmem:[#allocation21_spill] sm:$0xff]  ;;  %v6838_v31 = vadd.f32 %v6695_v33, %v6533_v19 }
 0x2db   : > { %8251 = vst [vmem:[#allocation109_spill] sm:$0xff] %v6814_v43  ;;  %8253 = vst [vmem:[#allocation110_spill] sm:$0xff] %v6818_v27  ;;  %v6830_v12 = vadd.f32 %v6687_v8, %v8257_v56  ;;  %v6834_v36 = vadd.f32 %v6691_v13, %v8259_v38  ;;  %v8262_v27 = vld [vmem:[#allocation26_spill] sm:$0xff]  ;;  %v6850_v56 = vadd.f32 %v6695_v33, %v6536_v25 }
 0x2dc   : > { %8255 = vst [vmem:[#allocation111_spill] sm:$0xff] %v6822_v21  ;;  %8256 = vst [vmem:[#allocation62_spill] sm:$0xff] %v6826_v53  ;;  %v6842_v37 = vadd.f32 %v6687_v8, %v8262_v27  ;;  %v8264_v21 = vld [vmem:[#allocation23_spill] sm:$0xff]  ;;  %v6862_v27 = vadd.f32 %v6695_v33, %v6539_v6  ;;  %v8404_v10 = vld [vmem:[#allocation104_spill] sm:$0xff] }
 0x2dd   : > { %8258 = vst [vmem:[#allocation76_spill] sm:$0xff] %v6830_v12  ;;  %8260 = vst [vmem:[#allocation64_spill] sm:$0xff] %v6834_v36  ;;  %v6846_v61 = vadd.f32 %v6691_v13, %v8264_v21  ;;  %v8267_v12 = vld [vmem:[#allocation28_spill] sm:$0xff]  ;;  %v8269_v36 = vld [vmem:[#allocation79_spill] sm:$0xff] }
 0x2de   : > { %8261 = vst [vmem:[#allocation16_spill] sm:$0xff] %v6838_v31  ;;  %8263 = vst [vmem:[#allocation66_spill] sm:$0xff] %v6842_v37  ;;  %v6854_v38 = vadd.f32 %v6687_v8, %v8267_v12  ;;  %v6858_v19 = vadd.f32 %v6691_v13, %v8269_v36  ;;  %v8272_v37 = vld [vmem:[#allocation30_spill] sm:$0xff]  ;;  %v6874_v12 = vadd.f32 %v6695_v33, %v6542_v42 }
 0x2df   : > { %8265 = vst [vmem:[#allocation80_spill] sm:$0xff] %v6846_v61  ;;  %8266 = vst [vmem:[#allocation68_spill] sm:$0xff] %v6850_v56  ;;  %v6866_v21 = vadd.f32 %v6687_v8, %v8272_v37  ;;  %v8274_v61 = vld [vmem:[#allocation85_spill] sm:$0xff]  ;;  %v6886_v37 = vadd.f32 %v6695_v33, %v6545_v55 }
 0x2e0   : > { %8268 = vst [vmem:[#allocation78_spill] sm:$0xff] %v6854_v38  ;;  %8270 = vst [vmem:[#allocation70_spill] sm:$0xff] %v6858_v19  ;;  %v6870_v25 = vadd.f32 %v6691_v13, %v8274_v61  ;;  %v8277_v38 = vld [vmem:[#allocation32_spill] sm:$0xff]  ;;  %v8279_v19 = vld [vmem:[#allocation25_spill] sm:$0xff] }
 0x2e1   : > { %8271 = vst [vmem:[#allocation18_spill] sm:$0xff] %v6862_v27  ;;  %8273 = vst [vmem:[#allocation17_spill] sm:$0xff] %v6866_v21  ;;  %v6878_v36 = vadd.f32 %v6687_v8, %v8277_v38  ;;  %v6882_v6 = vadd.f32 %v6691_v13, %v8279_v19  ;;  %v8282_v21 = vld [vmem:[#allocation34_spill] sm:$0xff]  ;;  %v6898_v38 = vadd.f32 %v6695_v33, %v6548_v32  ;;  %v8409_v15 = vld [vmem:[#allocation112_spill] sm:$0xff] }
 0x2e2   : > { %8275 = vst [vmem:[#allocation20_spill] sm:$0xff] %v6870_v25  ;;  %8276 = vst [vmem:[#allocation86_spill] sm:$0xff] %v6874_v12  ;;  %v6890_v61 = vadd.f32 %v6687_v8, %v8282_v21  ;;  %v8284_v25 = vld [vmem:[#allocation27_spill] sm:$0xff]  ;;  %v6910_v21 = vadd.f32 %v6695_v33, %v6560_v23  ;;  %v8411_v22 = vld [vmem:[#allocation110_spill] sm:$0xff] }
 0x2e3   : > { %8278 = vst [vmem:[#allocation22_spill] sm:$0xff] %v6878_v36  ;;  %8280 = vst [vmem:[#allocation19_spill] sm:$0xff] %v6882_v6  ;;  %v6894_v42 = vadd.f32 %v6691_v13, %v8284_v25  ;;  %v8287_v36 = vld [vmem:[#allocation36_spill] sm:$0xff]  ;;  %v8289_v6 = vld [vmem:[#allocation29_spill] sm:$0xff] }
 0x2e4   : > { %8281 = vst [vmem:[#allocation24_spill] sm:$0xff] %v6886_v37  ;;  %8283 = vst [vmem:[#allocation21_spill] sm:$0xff] %v6890_v61  ;;  %v6902_v19 = vadd.f32 %v6687_v8, %v8287_v36  ;;  %v6906_v55 = vadd.f32 %v6691_v13, %v8289_v6  ;;  %v8292_v61 = vld [vmem:[#allocation38_spill] sm:$0xff]  ;;  %v6922_v36 = vadd.f32 %v6695_v33, %v6563_v54  ;;  %v8413_v4 = vld [vmem:[#allocation76_spill] sm:$0xff] }
 0x2e5   : > { %8285 = vst [vmem:[#allocation26_spill] sm:$0xff] %v6894_v42  ;;  %8286 = vst [vmem:[#allocation23_spill] sm:$0xff] %v6898_v38  ;;  %v6914_v25 = vadd.f32 %v6687_v8, %v8292_v61  ;;  %v8294_v42 = vld [vmem:[#allocation31_spill] sm:$0xff]  ;;  %v6934_v61 = vadd.f32 %v6695_v33, %v6568_v41  ;;  %v8415_v34 = vld [vmem:[#allocation66_spill] sm:$0xff] }
 0x2e6   : > { %8288 = vst [vmem:[#allocation28_spill] sm:$0xff] %v6902_v19  ;;  %8290 = vst [vmem:[#allocation79_spill] sm:$0xff] %v6906_v55  ;;  %v6918_v32 = vadd.f32 %v6691_v13, %v8294_v42  ;;  %v8297_v19 = vld [vmem:[#allocation40_spill] sm:$0xff]  ;;  %v8299_v55 = vld [vmem:[#allocation33_spill] sm:$0xff] }
 0x2e7   : > { %8291 = vst [vmem:[#allocation30_spill] sm:$0xff] %v6910_v21  ;;  %8293 = vst [vmem:[#allocation85_spill] sm:$0xff] %v6914_v25  ;;  %v6926_v6 = vadd.f32 %v6687_v8, %v8297_v19  ;;  %v6930_v23 = vadd.f32 %v6691_v13, %v8299_v55  ;;  %v8302_v25 = vld [vmem:[#allocation42_spill] sm:$0xff]  ;;  %v6946_v19 = vadd.f32 %v6695_v33, %v6571_v11 }
 0x2e8   : > { %8295 = vst [vmem:[#allocation32_spill] sm:$0xff] %v6918_v32  ;;  %8296 = vst [vmem:[#allocation25_spill] sm:$0xff] %v6922_v36  ;;  %v6938_v42 = vadd.f32 %v6687_v8, %v8302_v25  ;;  %v8304_v32 = vld [vmem:[#allocation35_spill] sm:$0xff]  ;;  %v6958_v25 = vadd.f32 %v6695_v33, %v6574_v35  ;;  %v8419_v50 = vld [vmem:[#allocation17_spill] sm:$0xff] }
 0x2e9   : > { %8298 = vst [vmem:[#allocation34_spill] sm:$0xff] %v6926_v6  ;;  %8300 = vst [vmem:[#allocation27_spill] sm:$0xff] %v6930_v23  ;;  %v6942_v54 = vadd.f32 %v6691_v13, %v8304_v32  ;;  %v8307_v6 = vld [vmem:[#allocation44_spill] sm:$0xff]  ;;  %v8309_v23 = vld [vmem:[#allocation37_spill] sm:$0xff] }
 0x2ea   : > { %8301 = vst [vmem:[#allocation36_spill] sm:$0xff] %v6934_v61  ;;  %8303 = vst [vmem:[#allocation29_spill] sm:$0xff] %v6938_v42  ;;  %v6950_v55 = vadd.f32 %v6687_v8, %v8307_v6  ;;  %v6954_v41 = vadd.f32 %v6691_v13, %v8309_v23  ;;  %v8312_v42 = vld [vmem:[#allocation46_spill] sm:$0xff]  ;;  %v6970_v6 = vadd.f32 %v6695_v33, %v6577_v20 }
 0x2eb   : > { %8305 = vst [vmem:[#allocation38_spill] sm:$0xff] %v6942_v54  ;;  %8306 = vst [vmem:[#allocation31_spill] sm:$0xff] %v6946_v19  ;;  %v6962_v32 = vadd.f32 %v6687_v8, %v8312_v42  ;;  %v8314_v54 = vld [vmem:[#allocation39_spill] sm:$0xff]  ;;  %v6982_v42 = vadd.f32 %v6695_v33, %v6580_v18  ;;  %v8421_v43 = vld [vmem:[#allocation22_spill] sm:$0xff] }
 0x2ec   : > { %8308 = vst [vmem:[#allocation40_spill] sm:$0xff] %v6950_v55  ;;  %8310 = vst [vmem:[#allocation33_spill] sm:$0xff] %v6954_v41  ;;  %v6966_v11 = vadd.f32 %v6691_v13, %v8314_v54  ;;  %v8317_v55 = vld [vmem:[#allocation48_spill] sm:$0xff]  ;;  %v8319_v41 = vld [vmem:[#allocation41_spill] sm:$0xff] }
 0x2ed   : > { %8311 = vst [vmem:[#allocation42_spill] sm:$0xff] %v6958_v25  ;;  %8313 = vst [vmem:[#allocation35_spill] sm:$0xff] %v6962_v32  ;;  %v6974_v23 = vadd.f32 %v6687_v8, %v8317_v55  ;;  %v6978_v35 = vadd.f32 %v6691_v13, %v8319_v41  ;;  %v8322_v32 = vld [vmem:[#allocation50_spill] sm:$0xff]  ;;  %v6994_v55 = vadd.f32 %v6695_v33, %v6583_v47  ;;  %v8423_v53 = vld [vmem:[#allocation21_spill] sm:$0xff] }
 0x2ee   : > { %8315 = vst [vmem:[#allocation44_spill] sm:$0xff] %v6966_v11  ;;  %8316 = vst [vmem:[#allocation37_spill] sm:$0xff] %v6970_v6  ;;  %v6986_v54 = vadd.f32 %v6687_v8, %v8322_v32  ;;  %v8324_v11 = vld [vmem:[#allocation43_spill] sm:$0xff]  ;;  %v7006_v32 = vadd.f32 %v6695_v33, %v6586_v2  ;;  %v8425_v31 = vld [vmem:[#allocation28_spill] sm:$0xff] }
 0x2ef   : > { %8318 = vst [vmem:[#allocation46_spill] sm:$0xff] %v6974_v23  ;;  %8320 = vst [vmem:[#allocation39_spill] sm:$0xff] %v6978_v35  ;;  %v6990_v20 = vadd.f32 %v6691_v13, %v8324_v11  ;;  %v8327_v23 = vld [vmem:[#allocation52_spill] sm:$0xff]  ;;  %v8329_v35 = vld [vmem:[#allocation45_spill] sm:$0xff] }
 0x2f0   : > { %8321 = vst [vmem:[#allocation48_spill] sm:$0xff] %v6982_v42  ;;  %8323 = vst [vmem:[#allocation41_spill] sm:$0xff] %v6986_v54  ;;  %v6998_v41 = vadd.f32 %v6687_v8, %v8327_v23  ;;  %v7002_v18 = vadd.f32 %v6691_v13, %v8329_v35  ;;  %v8332_v54 = vld [vmem:[#allocation54_spill] sm:$0xff]  ;;  %v7018_v23 = vadd.f32 %v6695_v33, %v6589_v45  ;;  %v8427_v56 = vld [vmem:[#allocation85_spill] sm:$0xff] }
 0x2f1   : > { %8325 = vst [vmem:[#allocation50_spill] sm:$0xff] %v6990_v20  ;;  %8326 = vst [vmem:[#allocation43_spill] sm:$0xff] %v6994_v55  ;;  %v7010_v11 = vadd.f32 %v6687_v8, %v8332_v54  ;;  %v8334_v20 = vld [vmem:[#allocation47_spill] sm:$0xff]  ;;  %v7030_v54 = vadd.f32 %v6695_v33, %v6592_v51  ;;  %v8429_v27 = vld [vmem:[#allocation34_spill] sm:$0xff] }
 0x2f2   : > { %8328 = vst [vmem:[#allocation52_spill] sm:$0xff] %v6998_v41  ;;  %8330 = vst [vmem:[#allocation45_spill] sm:$0xff] %v7002_v18  ;;  %v7014_v47 = vadd.f32 %v6691_v13, %v8334_v20  ;;  %v8337_v41 = vld [vmem:[#allocation56_spill] sm:$0xff]  ;;  %v8339_v18 = vld [vmem:[#allocation49_spill] sm:$0xff] }
 0x2f3   : > { %8331 = vst [vmem:[#allocation113_spill] sm:$0xff] %v7006_v32  ;;  %8333 = vst [vmem:[#allocation54_spill] sm:$0xff] %v7010_v11  ;;  %v7022_v35 = vadd.f32 %v6687_v8, %v8337_v41  ;;  %v7026_v2 = vadd.f32 %v6691_v13, %v8339_v18  ;;  %v8342_v11 = vld [vmem:[#allocation58_spill] sm:$0xff]  ;;  %v7042_v41 = vadd.f32 %v6695_v33, %v6595_v0  ;;  %v8431_v12 = vld [vmem:[#allocation29_spill] sm:$0xff] }
 0x2f4   : > { %8335 = vst [vmem:[#allocation47_spill] sm:$0xff] %v7014_v47  ;;  %8336 = vst [vmem:[#allocation114_spill] sm:$0xff] %v7018_v23  ;;  %v7034_v20 = vadd.f32 %v6687_v8, %v8342_v11  ;;  %v8344_v47 = vld [vmem:[#allocation51_spill] sm:$0xff]  ;;  %v7054_v11 = vadd.f32 %v6695_v33, %v6598_v28  ;;  %v7062_v0 = vadd.f32 %v6691_v13, %v6495_v7  ;;  %v8390_v23 = vld [vmem:[#allocation92_spill] sm:$0xff] }
 0x2f5   : > { %8338 = vst [vmem:[#allocation56_spill] sm:$0xff] %v7022_v35  ;;  %8340 = vst [vmem:[#allocation49_spill] sm:$0xff] %v7026_v2  ;;  %v7038_v45 = vadd.f32 %v6691_v13, %v8344_v47  ;;  %v8347_v35 = vld [vmem:[#allocation60_spill] sm:$0xff]  ;;  %v8349_v2 = vld [vmem:[#allocation53_spill] sm:$0xff]  ;;  %v7074_v28 = vadd.f32 %v6691_v13, %v6499_v60 }
 0x2f6   : > { %8341 = vst [vmem:[#allocation115_spill] sm:$0xff] %v7030_v54  ;;  %8343 = vst [vmem:[#allocation58_spill] sm:$0xff] %v7034_v20  ;;  %v7046_v18 = vadd.f32 %v6687_v8, %v8347_v35  ;;  %v7050_v51 = vadd.f32 %v6691_v13, %v8349_v2  ;;  %v8352_v20 = vld [vmem:[#allocation82_spill] sm:$0xff]  ;;  %v7066_v35 = vadd.f32 %v6695_v33, %v6551_v58  ;;  %v8388_v54 = vld [vmem:[#allocation75_spill] sm:$0xff] }
 0x2f7   : > { %8345 = vst [vmem:[#allocation51_spill] sm:$0xff] %v7038_v45  ;;  %8346 = vst [vmem:[#allocation116_spill] sm:$0xff] %v7042_v41  ;;  %v7058_v47 = vadd.f32 %v6687_v8, %v8352_v20  ;;  %v7078_v20 = vadd.f32 %v6695_v33, %v6554_v26  ;;  %v8384_v41 = vld [vmem:[#allocation74_spill] sm:$0xff]  ;;  %v8386_v45 = vld [vmem:[#allocation91_spill] sm:$0xff] }
 0x2f8   : > { %8348 = vst [vmem:[#allocation60_spill] sm:$0xff] %v7046_v18  ;;  %8350 = vst [vmem:[#allocation53_spill] sm:$0xff] %v7050_v51  ;;  %v8356_v18 = vld [vmem:[#allocation83_spill] sm:$0xff]  ;;  %v8381_v51 = vld [vmem:[#allocation73_spill] sm:$0xff] }
 0x2f9   : > { %8351 = vst [vmem:[#allocation117_spill] sm:$0xff] %v7054_v11  ;;  %8353 = vst [vmem:[#allocation82_spill] sm:$0xff] %v7058_v47  ;;  %v7070_v2 = vadd.f32 %v6687_v8, %v8356_v18  ;;  %v8360_v47 = vld [vmem:[#allocation84_spill] sm:$0xff]  ;;  %v7090_v18 = vadd.f32 %v6695_v33, %v6557_v1  ;;  %v7110_v1 = vadd.f32 %v6699_v49, %v6609_v14  ;;  %v8370_v33 = vld [vmem:[#allocation77_spill] sm:$0xff] }
 0x2fa   : > { %8354 = vst [vmem:[#allocation118_spill] sm:$0xff] %v7062_v0  ;;  %8355 = vst [vmem:[#allocation119_spill] sm:$0xff] %v7066_v35  ;;  %v7082_v7 = vadd.f32 %v6687_v8, %v8360_v47  ;;  %v8362_v0 = vld [vmem:[#allocation90_spill] sm:$0xff]  ;;  %v7102_v47 = vadd.f32 %v6699_v49, %v6603_v52  ;;  %v8379_v35 = vld [vmem:[#allocation71_spill] sm:$0xff] }
 0x2fb   : > { %8357 = vst [vmem:[#allocation83_spill] sm:$0xff] %v7070_v2  ;;  %8358 = vst [vmem:[#allocation120_spill] sm:$0xff] %v7074_v28  ;;  %v7086_v58 = vadd.f32 %v6691_v13, %v8362_v0  ;;  %v8365_v2 = vld [vmem:[#allocation81_spill] sm:$0xff]  ;;  %v8367_v28 = vld [vmem:[#allocation88_spill] sm:$0xff]  ;;  %v7106_v0 = vadd.f32 %v6699_v49, %v6606_v62  ;;  %v7126_v62 = vadd.f32 %v6699_v49, %v6622_v17 }
 0x2fc   : > { %8359 = vst [vmem:[#allocation121_spill] sm:$0xff] %v7078_v20  ;;  %8361 = vst [vmem:[#allocation84_spill] sm:$0xff] %v7082_v7  ;;  %v7094_v60 = vadd.f32 %v6687_v8, %v8365_v2  ;;  %v7098_v26 = vadd.f32 %v6691_v13, %v8367_v28  ;;  %v7114_v8 = vadd.f32 %v6699_v49, %v8370_v33  ;;  %v8371_v2 = vld [vmem:[#allocation55_spill] sm:$0xff]  ;;  %v8372_v28 = vld [vmem:[#allocation57_spill] sm:$0xff] }
 0x2fd   : > { %8363 = vst [vmem:[#allocation90_spill] sm:$0xff] %v7086_v58  ;;  %8364 = vst [vmem:[#allocation122_spill] sm:$0xff] %v7090_v18  ;;  %v7118_v13 = vadd.f32 %v6699_v49, %v8371_v2  ;;  %v7122_v52 = vadd.f32 %v6699_v49, %v8372_v28  ;;  %v7134_v33 = vadd.f32 %v6699_v49, %v6628_v63  ;;  %v8375_v18 = vld [vmem:[#allocation63_spill] sm:$0xff]  ;;  %v8376_v58 = vld [vmem:[#allocation65_spill] sm:$0xff] }
 0x2fe   : > { %8366 = vst [vmem:[#allocation81_spill] sm:$0xff] %v7094_v60  ;;  %8368 = vst [vmem:[#allocation88_spill] sm:$0xff] %v7098_v26  ;;  %v8373_v26 = vld [vmem:[#allocation59_spill] sm:$0xff]  ;;  %v7138_v2 = vadd.f32 %v6699_v49, %v6632_v46  ;;  %v8374_v60 = vld [vmem:[#allocation61_spill] sm:$0xff]  ;;  %v7146_v17 = vadd.f32 %v6699_v49, %v8375_v18  ;;  %v7154_v63 = vadd.f32 %v6699_v49, %v6645_v16 }
 0x2ff   : > { %8369 = vst [vmem:[#allocation123_spill] sm:$0xff] %v7110_v1  ;;  %v7130_v14 = vadd.f32 %v6699_v49, %v8373_v26  ;;  %v7142_v28 = vadd.f32 %v6699_v49, %v8374_v60  ;;  %v7150_v26 = vadd.f32 %v6699_v49, %v8376_v58  ;;  %v8377_v7 = vld [vmem:[#allocation67_spill] sm:$0xff]  ;;  %v8378_v20 = vld [vmem:[#allocation69_spill] sm:$0xff]  ;;  %v7166_v18 = vadd.f32 %v6699_v49, %v8379_v35  ;;  %v8380_v11 = vld [vmem:[#allocation72_spill] sm:$0xff] }
 0x300   : > { %v7158_v46 = vadd.f32 %v6699_v49, %v8377_v7  ;;  %v7162_v60 = vadd.f32 %v6699_v49, %v8378_v20  ;;  %v7170_v58 = vadd.f32 %v6699_v49, %v8380_v11  ;;  %v7174_v16 = vadd.f32 %v6699_v49, %v8381_v51  ;;  %v8392_v32 = vld [vmem:[#allocation98_spill] sm:$0xff]  ;;  %v8433_v37 = vld [vmem:[#allocation40_spill] sm:$0xff]  ;;  %v8479_v42 = vld [vmem:[#allocation101_spill] sm:$0xff] }
 0x301   : > { %v7178_v7 = vadd.f32 %v6699_v49, %v6663_v29  ;;  %v7182_v20 = vadd.f32 %v6699_v49, %v6666_v24  ;;  %v7186_v35 = vadd.f32 %v6699_v49, %v8384_v41  ;;  %v7190_v11 = vadd.f32 %v6699_v49, %v8386_v45  ;;  %v8417_v1 = vld [vmem:[#allocation78_spill] sm:$0xff]  ;;  %v8465_v61 = vld [vmem:[#allocation119_spill] sm:$0xff]  ;;  %v8477_v55 = vld [vmem:[#allocation100_spill] sm:$0xff] }
 0x302   : > { %v7194_v51 = vadd.f32 %v6699_v49, %v8388_v54  ;;  %v7198_v29 = vadd.f32 %v6699_v49, %v8390_v23  ;;  %v7202_v24 = vadd.f32 %v6699_v49, %v8392_v32  ;;  %v7206_v41 = vadd.f32 %v6699_v49, %v6702_v9  ;;  %v8464_v38 = vld [vmem:[#allocation118_spill] sm:$0xff]  ;;  %v8468_v21 = vld [vmem:[#allocation120_spill] sm:$0xff] }
 0x303   : > { %8382 = vst [vmem:[#allocation77_spill] sm:$0xff] %v7178_v7  ;;  %8383 = vst [vmem:[#allocation55_spill] sm:$0xff] %v7182_v20  ;;  %v7210_v45 = vadd.f32 %v6699_v49, %v6705_v59  ;;  %v7214_v54 = vadd.f32 %v6699_v49, %v6708_v30  ;;  %v7218_v23 = vadd.f32 %v6699_v49, %v6711_v3  ;;  %v8401_v30 = vld [vmem:[#allocation102_spill] sm:$0xff]  ;;  %v8476_v3 = vmax.f32 %v6719_v5, 0.0 }
 0x304   : > { %8385 = vst [vmem:[#allocation57_spill] sm:$0xff] %v7186_v35  ;;  %8387 = vst [vmem:[#allocation59_spill] sm:$0xff] %v7190_v11  ;;  %v8463_v7 = vld [vmem:[#allocation82_spill] sm:$0xff]  ;;  %v8471_v35 = vld [vmem:[#allocation84_spill] sm:$0xff]  ;;  %v8478_v19 = vmax.f32 %v8477_v55, 0.0  ;;  %v8481_v9 = vmax.f32 %v7102_v47, 0.0 }
 0x305   : > { %8389 = vst [vmem:[#allocation61_spill] sm:$0xff] %v7194_v51  ;;  %8391 = vst [vmem:[#allocation63_spill] sm:$0xff] %v7198_v29  ;;  %v8398_v29 = vld [vmem:[#allocation99_spill] sm:$0xff]  ;;  %v8466_v6 = vmov %v7214_v54  ;;  %v8474_v59 = vld [vmem:[#allocation81_spill] sm:$0xff]  ;;  %v8482_v51 = vmax.f32 %v6731_v40, 0.0  ;;  %v8483_v25 = vmax.f32 %v8401_v30, 0.0 }
 0x306   : > { %8393 = vst [vmem:[#allocation65_spill] sm:$0xff] %v7202_v24  ;;  %8394 = vst [vmem:[#allocation67_spill] sm:$0xff] %v7206_v41  ;;  %v7222_v32 = vadd.f32 %v6699_v49, %v8398_v29  ;;  %v8403_v49 = vld [vmem:[#allocation87_spill] sm:$0xff]  ;;  %v8407_v41 = vld [vmem:[#allocation105_spill] sm:$0xff]  ;;  %v4039_v29 = vpack.c.bf16 %v8478_v19, %v8476_v3  ;;  %v8480_v24 = vmax.f32 %v8479_v42, 0.0  ;;  %v8488_v55 = vmax.f32 %v6751_v39, 0.0 }
 0x307   : > { %8395 = vst [vmem:[#allocation69_spill] sm:$0xff] %v7210_v45  ;;  %8396 = vst [vmem:[#allocation71_spill] sm:$0xff] %v7214_v54  ;;  %v8475_v11 = vld [vmem:[#allocation88_spill] sm:$0xff]  ;;  %v4041_v45 = vpack.c.bf16 %v8483_v25, %v8482_v51  ;;  %v8485_v54 = vmax.f32 %v7106_v0, 0.0  ;;  %v8487_v19 = vmax.f32 %v8403_v49, 0.0  ;;  %v8489_v47 = vld [vmem:[#allocation123_spill] sm:$0xff] }
 0x308   : > { %8397 = vst [vmem:[#allocation72_spill] sm:$0xff] %v7218_v23  ;;  %8399 = vst [vmem:[#allocation73_spill] sm:$0xff] %v7222_v32  ;;  %v8402_v23 = vld [vmem:[#allocation103_spill] sm:$0xff]  ;;  %v4040_v36 = vpack.c.bf16 %v8481_v9, %v8480_v24  ;;  %v8484_v32 = vmax.f32 %v6739_v48, 0.0  ;;  %v8490_v24 = vmax.f32 %v8489_v47, 0.0  ;;  %v8491_v25 = vmax.f32 %v8404_v10, 0.0 }
 0x309   : > { %v8486_v5 = vmax.f32 %v8402_v23, 0.0  ;;  %v8492_v51 = vld [vmem:[#allocation89_spill] sm:$0xff]  ;;  %v8496_v23 = vmax.f32 %v7114_v8, 0.0  ;;  %v8497_v30 = vmax.f32 %v6767_v57, 0.0  ;;  %v8498_v3 = vld [vmem:[#allocation94_spill] sm:$0xff]  ;;  %v8503_v10 = vmax.f32 %v6779_v44, 0.0  ;;  %3550 = vst [vmem:[%s6793_s7] sm:$0xff] %v4039_v29 }
 0x30a   : > { %v4042_v20 = vpack.c.bf16 %v8485_v54, %v8484_v32  ;;  %v4044_v40 = vpack.c.bf16 %v8490_v24, %v8488_v55  ;;  %v8493_v48 = vmax.f32 %v8492_v51, 0.0  ;;  %v8494_v9 = vld [vmem:[#allocation93_spill] sm:$0xff]  ;;  %v8499_v49 = vmax.f32 %v8498_v3, 0.0  ;;  %v8504_v24 = vld [vmem:[#allocation96_spill] sm:$0xff]  ;;  %3551 = vst [vmem:[%s6793_s7 + $0x8] sm:$0xff] %v4040_v36  ;;  %3552 = vst [vmem:[%s6793_s7 + $0x10] sm:$0xff] %v4041_v45 }
 0x30b   : > { %v4043_v42 = vpack.c.bf16 %v8487_v19, %v8486_v5  ;;  %v8495_v54 = vmax.f32 %v8494_v9, 0.0  ;;  %v8500_v5 = vld [vmem:[#allocation95_spill] sm:$0xff]  ;;  %v8502_v55 = vmax.f32 %v7118_v13, 0.0  ;;  %v8505_v51 = vmax.f32 %v8504_v24, 0.0  ;;  %v8506_v57 = vld [vmem:[#allocation97_spill] sm:$0xff] }
 0x30c   : > { %v4045_v0 = vpack.c.bf16 %v8493_v48, %v8491_v25  ;;  %v4047_v39 = vpack.c.bf16 %v8499_v49, %v8497_v30  ;;  %v8501_v19 = vmax.f32 %v8500_v5, 0.0  ;;  %v8507_v8 = vmax.f32 %v8506_v57, 0.0  ;;  %v8512_v30 = vld [vmem:[#allocation107_spill] sm:$0xff]  ;;  %v8516_v5 = vld [vmem:[#allocation108_spill] sm:$0xff]  ;;  %3553 = vst [vmem:[%s6793_s7 + $0x18] sm:$0xff] %v4042_v20  ;;  %3555 = vst [vmem:[%s6793_s7 + $0x28] sm:$0xff] %v4044_v40 }
 0x30d   : > { %v4046_v32 = vpack.c.bf16 %v8496_v23, %v8495_v54  ;;  %v4049_v25 = vpack.c.bf16 %v8505_v51, %v8503_v10  ;;  %v8508_v48 = vmax.f32 %v7122_v52, 0.0  ;;  %v8509_v13 = vmax.f32 %v8407_v41, 0.0  ;;  %v8510_v54 = vld [vmem:[#allocation106_spill] sm:$0xff]  ;;  %3554 = vst [vmem:[%s6793_s7 + $0x20] sm:$0xff] %v4043_v42  ;;  %v8518_v52 = vld [vmem:[#allocation109_spill] sm:$0xff]  ;;  %v8522_v24 = vld [vmem:[#allocation111_spill] sm:$0xff] }
 0x30e   : > { %v4048_v47 = vpack.c.bf16 %v8502_v55, %v8501_v19  ;;  %v8511_v23 = vmax.f32 %v8510_v54, 0.0  ;;  %v8513_v3 = vmax.f32 %v8512_v30, 0.0  ;;  %v8514_v49 = vmax.f32 %v7126_v62, 0.0  ;;  %3556 = vst [vmem:[%s6793_s7 + $0x30] sm:$0xff] %v4045_v0  ;;  %v8524_v57 = vld [vmem:[#allocation62_spill] sm:$0xff]  ;;  %3558 = vst [vmem:[%s6793_s7 + $0x40] sm:$0xff] %v4047_v39 }
 0x30f   : > { %v4050_v9 = vpack.c.bf16 %v8508_v48, %v8507_v8  ;;  %v8515_v36 = vmax.f32 %v8409_v15, 0.0  ;;  %v8517_v45 = vmax.f32 %v8516_v5, 0.0  ;;  %v8519_v41 = vmax.f32 %v8518_v52, 0.0  ;;  %v8528_v48 = vld [vmem:[#allocation64_spill] sm:$0xff]  ;;  %3557 = vst [vmem:[%s6793_s7 + $0x38] sm:$0xff] %v4046_v32  ;;  %3560 = vst [vmem:[%s6793_s7 + $0x50] sm:$0xff] %v4049_v25 }
 0x310   : > { %v4051_v44 = vpack.c.bf16 %v8511_v23, %v8509_v13  ;;  %v4052_v29 = vpack.c.bf16 %v8514_v49, %v8513_v3  ;;  %v8520_v55 = vmax.f32 %v7130_v14, 0.0  ;;  %v8521_v62 = vmax.f32 %v8411_v22, 0.0  ;;  %3559 = vst [vmem:[%s6793_s7 + $0x48] sm:$0xff] %v4048_v47  ;;  %v8530_v22 = vld [vmem:[#allocation16_spill] sm:$0xff]  ;;  %v8540_v5 = vld [vmem:[#allocation70_spill] sm:$0xff] }
 0x311   : > { %v4053_v19 = vpack.c.bf16 %v8517_v45, %v8515_v36  ;;  %v8523_v15 = vmax.f32 %v8522_v24, 0.0  ;;  %v8525_v8 = vmax.f32 %v8524_v57, 0.0  ;;  %v8526_v20 = vmax.f32 %v7134_v33, 0.0  ;;  %v8534_v30 = vld [vmem:[#allocation80_spill] sm:$0xff]  ;;  %3561 = vst [vmem:[%s6793_s7 + $0x58] sm:$0xff] %v4050_v9  ;;  %v8548_v24 = vld [vmem:[#allocation86_spill] sm:$0xff] }
 0x312   : > { %v4054_v10 = vpack.c.bf16 %v8520_v55, %v8519_v41  ;;  %v8527_v40 = vmax.f32 %v8413_v4, 0.0  ;;  %v8529_v0 = vmax.f32 %v8528_v48, 0.0  ;;  %v8531_v14 = vmax.f32 %v8530_v22, 0.0  ;;  %v8536_v49 = vld [vmem:[#allocation68_spill] sm:$0xff]  ;;  %3562 = vst [vmem:[%s6793_s7 + $0x60] sm:$0xff] %v4051_v44  ;;  %3563 = vst [vmem:[%s6793_s7 + $0x68] sm:$0xff] %v4052_v29 }
 0x313   : > { %v4055_v51 = vpack.c.bf16 %v8523_v15, %v8521_v62  ;;  %v4056_v42 = vpack.c.bf16 %v8526_v20, %v8525_v8  ;;  %v8532_v54 = vmax.f32 %v7138_v2, 0.0  ;;  %v8533_v33 = vmax.f32 %v8415_v34, 0.0  ;;  %3564 = vst [vmem:[%s6793_s7 + $0x70] sm:$0xff] %v4053_v19  ;;  %v8542_v34 = vld [vmem:[#allocation18_spill] sm:$0xff]  ;;  %v8546_v55 = vld [vmem:[#allocation20_spill] sm:$0xff]  ;;  %v8552_v57 = vld [vmem:[#allocation19_spill] sm:$0xff] }
 0x314   : > { %v4057_v13 = vpack.c.bf16 %v8529_v0, %v8527_v40  ;;  %v8535_v4 = vmax.f32 %v8534_v30, 0.0  ;;  %v8537_v36 = vmax.f32 %v8536_v49, 0.0  ;;  %v8538_v32 = vmax.f32 %v7142_v28, 0.0  ;;  %3565 = vst [vmem:[%s6793_s7 + $0x78] sm:$0xff] %v4054_v10  ;;  %v8558_v48 = vld [vmem:[#allocation26_spill] sm:$0xff]  ;;  %v8560_v22 = vld [vmem:[#allocation23_spill] sm:$0xff] }
 0x315   : > { %v4058_v23 = vpack.c.bf16 %v8532_v54, %v8531_v14  ;;  %v8539_v47 = vmax.f32 %v8417_v1, 0.0  ;;  %v8541_v25 = vmax.f32 %v8540_v5, 0.0  ;;  %v8543_v2 = vmax.f32 %v8542_v34, 0.0  ;;  %3566 = vst [vmem:[%s6793_s7 + $0x80] sm:$0xff] %v4055_v51  ;;  %3567 = vst [vmem:[%s6793_s7 + $0x88] sm:$0xff] %v4056_v42  ;;  %v8564_v54 = vld [vmem:[#allocation79_spill] sm:$0xff] }
 0x316   : > { %v4059_v3 = vpack.c.bf16 %v8535_v4, %v8533_v33  ;;  %v4060_v39 = vpack.c.bf16 %v8538_v32, %v8537_v36  ;;  %v8544_v52 = vmax.f32 %v7146_v17, 0.0  ;;  %v8545_v28 = vmax.f32 %v8419_v50, 0.0  ;;  %3568 = vst [vmem:[%s6793_s7 + $0x90] sm:$0xff] %v4057_v13  ;;  %v8554_v50 = vld [vmem:[#allocation24_spill] sm:$0xff]  ;;  %v8572_v32 = vld [vmem:[#allocation25_spill] sm:$0xff]  ;;  %v8576_v5 = vld [vmem:[#allocation27_spill] sm:$0xff] }
 0x317   : > { %v4061_v45 = vpack.c.bf16 %v8541_v25, %v8539_v47  ;;  %v8547_v1 = vmax.f32 %v8546_v55, 0.0  ;;  %v8549_v15 = vmax.f32 %v8548_v24, 0.0  ;;  %v8550_v9 = vmax.f32 %v7150_v26, 0.0  ;;  %3569 = vst [vmem:[%s6793_s7 + $0x98] sm:$0xff] %v4058_v23  ;;  %v8570_v49 = vld [vmem:[#allocation32_spill] sm:$0xff]  ;;  %v8584_v55 = vld [vmem:[#allocation31_spill] sm:$0xff] }
 0x318   : > { %v4062_v41 = vpack.c.bf16 %v8544_v52, %v8543_v2  ;;  %v8551_v29 = vmax.f32 %v8421_v43, 0.0  ;;  %v8553_v19 = vmax.f32 %v8552_v57, 0.0  ;;  %v8555_v17 = vmax.f32 %v8554_v50, 0.0  ;;  %3570 = vst [vmem:[%s6793_s7 + $0xa0] sm:$0xff] %v4059_v3  ;;  %3571 = vst [vmem:[%s6793_s7 + $0xa8] sm:$0xff] %v4060_v39  ;;  %v8582_v52 = vld [vmem:[#allocation38_spill] sm:$0xff] }
 0x319   : > { %v4063_v62 = vpack.c.bf16 %v8547_v1, %v8545_v28  ;;  %v4064_v44 = vpack.c.bf16 %v8550_v9, %v8549_v15  ;;  %v8556_v20 = vmax.f32 %v7154_v63, 0.0  ;;  %v8557_v26 = vmax.f32 %v8423_v53, 0.0  ;;  %3572 = vst [vmem:[%s6793_s7 + $0xb0] sm:$0xff] %v4061_v45  ;;  %v8566_v53 = vld [vmem:[#allocation30_spill] sm:$0xff]  ;;  %v8588_v15 = vld [vmem:[#allocation33_spill] sm:$0xff]  ;;  %v8596_v50 = vld [vmem:[#allocation44_spill] sm:$0xff] }
 0x31a   : > { %v4065_v8 = vpack.c.bf16 %v8553_v19, %v8551_v29  ;;  %v8559_v43 = vmax.f32 %v8558_v48, 0.0  ;;  %v8561_v14 = vmax.f32 %v8560_v22, 0.0  ;;  %v8562_v10 = vmax.f32 %v7158_v46, 0.0  ;;  %3573 = vst [vmem:[%s6793_s7 + $0xb8] sm:$0xff] %v4062_v41  ;;  %v8592_v29 = vld [vmem:[#allocation77_spill] sm:$0xff] }
 0x31b   : > { %v4066_v40 = vpack.c.bf16 %v8556_v20, %v8555_v17  ;;  %v8563_v42 = vmax.f32 %v8425_v31, 0.0  ;;  %v8565_v13 = vmax.f32 %v8564_v54, 0.0  ;;  %v8567_v63 = vmax.f32 %v8566_v53, 0.0  ;;  %3574 = vst [vmem:[%s6793_s7 + $0xc0] sm:$0xff] %v4063_v62  ;;  %3575 = vst [vmem:[%s6793_s7 + $0xc8] sm:$0xff] %v4064_v44  ;;  %v8598_v20 = vld [vmem:[#allocation37_spill] sm:$0xff] }
 0x31c   : > { %v4067_v0 = vpack.c.bf16 %v8559_v43, %v8557_v26  ;;  %v4068_v51 = vpack.c.bf16 %v8562_v10, %v8561_v14  ;;  %v8568_v30 = vmax.f32 %v7162_v60, 0.0  ;;  %v8569_v46 = vmax.f32 %v8427_v56, 0.0  ;;  %3576 = vst [vmem:[%s6793_s7 + $0xd0] sm:$0xff] %v4065_v8  ;;  %v8578_v56 = vld [vmem:[#allocation36_spill] sm:$0xff]  ;;  %v8594_v8 = vld [vmem:[#allocation35_spill] sm:$0xff] }
 0x31d   : > { %v4069_v33 = vpack.c.bf16 %v8565_v13, %v8563_v42  ;;  %v8571_v31 = vmax.f32 %v8570_v49, 0.0  ;;  %v8573_v47 = vmax.f32 %v8572_v32, 0.0  ;;  %v8574_v23 = vmax.f32 %v7166_v18, 0.0  ;;  %3577 = vst [vmem:[%s6793_s7 + $0xd8] sm:$0xff] %v4066_v40  ;;  %v8600_v40 = vld [vmem:[#allocation55_spill] sm:$0xff]  ;;  %v8606_v42 = vld [vmem:[#allocation48_spill] sm:$0xff] }
 0x31e   : > { %v4070_v4 = vpack.c.bf16 %v8568_v30, %v8567_v63  ;;  %v8575_v39 = vmax.f32 %v8429_v27, 0.0  ;;  %v8577_v25 = vmax.f32 %v8576_v5, 0.0  ;;  %v8579_v60 = vmax.f32 %v8578_v56, 0.0  ;;  %3578 = vst [vmem:[%s6793_s7 + $0xe0] sm:$0xff] %v4067_v0  ;;  %3579 = vst [vmem:[%s6793_s7 + $0xe8] sm:$0xff] %v4068_v51  ;;  %v8602_v0 = vld [vmem:[#allocation46_spill] sm:$0xff] }
 0x31f   : > { %v4071_v36 = vpack.c.bf16 %v8571_v31, %v8569_v46  ;;  %v4072_v3 = vpack.c.bf16 %v8574_v23, %v8573_v47  ;;  %v8580_v34 = vmax.f32 %v7170_v58, 0.0  ;;  %v8581_v18 = vmax.f32 %v8431_v12, 0.0  ;;  %3580 = vst [vmem:[%s6793_s7 + $0xf0] sm:$0xff] %v4069_v33  ;;  %v8590_v12 = vld [vmem:[#allocation42_spill] sm:$0xff]  ;;  %v8604_v14 = vld [vmem:[#allocation39_spill] sm:$0xff]  ;;  %v8608_v13 = vld [vmem:[#allocation57_spill] sm:$0xff] }
 0x320   : > { %v4073_v45 = vpack.c.bf16 %v8577_v25, %v8575_v39  ;;  %v8583_v27 = vmax.f32 %v8582_v52, 0.0  ;;  %v8585_v41 = vmax.f32 %v8584_v55, 0.0  ;;  %v8586_v1 = vmax.f32 %v7174_v16, 0.0  ;;  %3581 = vst [vmem:[%s6793_s7 + $0xf8] sm:$0xff] %v4070_v4  ;;  %v8610_v63 = vld [vmem:[#allocation41_spill] sm:$0xff]  ;;  %v8612_v46 = vld [vmem:[#allocation50_spill] sm:$0xff] }
 0x321   : > { %v4074_v2 = vpack.c.bf16 %v8580_v34, %v8579_v60  ;;  %v8587_v24 = vmax.f32 %v8433_v37, 0.0  ;;  %v8589_v9 = vmax.f32 %v8588_v15, 0.0  ;;  %v8591_v58 = vmax.f32 %v8590_v12, 0.0  ;;  %3582 = vst [vmem:[%s6793_s7 + $0x100] sm:$0xff] %v4071_v36  ;;  %3583 = vst [vmem:[%s6793_s7 + $0x108] sm:$0xff] %v4072_v3  ;;  %v8614_v32 = vld [vmem:[#allocation43_spill] sm:$0xff] }
 0x322   : > { %v4075_v28 = vpack.c.bf16 %v8583_v27, %v8581_v18  ;;  %v4076_v62 = vpack.c.bf16 %v8586_v1, %v8585_v41  ;;  %v8593_v57 = vmax.f32 %v8592_v29, 0.0  ;;  %v8595_v16 = vmax.f32 %v8594_v8, 0.0  ;;  %3584 = vst [vmem:[%s6793_s7 + $0x110] sm:$0xff] %v4073_v45  ;;  %v8616_v36 = vld [vmem:[#allocation59_spill] sm:$0xff]  ;;  %v8618_v3 = vld [vmem:[#allocation52_spill] sm:$0xff]  ;;  %v8620_v5 = vld [vmem:[#allocation45_spill] sm:$0xff] }
 0x323   : > { %v4077_v44 = vpack.c.bf16 %v8589_v9, %v8587_v24  ;;  %v8597_v17 = vmax.f32 %v8596_v50, 0.0  ;;  %v8599_v26 = vmax.f32 %v8598_v20, 0.0  ;;  %v8601_v48 = vmax.f32 %v8600_v40, 0.0  ;;  %3585 = vst [vmem:[%s6793_s7 + $0x118] sm:$0xff] %v4074_v2  ;;  %v8622_v56 = vld [vmem:[#allocation113_spill] sm:$0xff]  ;;  %v8626_v27 = vld [vmem:[#allocation54_spill] sm:$0xff] }
 0x324   : > { %v4078_v19 = vpack.c.bf16 %v8593_v57, %v8591_v58  ;;  %v8603_v22 = vmax.f32 %v8602_v0, 0.0  ;;  %v8605_v10 = vmax.f32 %v8604_v14, 0.0  ;;  %v8607_v54 = vmax.f32 %v8606_v42, 0.0  ;;  %3586 = vst [vmem:[%s6793_s7 + $0x120] sm:$0xff] %v4075_v28  ;;  %3587 = vst [vmem:[%s6793_s7 + $0x128] sm:$0xff] %v4076_v62  ;;  %v8624_v34 = vld [vmem:[#allocation61_spill] sm:$0xff] }
 0x325   : > { %v4079_v37 = vpack.c.bf16 %v8597_v17, %v8595_v16  ;;  %v4080_v43 = vpack.c.bf16 %v8601_v48, %v8599_v26  ;;  %v8609_v33 = vmax.f32 %v8608_v13, 0.0  ;;  %v8611_v30 = vmax.f32 %v8610_v63, 0.0  ;;  %3588 = vst [vmem:[%s6793_s7 + $0x130] sm:$0xff] %v4077_v44  ;;  %v8628_v41 = vld [vmem:[#allocation47_spill] sm:$0xff]  ;;  %v8630_v15 = vld [vmem:[#allocation114_spill] sm:$0xff]  ;;  %v8634_v12 = vld [vmem:[#allocation56_spill] sm:$0xff] }
 0x326   : > { %v4081_v51 = vpack.c.bf16 %v8605_v10, %v8603_v22  ;;  %v8613_v49 = vmax.f32 %v8612_v46, 0.0  ;;  %v8615_v4 = vmax.f32 %v8614_v32, 0.0  ;;  %v8617_v47 = vmax.f32 %v8616_v36, 0.0  ;;  %v8632_v28 = vld [vmem:[#allocation63_spill] sm:$0xff]  ;;  %v8636_v58 = vld [vmem:[#allocation49_spill] sm:$0xff]  ;;  %3589 = vst [vmem:[%s6793_s7 + $0x138] sm:$0xff] %v4078_v19 }
 0x327   : > { %v4082_v53 = vpack.c.bf16 %v8609_v33, %v8607_v54  ;;  %v8619_v39 = vmax.f32 %v8618_v3, 0.0  ;;  %v8621_v25 = vmax.f32 %v8620_v5, 0.0  ;;  %v8623_v60 = vmax.f32 %v8622_v56, 0.0  ;;  %3590 = vst [vmem:[%s6793_s7 + $0x140] sm:$0xff] %v4079_v37  ;;  %3591 = vst [vmem:[%s6793_s7 + $0x148] sm:$0xff] %v4080_v43  ;;  %v8638_v8 = vld [vmem:[#allocation115_spill] sm:$0xff] }
 0x328   : > { %v4083_v31 = vpack.c.bf16 %v8613_v49, %v8611_v30  ;;  %v4084_v23 = vpack.c.bf16 %v8617_v47, %v8615_v4  ;;  %v8625_v18 = vmax.f32 %v8624_v34, 0.0  ;;  %v8627_v55 = vmax.f32 %v8626_v27, 0.0  ;;  %3592 = vst [vmem:[%s6793_s7 + $0x150] sm:$0xff] %v4081_v51  ;;  %v8640_v50 = vld [vmem:[#allocation65_spill] sm:$0xff]  ;;  %v8642_v26 = vld [vmem:[#allocation58_spill] sm:$0xff]  ;;  %v8644_v48 = vld [vmem:[#allocation51_spill] sm:$0xff] }
 0x329   : > { %v4085_v45 = vpack.c.bf16 %v8621_v25, %v8619_v39  ;;  %v8629_v1 = vmax.f32 %v8628_v41, 0.0  ;;  %v8631_v2 = vmax.f32 %v8630_v15, 0.0  ;;  %v8633_v9 = vmax.f32 %v8632_v28, 0.0  ;;  %v8646_v14 = vld [vmem:[#allocation116_spill] sm:$0xff]  ;;  %v8648_v19 = vld [vmem:[#allocation67_spill] sm:$0xff]  ;;  %v8652_v51 = vld [vmem:[#allocation53_spill] sm:$0xff] }
 0x32a   : > { %v4086_v52 = vpack.c.bf16 %v8625_v18, %v8623_v60  ;;  %v8635_v44 = vmax.f32 %v8634_v12, 0.0  ;;  %v8637_v29 = vmax.f32 %v8636_v58, 0.0  ;;  %v8639_v16 = vmax.f32 %v8638_v8, 0.0  ;;  %v8650_v43 = vld [vmem:[#allocation60_spill] sm:$0xff]  ;;  %3593 = vst [vmem:[%s6793_s7 + $0x158] sm:$0xff] %v4082_v53  ;;  %3594 = vst [vmem:[%s6793_s7 + $0x160] sm:$0xff] %v4083_v31 }
 0x32b   : > { %v4087_v24 = vpack.c.bf16 %v8629_v1, %v8627_v55  ;;  %v4088_v62 = vpack.c.bf16 %v8633_v9, %v8631_v2  ;;  %v8641_v17 = vmax.f32 %v8640_v50, 0.0  ;;  %v8643_v40 = vmax.f32 %v8642_v26, 0.0  ;;  %3595 = vst [vmem:[%s6793_s7 + $0x168] sm:$0xff] %v4084_v23  ;;  %3596 = vst [vmem:[%s6793_s7 + $0x170] sm:$0xff] %v4085_v45  ;;  %v8654_v63 = vld [vmem:[#allocation117_spill] sm:$0xff]  ;;  %v8662_v3 = vld [vmem:[#allocation83_spill] sm:$0xff] }
 0x32c   : > { %v4089_v57 = vpack.c.bf16 %v8637_v29, %v8635_v44  ;;  %v8645_v0 = vmax.f32 %v8644_v48, 0.0  ;;  %v8647_v10 = vmax.f32 %v8646_v14, 0.0  ;;  %v8649_v37 = vmax.f32 %v8648_v19, 0.0  ;;  %v8656_v46 = vld [vmem:[#allocation69_spill] sm:$0xff]  ;;  %3597 = vst [vmem:[%s6793_s7 + $0x178] sm:$0xff] %v4086_v52  ;;  %v8670_v56 = vld [vmem:[#allocation90_spill] sm:$0xff] }
 0x32d   : > { %v4090_v20 = vpack.c.bf16 %v8641_v17, %v8639_v16  ;;  %v8651_v54 = vmax.f32 %v8650_v43, 0.0  ;;  %v8653_v13 = vmax.f32 %v8652_v51, 0.0  ;;  %v8655_v30 = vmax.f32 %v8654_v63, 0.0  ;;  %3598 = vst [vmem:[%s6793_s7 + $0x180] sm:$0xff] %v4087_v24  ;;  %3599 = vst [vmem:[%s6793_s7 + $0x188] sm:$0xff] %v4088_v62  ;;  %v8672_v18 = vld [vmem:[#allocation122_spill] sm:$0xff] }
 0x32e   : > { %v4091_v22 = vpack.c.bf16 %v8645_v0, %v8643_v40  ;;  %v4092_v42 = vpack.c.bf16 %v8649_v37, %v8647_v10  ;;  %v8657_v49 = vmax.f32 %v8656_v46, 0.0  ;;  %v8658_v4 = vmax.f32 %v8463_v7, 0.0  ;;  %3600 = vst [vmem:[%s6793_s7 + $0x190] sm:$0xff] %v4089_v57  ;;  %v8674_v27 = vld [vmem:[#allocation73_spill] sm:$0xff] }
 0x32f   : > { %v4093_v33 = vpack.c.bf16 %v8653_v13, %v8651_v54  ;;  %v8659_v53 = vmax.f32 %v8464_v38, 0.0  ;;  %v8660_v36 = vmax.f32 %v8465_v61, 0.0  ;;  %v8661_v47 = vmax.f32 %v8466_v6, 0.0  ;;  %v8665_v38 = vld [vmem:[#allocation121_spill] sm:$0xff]  ;;  %v8667_v6 = vld [vmem:[#allocation72_spill] sm:$0xff]  ;;  %3601 = vst [vmem:[%s6793_s7 + $0x198] sm:$0xff] %v4090_v20 }
 0x330   : > { %v4094_v32 = vpack.c.bf16 %v8657_v49, %v8655_v30  ;;  %v8663_v39 = vmax.f32 %v8662_v3, 0.0  ;;  %v8664_v5 = vmax.f32 %v8468_v21, 0.0  ;;  %v8666_v61 = vmax.f32 %v8665_v38, 0.0  ;;  %3602 = vst [vmem:[%s6793_s7 + $0x1a0] sm:$0xff] %v4091_v22  ;;  %3603 = vst [vmem:[%s6793_s7 + $0x1a8] sm:$0xff] %v4092_v42 }
 0x331   : > { %v4095_v31 = vpack.c.bf16 %v8659_v53, %v8658_v4  ;;  %v4096_v23 = vpack.c.bf16 %v8661_v47, %v8660_v36  ;;  %v8668_v7 = vmax.f32 %v8667_v6, 0.0  ;;  %v8669_v21 = vmax.f32 %v8471_v35, 0.0  ;;  %3604 = vst [vmem:[%s6793_s7 + $0x1b0] sm:$0xff] %v4093_v33 }
 0x332   : > { %v4097_v25 = vpack.c.bf16 %v8664_v5, %v8663_v39  ;;  %v8671_v60 = vmax.f32 %v8670_v56, 0.0  ;;  %v8673_v52 = vmax.f32 %v8672_v18, 0.0  ;;  %v8675_v55 = vmax.f32 %v8674_v27, 0.0  ;;  %3605 = vst [vmem:[%s6793_s7 + $0x1b8] sm:$0xff] %v4094_v32 }
 0x333   : > { %v4098_v45 = vpack.c.bf16 %v8668_v7, %v8666_v61  ;;  %v8676_v1 = vmax.f32 %v8474_v59, 0.0  ;;  %v8677_v24 = vmax.f32 %v8475_v11, 0.0  ;;  %3606 = vst [vmem:[%s6793_s7 + $0x1c0] sm:$0xff] %v4095_v31  ;;  %3607 = vst [vmem:[%s6793_s7 + $0x1c8] sm:$0xff] %v4096_v23 }
 0x334   : > { %v4099_v34 = vpack.c.bf16 %v8671_v60, %v8669_v21  ;;  %v4100_v41 = vpack.c.bf16 %v8675_v55, %v8673_v52  ;;  %3608 = vst [vmem:[%s6793_s7 + $0x1d0] sm:$0xff] %v4097_v25 }
 0x335   : > { %v4101_v15 = vpack.c.bf16 %v8677_v24, %v8676_v1  ;;  %3609 = vst [vmem:[%s6793_s7 + $0x1d8] sm:$0xff] %v4098_v45 }
 0x336   : > { %3610 = vst [vmem:[%s6793_s7 + $0x1e0] sm:$0xff] %v4099_v34  ;;  %3611 = vst [vmem:[%s6793_s7 + $0x1e8] sm:$0xff] %v4100_v41 }
 0x337   : > { %3612 = vst [vmem:[%s6793_s7 + $0x1f0] sm:$0xff] %v4101_v15 }
 0x338   : > { %4597 = shalt.err (!%p4594_p10)
}
 0x339   : > { %s4598_s26 = scalar_lea.hbm %s7622_s14, 8192  ;;  %s4602_s11 = scalar_lea.hbm %s7719_s4, 16384 }
 0x33a   : > { %p4599_p4 = scmp.ne.s32.totalorder %s7622_s14, %s4598_s26  ;;  %p4603_p13 = scmp.lt.s32.totalorder %s7622_s14, %s7719_s4 }
 0x33b   : > { %p4604_p8 = scmp.lt.s32.totalorder %s4602_s11, %s4598_s26 }
 0x33c   : > { %p4600_p7 = pnand %p4599_p4, %p8678_p3 }
 0x33d   : > { %p4605_p6 = por %p4604_p8, %p4603_p13 }
 0x33e   : > { %p4601_p11 = pneg %p4600_p7 }
 0x340   : > { %p4606_p2 = pnand %p4605_p6, %p4601_p11 }
 0x342   : > { %4609 = shalt.err (!%p4606_p2)
}
 0x343   : > { %s4667_s27 = smov 256   ;;  %s4668_s10 = smov 512  }
 0x344   : > { %s4669_s7 = smov 16  }
 0x345   : > { %4114 = dma.vmem_to_hbm [thread:$0]  (%p8678_p3), %s7644_s30, 8192, %s7622_s14, %s3615_s1, %s4667_s27, %s4668_s10, %s4669_s7  }
 0x346 PF: > { %s3643_s23 = sand.u32 1, %s4644_s15   ;;  %p8679_p12 = scmp.ne.s32.totalorder %s7935_s5, 0 }
 0x347   : > { %p8680_p0 = scmp.ge.s32.totalorder %s4656_s18, 2  ;;  %s3644_s8 = scalar_lea.sflag [#allocation4], %s3643_s23 }
 0x349   : > { %p4131_p1 = pnand %p8680_p0, %p8679_p12 }
 0x34b   : > { %p4132_p5 = pneg %p4131_p1 }
 0x34d   : > { %4639 = dma.done.wait (%p4132_p5), %s3644_s8, 8192  }
 0x34e   : > { %4641 = vsyncadd (%p4132_p5), %s3644_s8, 4294959104  ;;  %s8681_s13 = sld [smem:[#allocation15_spill]]  ;;  %p21_p9 = scmp.ge.s32.totalorder %s4716_s19, 4  }
 0x34f   : > { %s8682_s15 = smov %s4648_s16  ;;  %s8683_s16 = smov %s4652_s17 }
 0x350   : > { %s8685_s18 = smov %s4716_s19  ;;  %23 = sbr.rel (!%p21_p9) target bundleno = 10 (0xa), region = 110 }
 0x354   : > { %s8684_s17 = smov %s8681_s13 }
 0x355   :  { %3649 = vsyncpa [#allocation3], 1 }
 0x356   :  { %3651 = vsyncpa [#allocation3 + $0x1], 1 }
 0x357   :  { %3652 = vsyncpa [#allocation6], 1 }
 0x358   :  { %3654 = vsyncpa [#allocation6 + $0x1], 1 }
 0x359   :  { %3655 = vsyncpa [#allocation9], 1 }
 0x35a   :  { %3657 = vsyncpa [#allocation9 + $0x1], 1 }
 0x35b   :  { %3658 = vsyncpa [#allocation4], 1 }
 0x35c   :  { %3660 = vsyncpa [#allocation4 + $0x1], 1 }

</bundles_post_ra>
